<compile_context>
chip_gen: v7x
topology: tpu7x:2x2x1
jax: 0.10.0
libtpu: 0.0.40
codegen_flags: <defaults>
</compile_context>

<pallas_src>
import jax
import jax.numpy as jnp
from jax.experimental import pallas as pl
from jax.experimental.pallas import tpu as pltpu

_EPS = 1e-5
_LANE = 128
_DIMS_OUT = (512, 1024, 512, 256, 64)   # LN layers 1..5 output widths
_SLAB_W = 1024                          # widest layer -> slab lane width
_SLAB_ROWS = 16                         # 5 layers * (b, gamma, beta) + b6


def _fused_mlp_kernel(x_ref, w1, w2_hbm, w3_hbm, w4, w5, w6, prm,
                      o_ref, w2_vmem, w3_vmem, dma_sem):
    """Whole 6-layer MLP in one kernel; activations never leave VMEM/vregs."""

    # Kick off the two big weight fetches immediately; overlap with compute.
    cp2 = pltpu.make_async_copy(w2_hbm, w2_vmem, dma_sem.at[0])
    cp3 = pltpu.make_async_copy(w3_hbm, w3_vmem, dma_sem.at[1])
    cp2.start()
    cp3.start()

    def stage(h, w, row, dout):
        # MXU matmul (bf16 x bf16 -> f32 accum); LN/ReLU on VPU; rsqrt on EUP.
        z = jnp.dot(h, w, preferred_element_type=jnp.float32)
        z = z + prm[row:row + 1, :dout]                       # bias
        mu = jnp.mean(z, axis=-1, keepdims=True)
        var = jnp.mean(jnp.square(z - mu), axis=-1, keepdims=True)
        zn = (z - mu) * jax.lax.rsqrt(var + _EPS)
        y = jnp.maximum(zn * prm[row + 1:row + 2, :dout]      # gamma
                        + prm[row + 2:row + 3, :dout], 0.0)   # beta
        return y.astype(jnp.bfloat16)   # feed next MXU stage in bf16

    h = x_ref[...]
    h = stage(h, w1[...], 0, 512)
    cp2.wait()
    h = stage(h, w2_vmem[...], 3, 1024)
    cp3.wait()
    h = stage(h, w3_vmem[...], 6, 512)
    h = stage(h, w4[...], 9, 256)
    h = stage(h, w5[...], 12, 64)
    # Final plain linear, written to a lane-dense (B, 128) slab (padded lanes
    # of w6/b6 are zero, so they contribute exactly 0 and are sliced off).
    o_ref[...] = (
        jnp.dot(h, w6[...], preferred_element_type=jnp.float32)
        + prm[15:16, :o_ref.shape[-1]]
    )


def _full_spec(shape):
    # Full-array block, single grid step -> loaded into VMEM exactly once.
    return pl.BlockSpec(shape, lambda i: (0,) * len(shape))


def pack_params(p):
    """One-time packing (run OUTSIDE jit / at init):
       - weights pre-cast to bf16, w6/b6 pre-padded to 128 output lanes,
       - all biases / LN gammas / LN betas packed into one (16, 1024) f32 slab.
    """
    k = p["b6"].shape[0]
    k_pad = ((k + _LANE - 1) // _LANE) * _LANE

    slab = jnp.zeros((_SLAB_ROWS, _SLAB_W), jnp.float32)
    for li, dout in enumerate(_DIMS_OUT, start=1):
        r = 3 * (li - 1)
        slab = slab.at[r, :dout].set(p[f"b{li}"])
        slab = slab.at[r + 1, :dout].set(p[f"g{li}"])
        slab = slab.at[r + 2, :dout].set(p[f"beta{li}"])
    slab = slab.at[15, :k].set(p["b6"])

    w6 = jnp.zeros((p["w6"].shape[0], k_pad), jnp.float32).at[:, :k].set(p["w6"])

    return {
        "w1": p["w1"].astype(jnp.bfloat16),
        "w2": p["w2"].astype(jnp.bfloat16),
        "w3": p["w3"].astype(jnp.bfloat16),
        "w4": p["w4"].astype(jnp.bfloat16),
        "w5": p["w5"].astype(jnp.bfloat16),
        "w6": w6.astype(jnp.bfloat16),
        "slab": slab,
    }
    # TODO(synk): on v7x, w2/w3 could additionally be stored fp8(e4m3) with the
    # scale folded into the following LN gamma/beta (int8 on v5e/v6e); skipped
    # here pending an accuracy check for this regression head.


def rot_vec_global_forward(x, pp, k):
    """x: (B, F) float32; pp: packed params from pack_params. Returns (B, k)."""
    B, F = x.shape
    k_pad = pp["w6"].shape[1]

    in_specs = [
        _full_spec((B, F)),                      # x
        _full_spec(pp["w1"].shape),              # w1 (auto-DMA, prologue)
        pl.BlockSpec(memory_space=pl.ANY),       # w2 -> manual overlapped DMA
        pl.BlockSpec(memory_space=pl.ANY),       # w3 -> manual overlapped DMA
        _full_spec(pp["w4"].shape),              # w4
        _full_spec(pp["w5"].shape),              # w5
        _full_spec(pp["w6"].shape),              # w6 (lane-padded)
        _full_spec((_SLAB_ROWS, _SLAB_W)),       # packed bias/LN slab
    ]

    out = pl.pallas_call(
        _fused_mlp_kernel,
        out_shape=jax.ShapeDtypeStruct((B, k_pad), jnp.float32),
        grid=(1,),
        in_specs=in_specs,
        out_specs=_full_spec((B, k_pad)),
        scratch_shapes=[
            pltpu.VMEM(pp["w2"].shape, jnp.bfloat16),
            pltpu.VMEM(pp["w3"].shape, jnp.bfloat16),
            pltpu.SemaphoreType.DMA((2,)),
        ],
        compiler_params=pltpu.CompilerParams(
            dimension_semantics=("arbitrary",),
            vmem_limit_bytes=8 * 1024 * 1024,
        ),
    )(x.astype(jnp.bfloat16), pp["w1"], pp["w2"], pp["w3"],
      pp["w4"], pp["w5"], pp["w6"], pp["slab"])
    return out[:, :k]


def init_params(key, input_c, k):
    dims = [input_c, 512, 1024, 512, 256, 64, k]
    params = {}
    keys = jax.random.split(key, 2 * (len(dims) - 1))
    for li in range(len(dims) - 1):
        din, dout = dims[li], dims[li + 1]
        bound = 1.0 / jnp.sqrt(din)
        params[f"w{li + 1}"] = jax.random.uniform(
            keys[2 * li], (din, dout), jnp.float32, -bound, bound)
        params[f"b{li + 1}"] = jax.random.uniform(
            keys[2 * li + 1], (dout,), jnp.float32, -bound, bound)
        if li < len(dims) - 2:  # LayerNorm after layers 1..5
            params[f"g{li + 1}"] = jnp.ones((dout,), jnp.float32)
            params[f"beta{li + 1}"] = jnp.zeros((dout,), jnp.float32)
    return params


def _reference_forward(x, p):
    # Pure-JAX reference mirroring the kernel's bf16 weight/activation storage
    # (products exact in f32; only accumulation order differs).
    def q(a):
        return a.astype(jnp.bfloat16).astype(jnp.float32)

    h = q(x)
    for li in range(1, 6):
        h = h @ q(p[f"w{li}"]) + p[f"b{li}"]
        mu = jnp.mean(h, axis=-1, keepdims=True)
        var = jnp.mean(jnp.square(h - mu), axis=-1, keepdims=True)
        h = (h - mu) * jax.lax.rsqrt(var + _EPS)
        h = jnp.maximum(h * p[f"g{li}"] + p[f"beta{li}"], 0.0)
        h = q(h)
    return h @ q(p["w6"]) + p["b6"]


if __name__ == "__main__":
    B = 8          # batch
    INPUT_C = 256  # self.f
    R_C = 4        # FLAGS.R_c (rotation vector dim)

    key = jax.random.PRNGKey(0)
    kx, kp = jax.random.split(key)
    x = jax.random.normal(kx, (B, INPUT_C), jnp.float32)
    params = init_params(kp, INPUT_C, R_C)

    packed = pack_params(params)            # one-time, outside jit
    packed = jax.device_put(packed)

    fwd = jax.jit(rot_vec_global_forward, static_argnums=2)
    out = jax.block_until_ready(fwd(x, packed, R_C))

    ref = _reference_forward(x, params)
    assert out.shape == (B, R_C)
    assert jnp.allclose(out, ref, atol=2e-3, rtol=2e-3), (
        float(jnp.max(jnp.abs(out - ref))))

    print("KERNEL_OK")
</pallas_src>

<mosaic_0001>
module attributes {stable_mosaic.version = 11 : i64} {
  func.func @_fused_mlp_kernel(%arg0: i32, %arg1: memref<8x256xbf16, #tpu.memory_space<vmem>>, %arg2: memref<256x512xbf16, #tpu.memory_space<vmem>>, %arg3: memref<512x1024xbf16, #tpu.memory_space<any>>, %arg4: memref<1024x512xbf16, #tpu.memory_space<any>>, %arg5: memref<512x256xbf16, #tpu.memory_space<vmem>>, %arg6: memref<256x64xbf16, #tpu.memory_space<vmem>>, %arg7: memref<64x128xbf16, #tpu.memory_space<vmem>>, %arg8: memref<16x1024xf32, #tpu.memory_space<vmem>>, %arg9: memref<8x128xf32, #tpu.memory_space<vmem>>, %arg10: memref<512x1024xbf16, #tpu.memory_space<vmem>>, %arg11: memref<1024x512xbf16, #tpu.memory_space<vmem>>, %arg12: memref<2x!tpu.dma_semaphore, #tpu.memory_space<semaphore_mem>>) attributes {dimension_semantics = [#tpu.dimension_semantics<arbitrary>], iteration_bounds = array<i64: 1>, scalar_prefetch = 0 : i64, scratch_operands = 3 : i64, tpu.core_type = #tpu.core_type<tc>, window_params = [{pipeline_mode = #tpu.pipeline_mode<synchronous>, transform_indices = @transform_0, window_bounds = array<i64: 8, 256>}, {pipeline_mode = #tpu.pipeline_mode<synchronous>, transform_indices = @transform_1, window_bounds = array<i64: 256, 512>}, {}, {}, {pipeline_mode = #tpu.pipeline_mode<synchronous>, transform_indices = @transform_4, window_bounds = array<i64: 512, 256>}, {pipeline_mode = #tpu.pipeline_mode<synchronous>, transform_indices = @transform_5, window_bounds = array<i64: 256, 64>}, {pipeline_mode = #tpu.pipeline_mode<synchronous>, transform_indices = @transform_6, window_bounds = array<i64: 64, 128>}, {pipeline_mode = #tpu.pipeline_mode<synchronous>, transform_indices = @transform_7, window_bounds = array<i64: 16, 1024>}, {pipeline_mode = #tpu.pipeline_mode<synchronous>, transform_indices = @transform_8, window_bounds = array<i64: 8, 128>}]} {
    %c0_i32 = arith.constant 0 : i32
    %0 = tpu.memref_slice %arg12[%c0_i32] : memref<2x!tpu.dma_semaphore, #tpu.memory_space<semaphore_mem>> -> memref<1x!tpu.dma_semaphore, #tpu.memory_space<semaphore_mem>>
    %1 = tpu.memref_squeeze %0 : memref<1x!tpu.dma_semaphore, #tpu.memory_space<semaphore_mem>> -> memref<!tpu.dma_semaphore, #tpu.memory_space<semaphore_mem>>
    tpu.enqueue_dma source(%arg3 : memref<512x1024xbf16, #tpu.memory_space<any>>) target(%arg10 : memref<512x1024xbf16, #tpu.memory_space<vmem>>) target_semaphore(%1 : memref<!tpu.dma_semaphore, #tpu.memory_space<semaphore_mem>>)
    %c1_i32 = arith.constant 1 : i32
    %2 = tpu.memref_slice %arg12[%c1_i32] : memref<2x!tpu.dma_semaphore, #tpu.memory_space<semaphore_mem>> -> memref<1x!tpu.dma_semaphore, #tpu.memory_space<semaphore_mem>>
    %3 = tpu.memref_squeeze %2 : memref<1x!tpu.dma_semaphore, #tpu.memory_space<semaphore_mem>> -> memref<!tpu.dma_semaphore, #tpu.memory_space<semaphore_mem>>
    tpu.enqueue_dma source(%arg4 : memref<1024x512xbf16, #tpu.memory_space<any>>) target(%arg11 : memref<1024x512xbf16, #tpu.memory_space<vmem>>) target_semaphore(%3 : memref<!tpu.dma_semaphore, #tpu.memory_space<semaphore_mem>>)
    %c0 = arith.constant 0 : index
    %c0_0 = arith.constant 0 : index
    %4 = vector.load %arg1[%c0, %c0_0] : memref<8x256xbf16, #tpu.memory_space<vmem>>, vector<8x256xbf16>
    %c0_1 = arith.constant 0 : index
    %c0_2 = arith.constant 0 : index
    %5 = vector.load %arg2[%c0_1, %c0_2] : memref<256x512xbf16, #tpu.memory_space<vmem>>, vector<256x512xbf16>
    %cst = arith.constant dense<0.000000e+00> : vector<8x512xf32>
    %6 = tpu.matmul %4, %5, %cst {dimension_numbers = #tpu.dot_dimension_numbers<[1], [0], [0], [1], [0, 0, 1, 1], [], []>} : vector<8x256xbf16>, vector<256x512xbf16>, vector<8x512xf32> -> vector<8x512xf32>
    %c0_3 = arith.constant 0 : index
    %c0_4 = arith.constant 0 : index
    %7 = vector.load %arg8[%c0_3, %c0_4] : memref<16x1024xf32, #tpu.memory_space<vmem>>, vector<1x512xf32>
    %8 = vector.broadcast %7 : vector<1x512xf32> to vector<8x512xf32>
    %9 = arith.addf %6, %8 : vector<8x512xf32>
    %cst_5 = arith.constant dense<0.000000e+00> : vector<8xf32>
    %10 = vector.multi_reduction <add>, %9, %cst_5 [1] : vector<8x512xf32> to vector<8xf32>
    %11 = vector.shape_cast %10 : vector<8xf32> to vector<8x1xf32>
    %cst_6 = arith.constant 5.120000e+02 : f32
    %12 = vector.broadcast %cst_6 : f32 to vector<8x1xf32>
    %13 = arith.divf %11, %12 : vector<8x1xf32>
    %14 = vector.broadcast %13 : vector<8x1xf32> to vector<8x512xf32>
    %15 = arith.subf %9, %14 : vector<8x512xf32>
    %16 = arith.mulf %15, %15 : vector<8x512xf32>
    %cst_7 = arith.constant dense<0.000000e+00> : vector<8xf32>
    %17 = vector.multi_reduction <add>, %16, %cst_7 [1] : vector<8x512xf32> to vector<8xf32>
    %18 = vector.shape_cast %17 : vector<8xf32> to vector<8x1xf32>
    %cst_8 = arith.constant 5.120000e+02 : f32
    %19 = vector.broadcast %cst_8 : f32 to vector<8x1xf32>
    %20 = arith.divf %18, %19 : vector<8x1xf32>
    %21 = vector.broadcast %13 : vector<8x1xf32> to vector<8x512xf32>
    %22 = arith.subf %9, %21 : vector<8x512xf32>
    %cst_9 = arith.constant 9.99999974E-6 : f32
    %23 = vector.broadcast %cst_9 : f32 to vector<8x1xf32>
    %24 = arith.addf %20, %23 : vector<8x1xf32>
    %25 = math.rsqrt %24 : vector<8x1xf32>
    %26 = vector.broadcast %25 : vector<8x1xf32> to vector<8x512xf32>
    %27 = arith.mulf %22, %26 : vector<8x512xf32>
    %c1 = arith.constant 1 : index
    %c0_10 = arith.constant 0 : index
    %28 = vector.load %arg8[%c1, %c0_10] : memref<16x1024xf32, #tpu.memory_space<vmem>>, vector<1x512xf32>
    %29 = vector.broadcast %28 : vector<1x512xf32> to vector<8x512xf32>
    %30 = arith.mulf %27, %29 : vector<8x512xf32>
    %c2 = arith.constant 2 : index
    %c0_11 = arith.constant 0 : index
    %31 = vector.load %arg8[%c2, %c0_11] : memref<16x1024xf32, #tpu.memory_space<vmem>>, vector<1x512xf32>
    %32 = vector.broadcast %31 : vector<1x512xf32> to vector<8x512xf32>
    %33 = arith.addf %30, %32 : vector<8x512xf32>
    %cst_12 = arith.constant 0.000000e+00 : f32
    %34 = vector.broadcast %cst_12 : f32 to vector<8x512xf32>
    %35 = arith.maximumf %33, %34 : vector<8x512xf32>
    %36 = arith.truncf %35 : vector<8x512xf32> to vector<8x512xbf16>
    %c0_i32_13 = arith.constant 0 : i32
    %37 = tpu.memref_slice %arg12[%c0_i32_13] : memref<2x!tpu.dma_semaphore, #tpu.memory_space<semaphore_mem>> -> memref<1x!tpu.dma_semaphore, #tpu.memory_space<semaphore_mem>>
    %38 = tpu.memref_squeeze %37 : memref<1x!tpu.dma_semaphore, #tpu.memory_space<semaphore_mem>> -> memref<!tpu.dma_semaphore, #tpu.memory_space<semaphore_mem>>
    tpu.wait_dma2 semaphore(%38 : memref<!tpu.dma_semaphore, #tpu.memory_space<semaphore_mem>>) src(%arg3 : memref<512x1024xbf16, #tpu.memory_space<any>>) dst(%arg10 : memref<512x1024xbf16, #tpu.memory_space<vmem>>)
    %c0_14 = arith.constant 0 : index
    %c0_15 = arith.constant 0 : index
    %39 = vector.load %arg10[%c0_14, %c0_15] : memref<512x1024xbf16, #tpu.memory_space<vmem>>, vector<512x1024xbf16>
    %cst_16 = arith.constant dense<0.000000e+00> : vector<8x1024xf32>
    %40 = tpu.matmul %36, %39, %cst_16 {dimension_numbers = #tpu.dot_dimension_numbers<[1], [0], [0], [1], [0, 0, 1, 1], [], []>} : vector<8x512xbf16>, vector<512x1024xbf16>, vector<8x1024xf32> -> vector<8x1024xf32>
    %c3 = arith.constant 3 : index
    %c0_17 = arith.constant 0 : index
    %41 = vector.load %arg8[%c3, %c0_17] : memref<16x1024xf32, #tpu.memory_space<vmem>>, vector<1x1024xf32>
    %42 = vector.broadcast %41 : vector<1x1024xf32> to vector<8x1024xf32>
    %43 = arith.addf %40, %42 : vector<8x1024xf32>
    %cst_18 = arith.constant dense<0.000000e+00> : vector<8xf32>
    %44 = vector.multi_reduction <add>, %43, %cst_18 [1] : vector<8x1024xf32> to vector<8xf32>
    %45 = vector.shape_cast %44 : vector<8xf32> to vector<8x1xf32>
    %cst_19 = arith.constant 1.024000e+03 : f32
    %46 = vector.broadcast %cst_19 : f32 to vector<8x1xf32>
    %47 = arith.divf %45, %46 : vector<8x1xf32>
    %48 = vector.broadcast %47 : vector<8x1xf32> to vector<8x1024xf32>
    %49 = arith.subf %43, %48 : vector<8x1024xf32>
    %50 = arith.mulf %49, %49 : vector<8x1024xf32>
    %cst_20 = arith.constant dense<0.000000e+00> : vector<8xf32>
    %51 = vector.multi_reduction <add>, %50, %cst_20 [1] : vector<8x1024xf32> to vector<8xf32>
    %52 = vector.shape_cast %51 : vector<8xf32> to vector<8x1xf32>
    %cst_21 = arith.constant 1.024000e+03 : f32
    %53 = vector.broadcast %cst_21 : f32 to vector<8x1xf32>
    %54 = arith.divf %52, %53 : vector<8x1xf32>
    %55 = vector.broadcast %47 : vector<8x1xf32> to vector<8x1024xf32>
    %56 = arith.subf %43, %55 : vector<8x1024xf32>
    %cst_22 = arith.constant 9.99999974E-6 : f32
    %57 = vector.broadcast %cst_22 : f32 to vector<8x1xf32>
    %58 = arith.addf %54, %57 : vector<8x1xf32>
    %59 = math.rsqrt %58 : vector<8x1xf32>
    %60 = vector.broadcast %59 : vector<8x1xf32> to vector<8x1024xf32>
    %61 = arith.mulf %56, %60 : vector<8x1024xf32>
    %c4 = arith.constant 4 : index
    %c0_23 = arith.constant 0 : index
    %62 = vector.load %arg8[%c4, %c0_23] : memref<16x1024xf32, #tpu.memory_space<vmem>>, vector<1x1024xf32>
    %63 = vector.broadcast %62 : vector<1x1024xf32> to vector<8x1024xf32>
    %64 = arith.mulf %61, %63 : vector<8x1024xf32>
    %c5 = arith.constant 5 : index
    %c0_24 = arith.constant 0 : index
    %65 = vector.load %arg8[%c5, %c0_24] : memref<16x1024xf32, #tpu.memory_space<vmem>>, vector<1x1024xf32>
    %66 = vector.broadcast %65 : vector<1x1024xf32> to vector<8x1024xf32>
    %67 = arith.addf %64, %66 : vector<8x1024xf32>
    %cst_25 = arith.constant 0.000000e+00 : f32
    %68 = vector.broadcast %cst_25 : f32 to vector<8x1024xf32>
    %69 = arith.maximumf %67, %68 : vector<8x1024xf32>
    %70 = arith.truncf %69 : vector<8x1024xf32> to vector<8x1024xbf16>
    %c1_i32_26 = arith.constant 1 : i32
    %71 = tpu.memref_slice %arg12[%c1_i32_26] : memref<2x!tpu.dma_semaphore, #tpu.memory_space<semaphore_mem>> -> memref<1x!tpu.dma_semaphore, #tpu.memory_space<semaphore_mem>>
    %72 = tpu.memref_squeeze %71 : memref<1x!tpu.dma_semaphore, #tpu.memory_space<semaphore_mem>> -> memref<!tpu.dma_semaphore, #tpu.memory_space<semaphore_mem>>
    tpu.wait_dma2 semaphore(%72 : memref<!tpu.dma_semaphore, #tpu.memory_space<semaphore_mem>>) src(%arg4 : memref<1024x512xbf16, #tpu.memory_space<any>>) dst(%arg11 : memref<1024x512xbf16, #tpu.memory_space<vmem>>)
    %c0_27 = arith.constant 0 : index
    %c0_28 = arith.constant 0 : index
    %73 = vector.load %arg11[%c0_27, %c0_28] : memref<1024x512xbf16, #tpu.memory_space<vmem>>, vector<1024x512xbf16>
    %cst_29 = arith.constant dense<0.000000e+00> : vector<8x512xf32>
    %74 = tpu.matmul %70, %73, %cst_29 {dimension_numbers = #tpu.dot_dimension_numbers<[1], [0], [0], [1], [0, 0, 1, 1], [], []>} : vector<8x1024xbf16>, vector<1024x512xbf16>, vector<8x512xf32> -> vector<8x512xf32>
    %c6 = arith.constant 6 : index
    %c0_30 = arith.constant 0 : index
    %75 = vector.load %arg8[%c6, %c0_30] : memref<16x1024xf32, #tpu.memory_space<vmem>>, vector<1x512xf32>
    %76 = vector.broadcast %75 : vector<1x512xf32> to vector<8x512xf32>
    %77 = arith.addf %74, %76 : vector<8x512xf32>
    %cst_31 = arith.constant dense<0.000000e+00> : vector<8xf32>
    %78 = vector.multi_reduction <add>, %77, %cst_31 [1] : vector<8x512xf32> to vector<8xf32>
    %79 = vector.shape_cast %78 : vector<8xf32> to vector<8x1xf32>
    %cst_32 = arith.constant 5.120000e+02 : f32
    %80 = vector.broadcast %cst_32 : f32 to vector<8x1xf32>
    %81 = arith.divf %79, %80 : vector<8x1xf32>
    %82 = vector.broadcast %81 : vector<8x1xf32> to vector<8x512xf32>
    %83 = arith.subf %77, %82 : vector<8x512xf32>
    %84 = arith.mulf %83, %83 : vector<8x512xf32>
    %cst_33 = arith.constant dense<0.000000e+00> : vector<8xf32>
    %85 = vector.multi_reduction <add>, %84, %cst_33 [1] : vector<8x512xf32> to vector<8xf32>
    %86 = vector.shape_cast %85 : vector<8xf32> to vector<8x1xf32>
    %cst_34 = arith.constant 5.120000e+02 : f32
    %87 = vector.broadcast %cst_34 : f32 to vector<8x1xf32>
    %88 = arith.divf %86, %87 : vector<8x1xf32>
    %89 = vector.broadcast %81 : vector<8x1xf32> to vector<8x512xf32>
    %90 = arith.subf %77, %89 : vector<8x512xf32>
    %cst_35 = arith.constant 9.99999974E-6 : f32
    %91 = vector.broadcast %cst_35 : f32 to vector<8x1xf32>
    %92 = arith.addf %88, %91 : vector<8x1xf32>
    %93 = math.rsqrt %92 : vector<8x1xf32>
    %94 = vector.broadcast %93 : vector<8x1xf32> to vector<8x512xf32>
    %95 = arith.mulf %90, %94 : vector<8x512xf32>
    %c7 = arith.constant 7 : index
    %c0_36 = arith.constant 0 : index
    %96 = vector.load %arg8[%c7, %c0_36] : memref<16x1024xf32, #tpu.memory_space<vmem>>, vector<1x512xf32>
    %97 = vector.broadcast %96 : vector<1x512xf32> to vector<8x512xf32>
    %98 = arith.mulf %95, %97 : vector<8x512xf32>
    %c8 = arith.constant 8 : index
    %c0_37 = arith.constant 0 : index
    %99 = vector.load %arg8[%c8, %c0_37] : memref<16x1024xf32, #tpu.memory_space<vmem>>, vector<1x512xf32>
    %100 = vector.broadcast %99 : vector<1x512xf32> to vector<8x512xf32>
    %101 = arith.addf %98, %100 : vector<8x512xf32>
    %cst_38 = arith.constant 0.000000e+00 : f32
    %102 = vector.broadcast %cst_38 : f32 to vector<8x512xf32>
    %103 = arith.maximumf %101, %102 : vector<8x512xf32>
    %104 = arith.truncf %103 : vector<8x512xf32> to vector<8x512xbf16>
    %c0_39 = arith.constant 0 : index
    %c0_40 = arith.constant 0 : index
    %105 = vector.load %arg5[%c0_39, %c0_40] : memref<512x256xbf16, #tpu.memory_space<vmem>>, vector<512x256xbf16>
    %cst_41 = arith.constant dense<0.000000e+00> : vector<8x256xf32>
    %106 = tpu.matmul %104, %105, %cst_41 {dimension_numbers = #tpu.dot_dimension_numbers<[1], [0], [0], [1], [0, 0, 1, 1], [], []>} : vector<8x512xbf16>, vector<512x256xbf16>, vector<8x256xf32> -> vector<8x256xf32>
    %c9 = arith.constant 9 : index
    %c0_42 = arith.constant 0 : index
    %107 = vector.load %arg8[%c9, %c0_42] : memref<16x1024xf32, #tpu.memory_space<vmem>>, vector<1x256xf32>
    %108 = vector.broadcast %107 : vector<1x256xf32> to vector<8x256xf32>
    %109 = arith.addf %106, %108 : vector<8x256xf32>
    %cst_43 = arith.constant dense<0.000000e+00> : vector<8xf32>
    %110 = vector.multi_reduction <add>, %109, %cst_43 [1] : vector<8x256xf32> to vector<8xf32>
    %111 = vector.shape_cast %110 : vector<8xf32> to vector<8x1xf32>
    %cst_44 = arith.constant 2.560000e+02 : f32
    %112 = vector.broadcast %cst_44 : f32 to vector<8x1xf32>
    %113 = arith.divf %111, %112 : vector<8x1xf32>
    %114 = vector.broadcast %113 : vector<8x1xf32> to vector<8x256xf32>
    %115 = arith.subf %109, %114 : vector<8x256xf32>
    %116 = arith.mulf %115, %115 : vector<8x256xf32>
    %cst_45 = arith.constant dense<0.000000e+00> : vector<8xf32>
    %117 = vector.multi_reduction <add>, %116, %cst_45 [1] : vector<8x256xf32> to vector<8xf32>
    %118 = vector.shape_cast %117 : vector<8xf32> to vector<8x1xf32>
    %cst_46 = arith.constant 2.560000e+02 : f32
    %119 = vector.broadcast %cst_46 : f32 to vector<8x1xf32>
    %120 = arith.divf %118, %119 : vector<8x1xf32>
    %121 = vector.broadcast %113 : vector<8x1xf32> to vector<8x256xf32>
    %122 = arith.subf %109, %121 : vector<8x256xf32>
    %cst_47 = arith.constant 9.99999974E-6 : f32
    %123 = vector.broadcast %cst_47 : f32 to vector<8x1xf32>
    %124 = arith.addf %120, %123 : vector<8x1xf32>
    %125 = math.rsqrt %124 : vector<8x1xf32>
    %126 = vector.broadcast %125 : vector<8x1xf32> to vector<8x256xf32>
    %127 = arith.mulf %122, %126 : vector<8x256xf32>
    %c10 = arith.constant 10 : index
    %c0_48 = arith.constant 0 : index
    %128 = vector.load %arg8[%c10, %c0_48] : memref<16x1024xf32, #tpu.memory_space<vmem>>, vector<1x256xf32>
    %129 = vector.broadcast %128 : vector<1x256xf32> to vector<8x256xf32>
    %130 = arith.mulf %127, %129 : vector<8x256xf32>
    %c11 = arith.constant 11 : index
    %c0_49 = arith.constant 0 : index
    %131 = vector.load %arg8[%c11, %c0_49] : memref<16x1024xf32, #tpu.memory_space<vmem>>, vector<1x256xf32>
    %132 = vector.broadcast %131 : vector<1x256xf32> to vector<8x256xf32>
    %133 = arith.addf %130, %132 : vector<8x256xf32>
    %cst_50 = arith.constant 0.000000e+00 : f32
    %134 = vector.broadcast %cst_50 : f32 to vector<8x256xf32>
    %135 = arith.maximumf %133, %134 : vector<8x256xf32>
    %136 = arith.truncf %135 : vector<8x256xf32> to vector<8x256xbf16>
    %c0_51 = arith.constant 0 : index
    %c0_52 = arith.constant 0 : index
    %137 = vector.load %arg6[%c0_51, %c0_52] : memref<256x64xbf16, #tpu.memory_space<vmem>>, vector<256x64xbf16>
    %cst_53 = arith.constant dense<0.000000e+00> : vector<8x64xf32>
    %138 = tpu.matmul %136, %137, %cst_53 {dimension_numbers = #tpu.dot_dimension_numbers<[1], [0], [0], [1], [0, 0, 1, 1], [], []>} : vector<8x256xbf16>, vector<256x64xbf16>, vector<8x64xf32> -> vector<8x64xf32>
    %c12 = arith.constant 12 : index
    %c0_54 = arith.constant 0 : index
    %139 = vector.load %arg8[%c12, %c0_54] : memref<16x1024xf32, #tpu.memory_space<vmem>>, vector<1x64xf32>
    %140 = vector.broadcast %139 : vector<1x64xf32> to vector<8x64xf32>
    %141 = arith.addf %138, %140 : vector<8x64xf32>
    %cst_55 = arith.constant dense<0.000000e+00> : vector<8xf32>
    %142 = vector.multi_reduction <add>, %141, %cst_55 [1] : vector<8x64xf32> to vector<8xf32>
    %143 = vector.shape_cast %142 : vector<8xf32> to vector<8x1xf32>
    %cst_56 = arith.constant 6.400000e+01 : f32
    %144 = vector.broadcast %cst_56 : f32 to vector<8x1xf32>
    %145 = arith.divf %143, %144 : vector<8x1xf32>
    %146 = vector.broadcast %145 : vector<8x1xf32> to vector<8x64xf32>
    %147 = arith.subf %141, %146 : vector<8x64xf32>
    %148 = arith.mulf %147, %147 : vector<8x64xf32>
    %cst_57 = arith.constant dense<0.000000e+00> : vector<8xf32>
    %149 = vector.multi_reduction <add>, %148, %cst_57 [1] : vector<8x64xf32> to vector<8xf32>
    %150 = vector.shape_cast %149 : vector<8xf32> to vector<8x1xf32>
    %cst_58 = arith.constant 6.400000e+01 : f32
    %151 = vector.broadcast %cst_58 : f32 to vector<8x1xf32>
    %152 = arith.divf %150, %151 : vector<8x1xf32>
    %153 = vector.broadcast %145 : vector<8x1xf32> to vector<8x64xf32>
    %154 = arith.subf %141, %153 : vector<8x64xf32>
    %cst_59 = arith.constant 9.99999974E-6 : f32
    %155 = vector.broadcast %cst_59 : f32 to vector<8x1xf32>
    %156 = arith.addf %152, %155 : vector<8x1xf32>
    %157 = math.rsqrt %156 : vector<8x1xf32>
    %158 = vector.broadcast %157 : vector<8x1xf32> to vector<8x64xf32>
    %159 = arith.mulf %154, %158 : vector<8x64xf32>
    %c13 = arith.constant 13 : index
    %c0_60 = arith.constant 0 : index
    %160 = vector.load %arg8[%c13, %c0_60] : memref<16x1024xf32, #tpu.memory_space<vmem>>, vector<1x64xf32>
    %161 = vector.broadcast %160 : vector<1x64xf32> to vector<8x64xf32>
    %162 = arith.mulf %159, %161 : vector<8x64xf32>
    %c14 = arith.constant 14 : index
    %c0_61 = arith.constant 0 : index
    %163 = vector.load %arg8[%c14, %c0_61] : memref<16x1024xf32, #tpu.memory_space<vmem>>, vector<1x64xf32>
    %164 = vector.broadcast %163 : vector<1x64xf32> to vector<8x64xf32>
    %165 = arith.addf %162, %164 : vector<8x64xf32>
    %cst_62 = arith.constant 0.000000e+00 : f32
    %166 = vector.broadcast %cst_62 : f32 to vector<8x64xf32>
    %167 = arith.maximumf %165, %166 : vector<8x64xf32>
    %168 = arith.truncf %167 : vector<8x64xf32> to vector<8x64xbf16>
    %c0_63 = arith.constant 0 : index
    %c0_64 = arith.constant 0 : index
    %169 = vector.load %arg7[%c0_63, %c0_64] : memref<64x128xbf16, #tpu.memory_space<vmem>>, vector<64x128xbf16>
    %cst_65 = arith.constant dense<0.000000e+00> : vector<8x128xf32>
    %170 = tpu.matmul %168, %169, %cst_65 {dimension_numbers = #tpu.dot_dimension_numbers<[1], [0], [0], [1], [0, 0, 1, 1], [], []>} : vector<8x64xbf16>, vector<64x128xbf16>, vector<8x128xf32> -> vector<8x128xf32>
    %c15 = arith.constant 15 : index
    %c0_66 = arith.constant 0 : index
    %171 = vector.load %arg8[%c15, %c0_66] : memref<16x1024xf32, #tpu.memory_space<vmem>>, vector<1x128xf32>
    %172 = vector.broadcast %171 : vector<1x128xf32> to vector<8x128xf32>
    %173 = arith.addf %170, %172 : vector<8x128xf32>
    %c0_67 = arith.constant 0 : index
    %c0_68 = arith.constant 0 : index
    %174 = vector.load %arg9[%c0_67, %c0_68] : memref<8x128xf32, #tpu.memory_space<vmem>>, vector<8x128xf32>
    tpu.vector_store %arg9[%c0_67, %c0_68], %173 {strides = array<i32>} : memref<8x128xf32, #tpu.memory_space<vmem>>, vector<8x128xf32>,
    return
  }
  func.func @transform_0(%arg0: i32) -> (i32, i32) {
    %c0_i32 = arith.constant 0 : i32
    %c0_i32_0 = arith.constant 0 : i32
    %c0_i32_1 = arith.constant 0 : i32
    return %c0_i32, %c0_i32_0 : i32, i32
  }
  func.func @transform_1(%arg0: i32) -> (i32, i32) {
    %c0_i32 = arith.constant 0 : i32
    %c0_i32_0 = arith.constant 0 : i32
    %c0_i32_1 = arith.constant 0 : i32
    return %c0_i32, %c0_i32_0 : i32, i32
  }
  func.func @transform_4(%arg0: i32) -> (i32, i32) {
    %c0_i32 = arith.constant 0 : i32
    %c0_i32_0 = arith.constant 0 : i32
    %c0_i32_1 = arith.constant 0 : i32
    return %c0_i32, %c0_i32_0 : i32, i32
  }
  func.func @transform_5(%arg0: i32) -> (i32, i32) {
    %c0_i32 = arith.constant 0 : i32
    %c0_i32_0 = arith.constant 0 : i32
    %c0_i32_1 = arith.constant 0 : i32
    return %c0_i32, %c0_i32_0 : i32, i32
  }
  func.func @transform_6(%arg0: i32) -> (i32, i32) {
    %c0_i32 = arith.constant 0 : i32
    %c0_i32_0 = arith.constant 0 : i32
    %c0_i32_1 = arith.constant 0 : i32
    return %c0_i32, %c0_i32_0 : i32, i32
  }
  func.func @transform_7(%arg0: i32) -> (i32, i32) {
    %c0_i32 = arith.constant 0 : i32
    %c0_i32_0 = arith.constant 0 : i32
    %c0_i32_1 = arith.constant 0 : i32
    return %c0_i32, %c0_i32_0 : i32, i32
  }
  func.func @transform_8(%arg0: i32) -> (i32, i32) {
    %c0_i32 = arith.constant 0 : i32
    %c0_i32_0 = arith.constant 0 : i32
    %c0_i32_1 = arith.constant 0 : i32
    return %c0_i32, %c0_i32_0 : i32, i32
  }
}

</mosaic_0001>

<bundles_post_ra>
// kernel: rot_vec_global_forward.1
= control target key start
LH: loop header
LB: loop body
LE: loop exit
PB: predicated region body
PF: predicated region fallthrough
CT: control target
= control target key end

     0   :  { %13 = vsyncpa [#allocation6], 0  ;;  %s3955_s0 = inlined_call_operand.vmem [shape: bf16[8,256], index: 0, kind: input, shape index: {}]   ;;  %s3956_s1 = inlined_call_operand.hbm [shape: bf16[256,512], index: 1, kind: input, shape index: {}]   ;;  %s3957_s2 = inlined_call_operand.hbm [shape: bf16[512,1024], index: 2, kind: input, shape index: {}]   ;;  %s3958_s3 = inlined_call_operand.hbm [shape: bf16[1024,512], index: 3, kind: input, shape index: {}]   ;;  %s3959_s4 = inlined_call_operand.hbm [shape: bf16[512,256], index: 4, kind: input, shape index: {}]   ;;  %s3960_s5 = inlined_call_operand.vmem [shape: bf16[256,64], index: 5, kind: input, shape index: {}]   ;;  %s3961_s6 = inlined_call_operand.vmem [shape: bf16[64,128], index: 6, kind: input, shape index: {}]   ;;  %s3962_s7 = inlined_call_operand.vmem [shape: f32[16,1024], index: 7, kind: input, shape index: {}]   ;;  %s3963_s8 = inlined_call_operand.vmem [shape: f32[8,128], index: 8, kind: output, shape index: {}]  }
   0x1   :  { %14 = vsyncpa [#allocation8], 0  ;;  %s3589_s27 = smov [#allocation5]   ;;  %s3537_s9 = scalar_lea.hbm %s3956_s1, 8192 }
   0x2   :  { %s22_s28 = sshll.u32 %s3589_s27, 4  ;;  %p3538_p0 = scmp.ne.s32.totalorder %s3956_s1, %s3537_s9  ;;  %s23_s28 = int_to_ptr.vmem [resolvable:$true] %s22_s28 }
   0x3   :  { %p3541_p1 = scmp.lt.u32.totalorder %s3537_s9, %s3956_s1 }
   0x5   :  { %p3543_p2 = pnand %p3541_p1, %p3538_p0 }
   0x7   :  { %3546 = shalt.err (!%p3543_p2)
}
   0x8   :  { %s3547_s14 = scalar_lea.vmem %s23_s28, 8192  ;;  %p3552_p4 = scmp.lt.s32.totalorder %s23_s28, %s23_s28 }
   0x9   :  { %p3548_p3 = scmp.ne.s32.totalorder %s23_s28, %s3547_s14  ;;  %p3553_p5 = scmp.lt.s32.totalorder %s3547_s14, %s3547_s14 }
   0xb   :  { %p3554_p6 = por %p3553_p5, %p3552_p4 }
   0xd   :  { %p3555_p7 = pnand %p3554_p6, %p3548_p3 }
   0xf   :  { %3558 = shalt.err (!%p3555_p7)
}
  0x10   :  { %s3590_s15 = smov 256   ;;  %s3591_s16 = smov 16  }
  0x11   :  { %28 = dma.hbm_to_vmem [thread:$0]  %s3956_s1, 8192, %s23_s28, [#allocation6], %s3590_s15, %s3590_s15, %s3591_s16  }
  0x12   :  { %s3592_s19 = smov [#allocation7]   ;;  %s3559_s23 = scalar_lea.hbm %s3959_s4, 8192 }
  0x13   :  { %s34_s20 = sshll.u32 %s3592_s19, 4  ;;  %p3560_p8 = scmp.ne.s32.totalorder %s3959_s4, %s3559_s23  ;;  %s35_s20 = int_to_ptr.vmem [resolvable:$true] %s34_s20 }
  0x14   :  { %p3563_p9 = scmp.lt.u32.totalorder %s3559_s23, %s3959_s4 }
  0x16   :  { %p3565_p10 = pnand %p3563_p9, %p3560_p8 }
  0x18   :  { %3568 = shalt.err (!%p3565_p10)
}
  0x19   :  { %s3569_s29 = scalar_lea.vmem %s35_s20, 8192  ;;  %p3574_p12 = scmp.lt.s32.totalorder %s35_s20, %s35_s20 }
  0x1a   :  { %p3570_p11 = scmp.ne.s32.totalorder %s35_s20, %s3569_s29  ;;  %p3575_p13 = scmp.lt.s32.totalorder %s3569_s29, %s3569_s29 }
  0x1c   :  { %p3576_p0 = por %p3575_p13, %p3574_p12 }
  0x1e   :  { %p3577_p1 = pnand %p3576_p0, %p3570_p11 }
  0x20   :  { %3580 = shalt.err (!%p3577_p1)
}
  0x21   :  { %s3593_s1 = smov 128   ;;  %s3594_s28 = smov 8  }
  0x22   :  { %40 = dma.hbm_to_vmem [thread:$0]  %s3959_s4, 8192, %s35_s20, [#allocation8], %s3593_s1, %s3593_s1, %s3594_s28  }
  0x23   :  { %3581 = dma.done.wait [#allocation6], 8192  }
  0x24   :  { %3582 = vsyncadd [#allocation6], 4294959104 }
  0x25   :  { %3583 = dma.done.wait [#allocation8], 8192  }
  0x26   :  { %3584 = vsyncadd [#allocation8], 4294959104  ;;  %s58_s10 = sld [smem:[#allocation0]]   ;;  %s3595_s11 = smov 1024  }
  0x27   :  { %70 = sst [smem:[#allocation10]] %s3595_s11  ;;  %s3596_s12 = smov [#allocation2]  }
  0x28   :  { %72 = sst [smem:[#allocation10 + $0x1]] %s3595_s11  ;;  %s66_s13 = sshll.u32 %s3596_s12, 4  ;;  %s67_s13 = int_to_ptr.vmem [resolvable:$true] %s66_s13 }
  0x29   :  { %74 = sst [smem:[#allocation10 + $0x2]] %s3594_s28  ;;  %s3597_s14 = smov 64  }
  0x2a   :  { %78 = sst [smem:[#allocation10 + $0x4]] %s3593_s1  ;;  %s3598_s16 = smov 2  }
  0x2b   :  { %76 = sst [smem:[#allocation10 + $0x3]] %s3597_s14  ;;  %s3599_s4 = smov 512  }
  0x2c   :  { %80 = sst [smem:[#allocation10 + $0x5]] %s3598_s16  ;;  %s3026_s17 = sshll.u32 %s58_s10, 26 }
  0x2d   :  { %82 = sst [smem:[#allocation10 + $0x6]] %s3599_s4  ;;  %s3027_s18 = sadd.s32 134217728, %s3026_s17 }
  0x2e   :  { %84 = sst [smem:[#allocation10 + $0x7]] %s3597_s14  ;;  %s3600_s19 = smov 4  }
  0x2f   :  { %86 = sst [smem:[#allocation10 + $0x8]] %s3600_s19  ;;  %s3601_s20 = smov [#allocation4]  }
  0x30   :  { %s3602_s21 = smov [#allocation9]   ;;  %s3603_s24 = smov [#allocation3]  }
  0x31   :  { %88 = dma.general %s3957_s2, 32768, %s67_s13, %s3601_s20, %s3602_s21, [#allocation10], %s3027_s18, 0  }
  0x32   :  { %105 = sst [smem:[#allocation12]] %s3599_s4  ;;  %s101_s25 = sshll.u32 %s3603_s24, 4  ;;  %s102_s25 = int_to_ptr.vmem [resolvable:$true] %s101_s25 }
  0x33   :  { %107 = sst [smem:[#allocation12 + $0x1]] %s3599_s4  ;;  %s3604_s26 = smov [#allocation4 + $0x1]  }
  0x34   :  { %109 = sst [smem:[#allocation12 + $0x2]] %s3600_s19  ;;  %s3605_s27 = smov [#allocation11]  }
  0x35   :  { %111 = sst [smem:[#allocation12 + $0x3]] %s3597_s14 }
  0x36   :  { %113 = sst [smem:[#allocation12 + $0x4]] %s3593_s1 }
  0x37   :  { %115 = sst [smem:[#allocation12 + $0x5]] %s3598_s16 }
  0x38   :  { %117 = sst [smem:[#allocation12 + $0x6]] %s3590_s15 }
  0x39   :  { %119 = sst [smem:[#allocation12 + $0x7]] %s3597_s14 }
  0x3a   :  { %121 = sst [smem:[#allocation12 + $0x8]] %s3600_s19 }
  0x3b   :  { %123 = dma.general %s3958_s3, 32768, %s102_s25, %s3604_s26, %s3605_s27, [#allocation12], %s3027_s18, 0  }
  0x3c   :  { %v3313_v0 = vld [vmem:[#allocation5 + $0x4] ss:$16 sps:$4 sm:$0xff]   ;;  %v3315_v1 = vld [vmem:[#allocation5] ss:$16 sps:$4 sm:$0xff]   ;;  %v3365_v34 = vld [vmem:[#allocation5 + $0xc] ss:$16 sps:$4 sm:$0xff]  }
  0x3d   :  { %538 = vmatprep.subr.bf16.mxu1 %v3313_v0  ;;  %v3316_v2 = vld [vmem:[#allocation5 + $0x24] ss:$16 sps:$4 sm:$0xff]   ;;  %v3318_v3 = vld [vmem:[#allocation5 + $0x20] ss:$16 sps:$4 sm:$0xff]   ;;  %v3363_v36 = vld [vmem:[#allocation5 + $0x8] ss:$16 sps:$4 sm:$0xff]  }
  0x3e   :  { %539 = vmatpush1.bf16.msra.mxu1 %v3315_v1  ;;  %v3319_v4 = vld [vmem:[#allocation5 + $0x44] ss:$16 sps:$4 sm:$0xff]   ;;  %v3321_v5 = vld [vmem:[#allocation5 + $0x40] ss:$16 sps:$4 sm:$0xff]   ;;  %v3368_v37 = vld [vmem:[#allocation5 + $0x2c] ss:$16 sps:$4 sm:$0xff]  }
  0x3f   :  { %540 = vmatprep.subr.bf16.mxu1 %v3316_v2  ;;  %v3322_v6 = vld [vmem:[#allocation5 + $0x64] ss:$16 sps:$4 sm:$0xff]   ;;  %v3324_v7 = vld [vmem:[#allocation5 + $0x60] ss:$16 sps:$4 sm:$0xff]   ;;  %v3366_v38 = vld [vmem:[#allocation5 + $0x28] ss:$16 sps:$4 sm:$0xff]  }
  0x40   :  { %v3325_v8 = vld [vmem:[#allocation5 + $0x84] ss:$16 sps:$4 sm:$0xff]   ;;  %v3327_v9 = vld [vmem:[#allocation5 + $0x80] ss:$16 sps:$4 sm:$0xff]   ;;  %v3371_v39 = vld [vmem:[#allocation5 + $0x4c] ss:$16 sps:$4 sm:$0xff]  }
  0x41   :  { %v3328_v10 = vld [vmem:[#allocation5 + $0xa4] ss:$16 sps:$4 sm:$0xff]   ;;  %v3330_v11 = vld [vmem:[#allocation5 + $0xa0] ss:$16 sps:$4 sm:$0xff]   ;;  %v3369_v40 = vld [vmem:[#allocation5 + $0x48] ss:$16 sps:$4 sm:$0xff]  }
  0x42   :  { %541 = vmatpush1.bf16.msra.mxu1 %v3318_v3  ;;  %v3331_v12 = vld [vmem:[#allocation5 + $0xc4] ss:$16 sps:$4 sm:$0xff]   ;;  %v3333_v15 = vld [vmem:[#allocation5 + $0xc0] ss:$16 sps:$4 sm:$0xff]   ;;  %v3374_v41 = vld [vmem:[#allocation5 + $0x6c] ss:$16 sps:$4 sm:$0xff]  }
  0x43   :  { %542 = vmatprep.subr.bf16.mxu1 %v3319_v4  ;;  %v124_v13 = vld [vmem:[%s3955_s0] sm:$0xff]  ;;  %v3372_v42 = vld [vmem:[#allocation5 + $0x68] ss:$16 sps:$4 sm:$0xff]   ;;  %v3377_v43 = vld [vmem:[#allocation5 + $0x8c] ss:$16 sps:$4 sm:$0xff]  }
  0x44   :  { %v3031_v14 = vcombine.high %v124_v13, %v124_v13  ;;  %v3334_v16 = vld [vmem:[#allocation5 + $0xe4] ss:$16 sps:$4 sm:$0xff]   ;;  %v3336_v17 = vld [vmem:[#allocation5 + $0xe0] ss:$16 sps:$4 sm:$0xff]   ;;  %v3693_v35 = vcombine.low %v124_v13, %v124_v13  ;;  %v3375_v44 = vld [vmem:[#allocation5 + $0x88] ss:$16 sps:$4 sm:$0xff]  }
  0x45   :  { %v3337_v18 = vld [vmem:[#allocation5 + $0x104] ss:$16 sps:$4 sm:$0xff]   ;;  %v3339_v19 = vld [vmem:[#allocation5 + $0x100] ss:$16 sps:$4 sm:$0xff]   ;;  %v3380_v45 = vld [vmem:[#allocation5 + $0xac] ss:$16 sps:$4 sm:$0xff]  }
  0x46   :  { %543 = vmatpush1.bf16.msra.mxu1 %v3321_v5  ;;  %570 = vmatprep.mubr.bf16.mxu1 %v3031_v14  ;;  %v3340_v20 = vld [vmem:[#allocation5 + $0x124] ss:$16 sps:$4 sm:$0xff]   ;;  %v3342_v21 = vld [vmem:[#allocation5 + $0x120] ss:$16 sps:$4 sm:$0xff]   ;;  %v3378_v46 = vld [vmem:[#allocation5 + $0xa8] ss:$16 sps:$4 sm:$0xff]  }
  0x47   :  { %544 = vmatprep.subr.bf16.mxu1 %v3322_v6  ;;  %v3343_v22 = vld [vmem:[#allocation5 + $0x144] ss:$16 sps:$4 sm:$0xff]   ;;  %v3345_v23 = vld [vmem:[#allocation5 + $0x140] ss:$16 sps:$4 sm:$0xff]   ;;  %v3383_v47 = vld [vmem:[#allocation5 + $0xcc] ss:$16 sps:$4 sm:$0xff]  }
  0x48   :  { %v3346_v24 = vld [vmem:[#allocation5 + $0x164] ss:$16 sps:$4 sm:$0xff]   ;;  %v3348_v25 = vld [vmem:[#allocation5 + $0x160] ss:$16 sps:$4 sm:$0xff]   ;;  %v3381_v48 = vld [vmem:[#allocation5 + $0xc8] ss:$16 sps:$4 sm:$0xff]  }
  0x49   :  { %v3349_v26 = vld [vmem:[#allocation5 + $0x184] ss:$16 sps:$4 sm:$0xff]   ;;  %v3351_v27 = vld [vmem:[#allocation5 + $0x180] ss:$16 sps:$4 sm:$0xff]   ;;  %v3386_v49 = vld [vmem:[#allocation5 + $0xec] ss:$16 sps:$4 sm:$0xff]  }
  0x4a   :  { %545 = vmatpush1.bf16.msra.mxu1 %v3324_v7  ;;  %v3352_v28 = vld [vmem:[#allocation5 + $0x1a4] ss:$16 sps:$4 sm:$0xff]   ;;  %v3354_v29 = vld [vmem:[#allocation5 + $0x1a0] ss:$16 sps:$4 sm:$0xff]   ;;  %v3384_v50 = vld [vmem:[#allocation5 + $0xe8] ss:$16 sps:$4 sm:$0xff]   ;;  %v191_v7 = vlaneseq }
  0x4b   :  { %546 = vmatprep.subr.bf16.mxu1 %v3325_v8  ;;  %v3355_v30 = vld [vmem:[#allocation5 + $0x1c4] ss:$16 sps:$4 sm:$0xff]   ;;  %v3357_v31 = vld [vmem:[#allocation5 + $0x1c0] ss:$16 sps:$4 sm:$0xff]   ;;  %v3389_v51 = vld [vmem:[#allocation5 + $0x10c] ss:$16 sps:$4 sm:$0xff]  }
  0x4c   :  { %v3358_v32 = vld [vmem:[#allocation5 + $0x1e4] ss:$16 sps:$4 sm:$0xff]   ;;  %v3360_v33 = vld [vmem:[#allocation5 + $0x1e0] ss:$16 sps:$4 sm:$0xff]   ;;  %v3387_v52 = vld [vmem:[#allocation5 + $0x108] ss:$16 sps:$4 sm:$0xff]  }
  0x4d   :  { %v3392_v53 = vld [vmem:[#allocation5 + $0x12c] ss:$16 sps:$4 sm:$0xff]   ;;  %v3390_v54 = vld [vmem:[#allocation5 + $0x128] ss:$16 sps:$4 sm:$0xff]   ;;  %v3697_v8 = vshrl.u32 %v191_v7, 7 }
  0x4e   :  { %547 = vmatpush1.bf16.msra.mxu1 %v3327_v9  ;;  %v3395_v55 = vld [vmem:[#allocation5 + $0x14c] ss:$16 sps:$4 sm:$0xff]   ;;  %v3393_v56 = vld [vmem:[#allocation5 + $0x148] ss:$16 sps:$4 sm:$0xff]  }
  0x4f   :  { %548 = vmatprep.subr.bf16.mxu1 %v3328_v10  ;;  %v3398_v57 = vld [vmem:[#allocation5 + $0x16c] ss:$16 sps:$4 sm:$0xff]   ;;  %v3396_v58 = vld [vmem:[#allocation5 + $0x168] ss:$16 sps:$4 sm:$0xff]   ;;  %v3700_v9 = vsub.s32 0, %v3697_v8  ;;  %v3703_v10 = vsub.s32 1, %v3697_v8 }
  0x50   :  { %v3401_v59 = vld [vmem:[#allocation5 + $0x18c] ss:$16 sps:$4 sm:$0xff]   ;;  %v3399_v60 = vld [vmem:[#allocation5 + $0x188] ss:$16 sps:$4 sm:$0xff]  }
  0x51   :  { %v3404_v61 = vld [vmem:[#allocation5 + $0x1ac] ss:$16 sps:$4 sm:$0xff]   ;;  %v3402_v62 = vld [vmem:[#allocation5 + $0x1a8] ss:$16 sps:$4 sm:$0xff]  }
  0x52   :  { %549 = vmatpush1.bf16.msra.mxu1 %v3330_v11  ;;  %v3407_v63 = vld [vmem:[#allocation5 + $0x1cc] ss:$16 sps:$4 sm:$0xff]   ;;  %v3405_v0 = vld [vmem:[#allocation5 + $0x1c8] ss:$16 sps:$4 sm:$0xff]  }
  0x53   :  { %550 = vmatprep.subr.bf16.mxu1 %v3331_v12  ;;  %v3410_v1 = vld [vmem:[#allocation5 + $0x1ec] ss:$16 sps:$4 sm:$0xff]   ;;  %v3408_v2 = vld [vmem:[#allocation5 + $0x1e8] ss:$16 sps:$4 sm:$0xff]  }
  0x54   :  { %v189_v11 = vld [vmem:[%s3962_s7] ss:$8 sm:$0xf] }
  0x55   :  { %v194_v12 = vrot.slane %v189_v11, %v3700_v9  ;;  %v198_v13 = vrot.slane %v189_v11, %v3703_v10 }
  0x56   :  { %551 = vmatpush1.bf16.msra.mxu1 %v3333_v15  ;;  %v3714_v15 = vsub.s32 3, %v3697_v8 }
  0x57   :  { %552 = vmatprep.subr.bf16.mxu1 %v3334_v16 }
  0x5a   :  { %553 = vmatpush1.bf16.msra.mxu1 %v3336_v17 }
  0x5b   :  { %554 = vmatprep.subr.bf16.mxu1 %v3337_v18 }
  0x5e   :  { %555 = vmatpush1.bf16.msra.mxu1 %v3339_v19  ;;  %v206_v19 = vrot.slane %v189_v11, %v3714_v15 }
  0x5f   :  { %556 = vmatprep.subr.bf16.mxu1 %v3340_v20 }
  0x62   :  { %557 = vmatpush1.bf16.msra.mxu1 %v3342_v21 }
  0x63   :  { %558 = vmatprep.subr.bf16.mxu1 %v3343_v22 }
  0x66   :  { %559 = vmatpush1.bf16.msra.mxu1 %v3345_v23 }
  0x67   :  { %560 = vmatprep.subr.bf16.mxu1 %v3346_v24 }
  0x6a   :  { %561 = vmatpush1.bf16.msra.mxu1 %v3348_v25 }
  0x6b   :  { %562 = vmatprep.subr.bf16.mxu1 %v3349_v26 }
  0x6e   :  { %563 = vmatpush1.bf16.msra.mxu1 %v3351_v27 }
  0x6f   :  { %564 = vmatprep.subr.bf16.mxu1 %v3352_v28 }
  0x72   :  { %565 = vmatpush1.bf16.msra.mxu1 %v3354_v29 }
  0x73   :  { %566 = vmatprep.subr.bf16.mxu1 %v3355_v30 }
  0x76   :  { %567 = vmatpush1.bf16.msra.mxu1 %v3357_v31 }
  0x77   :  { %568 = vmatprep.subr.bf16.mxu1 %v3358_v32 }
  0x7a   :  { %569 = vmatpush1.bf16.msra.mxu1 %v3360_v33 }
  0x7b   :  { %579 = vmatprep.subr.bf16.mxu1 %v3365_v34 }
  0x7d   :  { %571 = vmatmul.mubr.bf16.vlgmr.msra.gmra.mrb[0].mxu1 %v3693_v35 }
  0x7e   :  { %580 = vmatpush1.bf16.msra.mxu1 %v3363_v36  ;;  %611 = vmatprep.mubr.bf16.mxu1 %v3031_v14  ;;  %v3711_v14 = vsub.s32 2, %v3697_v8 }
  0x7f   :  { %581 = vmatprep.subr.bf16.mxu1 %v3368_v37 }
  0x80   :  { %v202_v18 = vrot.slane %v189_v11, %v3711_v14 }
  0x82   :  { %582 = vmatpush1.bf16.msra.mxu1 %v3366_v38 }
  0x83   :  { %583 = vmatprep.subr.bf16.mxu1 %v3371_v39 }
  0x86   :  { %584 = vmatpush1.bf16.msra.mxu1 %v3369_v40 }
  0x87   :  { %585 = vmatprep.subr.bf16.mxu1 %v3374_v41 }
  0x8a   :  { %586 = vmatpush1.bf16.msra.mxu1 %v3372_v42 }
  0x8b   :  { %587 = vmatprep.subr.bf16.mxu1 %v3377_v43 }
  0x8e   :  { %588 = vmatpush1.bf16.msra.mxu1 %v3375_v44 }
  0x8f   :  { %589 = vmatprep.subr.bf16.mxu1 %v3380_v45  ;;  %v3096_v45 = vld [vmem:[%s3962_s7 + $0x1] ss:$8 sm:$0xf] }
  0x92   :  { %590 = vmatpush1.bf16.msra.mxu1 %v3378_v46  ;;  %v3097_v46 = vld [vmem:[%s3962_s7 + $0x2] ss:$8 sm:$0xf] }
  0x93   :  { %591 = vmatprep.subr.bf16.mxu1 %v3383_v47  ;;  %v653_v47 = vrot.slane %v3096_v45, %v3700_v9 }
  0x96   :  { %592 = vmatpush1.bf16.msra.mxu1 %v3381_v48  ;;  %v657_v48 = vrot.slane %v3096_v45, %v3703_v10 }
  0x97   :  { %593 = vmatprep.subr.bf16.mxu1 %v3386_v49  ;;  %v661_v49 = vrot.slane %v3096_v45, %v3711_v14 }
  0x9a   :  { %594 = vmatpush1.bf16.msra.mxu1 %v3384_v50  ;;  %v665_v50 = vrot.slane %v3096_v45, %v3714_v15 }
  0x9b   :  { %595 = vmatprep.subr.bf16.mxu1 %v3389_v51 }
  0x9e   :  { %596 = vmatpush1.bf16.msra.mxu1 %v3387_v52  ;;  %v680_v52 = vrot.slane %v3097_v46, %v3700_v9 }
  0x9f   :  { %597 = vmatprep.subr.bf16.mxu1 %v3392_v53  ;;  %v684_v53 = vrot.slane %v3097_v46, %v3703_v10 }
  0xa2   :  { %598 = vmatpush1.bf16.msra.mxu1 %v3390_v54  ;;  %v688_v54 = vrot.slane %v3097_v46, %v3711_v14 }
  0xa3   :  { %599 = vmatprep.subr.bf16.mxu1 %v3395_v55  ;;  %v692_v55 = vrot.slane %v3097_v46, %v3714_v15 }
  0xa6   :  { %600 = vmatpush1.bf16.msra.mxu1 %v3393_v56 }
  0xa7   :  { %601 = vmatprep.subr.bf16.mxu1 %v3398_v57 }
  0xaa   :  { %602 = vmatpush1.bf16.msra.mxu1 %v3396_v58 }
  0xab   :  { %603 = vmatprep.subr.bf16.mxu1 %v3401_v59 }
  0xae   :  { %604 = vmatpush1.bf16.msra.mxu1 %v3399_v60 }
  0xaf   :  { %605 = vmatprep.subr.bf16.mxu1 %v3404_v61 }
  0xb2   :  { %606 = vmatpush1.bf16.msra.mxu1 %v3402_v62 }
  0xb3   :  { %607 = vmatprep.subr.bf16.mxu1 %v3407_v63 }
  0xb6   :  { %608 = vmatpush1.bf16.msra.mxu1 %v3405_v0 }
  0xb7   :  { %609 = vmatprep.subr.bf16.mxu1 %v3410_v1 }
  0xba   :  { %610 = vmatpush1.bf16.msra.mxu1 %v3408_v2 }
  0xbd   :  { %612 = vmatmul.mubr.bf16.vlgmr.msra.gmra.mrb[4].mxu1 %v3693_v35 }
 0x150   :  { %v572_v3 = vpop.f32.mrb[0].mxu1 }
 0x151   :  { %v574_v4 = vpop.f32.mrb[1].mxu1  ;;  %v573_v16 = vadd.f32 %v572_v3, %v194_v12 }
 0x152   :  { %v576_v5 = vpop.f32.mrb[2].mxu1  ;;  %v575_v17 = vadd.f32 %v574_v4, %v198_v13 }
 0x153   :  { %v577_v6 = vpop.f32.mrb[3].mxu1 }
 0x154   :  { %v620_v21 = vadd.f32 %v575_v17, %v573_v16 }
 0x190   :  { %v613_v20 = vpop.f32.mrb[4].mxu1 }
 0x191   :  { %v614_v22 = vadd.f32 %v613_v20, %v202_v18  ;;  %v615_v23 = vpop.f32.mrb[5].mxu1 }
 0x192   :  { %v616_v24 = vadd.f32 %v615_v23, %v206_v19  ;;  %v617_v25 = vpop.f32.mrb[6].mxu1 }
 0x193   :  { %v618_v26 = vpop.f32.mrb[7].mxu1  ;;  %v621_v27 = vadd.f32 %v620_v21, %v614_v22 }
 0x195   :  { %v622_v28 = vadd.f32 %v621_v27, %v616_v24 }
 0x197   :  { %623 = vadd.xlane.f32.xlu0 %v622_v28 }
 0x224   :  { %v624_v29 = vpop.xlane.xlu0 %623 }
 0x225   :  { %v626_v30 = vmul.f32 0.001953125, %v624_v29 }
 0x227   :  { %v627_v31 = vsub.f32 %v573_v16, %v626_v30  ;;  %v628_v32 = vsub.f32 %v575_v17, %v626_v30  ;;  %v629_v33 = vsub.f32 %v614_v22, %v626_v30  ;;  %v630_v34 = vsub.f32 %v616_v24, %v626_v30 }
 0x229   :  { %v631_v35 = vmul.f32 %v627_v31, %v627_v31  ;;  %v632_v36 = vmul.f32 %v628_v32, %v628_v32  ;;  %v633_v37 = vmul.f32 %v629_v33, %v629_v33  ;;  %v634_v39 = vmul.f32 %v630_v34, %v630_v34 }
 0x22b   :  { %v635_v38 = vadd.f32 %v632_v36, %v631_v35 }
 0x22d   :  { %v636_v40 = vadd.f32 %v635_v38, %v633_v37 }
 0x22f   :  { %v637_v41 = vadd.f32 %v636_v40, %v634_v39 }
 0x231   :  { %638 = vadd.xlane.f32.xlu0 %v637_v41 }
 0x2be   :  { %v639_v42 = vpop.xlane.xlu0 %638 }
 0x2bf   :  { %v640_v43 = vmul.f32 0.001953125, %v639_v42 }
 0x2c1   :  { %v641_v44 = vadd.f32 1e-05, %v640_v43 }
 0x2c3   :  { %3411 = vrsqrt.f32 %v641_v44 }
 0x2cd   :  { %v3412_v51 = vpop.eup %3411 }
 0x2ce   :  { %v643_v56 = vmul.f32 %v3412_v51, %v627_v31  ;;  %v644_v57 = vmul.f32 %v3412_v51, %v628_v32  ;;  %v645_v58 = vmul.f32 %v3412_v51, %v629_v33  ;;  %v646_v59 = vmul.f32 %v3412_v51, %v630_v34 }
 0x2d0   :  { %v670_v60 = vmul.f32 %v653_v47, %v643_v56  ;;  %v671_v61 = vmul.f32 %v657_v48, %v644_v57  ;;  %v672_v62 = vmul.f32 %v661_v49, %v645_v58  ;;  %v673_v63 = vmul.f32 %v665_v50, %v646_v59 }
 0x2d2   :  { %v697_v0 = vadd.f32 %v680_v52, %v670_v60  ;;  %v698_v1 = vadd.f32 %v684_v53, %v671_v61  ;;  %v699_v2 = vadd.f32 %v688_v54, %v672_v62  ;;  %v700_v3 = vadd.f32 %v692_v55, %v673_v63 }
 0x2d4   :  { %v701_v4 = vmax.f32 %v697_v0, 0.0  ;;  %v702_v5 = vmax.f32 %v698_v1, 0.0  ;;  %v703_v6 = vmax.f32 %v699_v2, 0.0  ;;  %v704_v7 = vmax.f32 %v700_v3, 0.0 }
 0x2d6   :  { %v3732_v11 = vpack.c.bf16 %v701_v4, %v701_v4  ;;  %v3734_v12 = vpack.c.bf16 %v702_v5, %v702_v5  ;;  %v3736_v13 = vpack.c.bf16 %v703_v6, %v703_v6  ;;  %v3738_v16 = vpack.c.bf16 %v704_v7, %v704_v7 }
 0x2d7   :  { %3585 = dma.done.wait [#allocation4], 32768 }
 0x2d8   :  { %3586 = vsyncadd [#allocation4], 4294934528  ;;  %1046 = vmatprep.mubr.bf16.mxu0 %v3734_v12  ;;  %1128 = vmatprep.mubr.bf16.mxu1 %v3734_v12  ;;  %v714_v17 = vld [vmem:[#allocation2 + $0x8] sm:$0xff]  ;;  %v716_v18 = vld [vmem:[#allocation2 + $0x18] sm:$0xff] }
 0x2d9   :  { %v713_v19 = vld [vmem:[#allocation2] sm:$0xff]  ;;  %1014 = vmatprep.subr.bf16.mxu0 %v714_v17  ;;  %1096 = vmatprep.subr.bf16.mxu1 %v716_v18  ;;  %v715_v20 = vld [vmem:[#allocation2 + $0x10] sm:$0xff]  ;;  %v722_v21 = vld [vmem:[#allocation2 + $0x48] sm:$0xff] }
 0x2da   :  { %v724_v22 = vld [vmem:[#allocation2 + $0x58] sm:$0xff]  ;;  %1015 = vmatpush1.bf16.msra.mxu0 %v713_v19  ;;  %1097 = vmatpush1.bf16.msra.mxu1 %v715_v20  ;;  %v721_v23 = vld [vmem:[#allocation2 + $0x40] sm:$0xff]  ;;  %v723_v24 = vld [vmem:[#allocation2 + $0x50] sm:$0xff] }
 0x2db   :  { %1016 = vmatprep.subr.bf16.mxu0 %v722_v21  ;;  %1098 = vmatprep.subr.bf16.mxu1 %v724_v22  ;;  %v730_v25 = vld [vmem:[#allocation2 + $0x88] sm:$0xff]  ;;  %v732_v26 = vld [vmem:[#allocation2 + $0x98] sm:$0xff]  ;;  %v729_v27 = vld [vmem:[#allocation2 + $0x80] sm:$0xff] }
 0x2dc   :  { %v731_v28 = vld [vmem:[#allocation2 + $0x90] sm:$0xff]  ;;  %v738_v29 = vld [vmem:[#allocation2 + $0xc8] sm:$0xff]  ;;  %v740_v30 = vld [vmem:[#allocation2 + $0xd8] sm:$0xff] }
 0x2dd   :  { %v737_v31 = vld [vmem:[#allocation2 + $0xc0] sm:$0xff]  ;;  %v739_v32 = vld [vmem:[#allocation2 + $0xd0] sm:$0xff]  ;;  %v746_v33 = vld [vmem:[#allocation2 + $0x108] sm:$0xff] }
 0x2de   :  { %1017 = vmatpush1.bf16.msra.mxu0 %v721_v23  ;;  %1099 = vmatpush1.bf16.msra.mxu1 %v723_v24  ;;  %v748_v34 = vld [vmem:[#allocation2 + $0x118] sm:$0xff]  ;;  %v745_v35 = vld [vmem:[#allocation2 + $0x100] sm:$0xff]  ;;  %v747_v36 = vld [vmem:[#allocation2 + $0x110] sm:$0xff] }
 0x2df   :  { %1018 = vmatprep.subr.bf16.mxu0 %v730_v25  ;;  %1100 = vmatprep.subr.bf16.mxu1 %v732_v26  ;;  %v754_v37 = vld [vmem:[#allocation2 + $0x148] sm:$0xff]  ;;  %v756_v38 = vld [vmem:[#allocation2 + $0x158] sm:$0xff]  ;;  %v753_v39 = vld [vmem:[#allocation2 + $0x140] sm:$0xff] }
 0x2e0   :  { %v755_v40 = vld [vmem:[#allocation2 + $0x150] sm:$0xff]  ;;  %v762_v41 = vld [vmem:[#allocation2 + $0x188] sm:$0xff]  ;;  %v764_v42 = vld [vmem:[#allocation2 + $0x198] sm:$0xff] }
 0x2e1   :  { %v761_v43 = vld [vmem:[#allocation2 + $0x180] sm:$0xff]  ;;  %v763_v44 = vld [vmem:[#allocation2 + $0x190] sm:$0xff]  ;;  %v770_v45 = vld [vmem:[#allocation2 + $0x1c8] sm:$0xff] }
 0x2e2   :  { %1019 = vmatpush1.bf16.msra.mxu0 %v729_v27  ;;  %1101 = vmatpush1.bf16.msra.mxu1 %v731_v28  ;;  %v772_v46 = vld [vmem:[#allocation2 + $0x1d8] sm:$0xff]  ;;  %v769_v47 = vld [vmem:[#allocation2 + $0x1c0] sm:$0xff]  ;;  %v771_v48 = vld [vmem:[#allocation2 + $0x1d0] sm:$0xff] }
 0x2e3   :  { %1020 = vmatprep.subr.bf16.mxu0 %v738_v29  ;;  %1102 = vmatprep.subr.bf16.mxu1 %v740_v30  ;;  %v778_v49 = vld [vmem:[#allocation2 + $0x208] sm:$0xff]  ;;  %v780_v50 = vld [vmem:[#allocation2 + $0x218] sm:$0xff]  ;;  %v777_v51 = vld [vmem:[#allocation2 + $0x200] sm:$0xff] }
 0x2e4   :  { %v779_v52 = vld [vmem:[#allocation2 + $0x210] sm:$0xff]  ;;  %v786_v53 = vld [vmem:[#allocation2 + $0x248] sm:$0xff]  ;;  %v788_v54 = vld [vmem:[#allocation2 + $0x258] sm:$0xff] }
 0x2e5   :  { %v785_v55 = vld [vmem:[#allocation2 + $0x240] sm:$0xff]  ;;  %v787_v56 = vld [vmem:[#allocation2 + $0x250] sm:$0xff]  ;;  %v794_v57 = vld [vmem:[#allocation2 + $0x288] sm:$0xff] }
 0x2e6   :  { %1021 = vmatpush1.bf16.msra.mxu0 %v737_v31  ;;  %1103 = vmatpush1.bf16.msra.mxu1 %v739_v32  ;;  %v796_v58 = vld [vmem:[#allocation2 + $0x298] sm:$0xff]  ;;  %v793_v59 = vld [vmem:[#allocation2 + $0x280] sm:$0xff]  ;;  %v795_v60 = vld [vmem:[#allocation2 + $0x290] sm:$0xff] }
 0x2e7   :  { %1022 = vmatprep.subr.bf16.mxu0 %v746_v33  ;;  %1104 = vmatprep.subr.bf16.mxu1 %v748_v34  ;;  %v802_v61 = vld [vmem:[#allocation2 + $0x2c8] sm:$0xff]  ;;  %v804_v62 = vld [vmem:[#allocation2 + $0x2d8] sm:$0xff]  ;;  %v801_v63 = vld [vmem:[#allocation2 + $0x2c0] sm:$0xff] }
 0x2e8   :  { %v803_v0 = vld [vmem:[#allocation2 + $0x2d0] sm:$0xff]  ;;  %v810_v1 = vld [vmem:[#allocation2 + $0x308] sm:$0xff]  ;;  %v812_v2 = vld [vmem:[#allocation2 + $0x318] sm:$0xff] }
 0x2e9   :  { %v809_v3 = vld [vmem:[#allocation2 + $0x300] sm:$0xff]  ;;  %v811_v4 = vld [vmem:[#allocation2 + $0x310] sm:$0xff]  ;;  %v818_v5 = vld [vmem:[#allocation2 + $0x348] sm:$0xff] }
 0x2ea   :  { %1023 = vmatpush1.bf16.msra.mxu0 %v745_v35  ;;  %1105 = vmatpush1.bf16.msra.mxu1 %v747_v36  ;;  %v820_v6 = vld [vmem:[#allocation2 + $0x358] sm:$0xff]  ;;  %v817_v7 = vld [vmem:[#allocation2 + $0x340] sm:$0xff]  ;;  %v819_v17 = vld [vmem:[#allocation2 + $0x350] sm:$0xff] }
 0x2eb   :  { %1024 = vmatprep.subr.bf16.mxu0 %v754_v37  ;;  %1106 = vmatprep.subr.bf16.mxu1 %v756_v38  ;;  %v826_v18 = vld [vmem:[#allocation2 + $0x388] sm:$0xff]  ;;  %v828_v19 = vld [vmem:[#allocation2 + $0x398] sm:$0xff]  ;;  %v825_v20 = vld [vmem:[#allocation2 + $0x380] sm:$0xff] }
 0x2ec   :  { %v827_v21 = vld [vmem:[#allocation2 + $0x390] sm:$0xff]  ;;  %v834_v22 = vld [vmem:[#allocation2 + $0x3c8] sm:$0xff]  ;;  %v836_v23 = vld [vmem:[#allocation2 + $0x3d8] sm:$0xff] }
 0x2ed   :  { %v833_v24 = vld [vmem:[#allocation2 + $0x3c0] sm:$0xff]  ;;  %v835_v25 = vld [vmem:[#allocation2 + $0x3d0] sm:$0xff]  ;;  %v842_v26 = vld [vmem:[#allocation2 + $0x408] sm:$0xff] }
 0x2ee   :  { %1025 = vmatpush1.bf16.msra.mxu0 %v753_v39  ;;  %1107 = vmatpush1.bf16.msra.mxu1 %v755_v40  ;;  %v844_v27 = vld [vmem:[#allocation2 + $0x418] sm:$0xff]  ;;  %v841_v28 = vld [vmem:[#allocation2 + $0x400] sm:$0xff]  ;;  %v843_v29 = vld [vmem:[#allocation2 + $0x410] sm:$0xff] }
 0x2ef   :  { %1026 = vmatprep.subr.bf16.mxu0 %v762_v41  ;;  %1108 = vmatprep.subr.bf16.mxu1 %v764_v42  ;;  %v850_v30 = vld [vmem:[#allocation2 + $0x448] sm:$0xff]  ;;  %v852_v31 = vld [vmem:[#allocation2 + $0x458] sm:$0xff]  ;;  %v849_v32 = vld [vmem:[#allocation2 + $0x440] sm:$0xff] }
 0x2f0   :  { %v851_v33 = vld [vmem:[#allocation2 + $0x450] sm:$0xff]  ;;  %v858_v34 = vld [vmem:[#allocation2 + $0x488] sm:$0xff]  ;;  %v860_v35 = vld [vmem:[#allocation2 + $0x498] sm:$0xff] }
 0x2f1   :  { %v857_v36 = vld [vmem:[#allocation2 + $0x480] sm:$0xff]  ;;  %v859_v37 = vld [vmem:[#allocation2 + $0x490] sm:$0xff]  ;;  %v866_v38 = vld [vmem:[#allocation2 + $0x4c8] sm:$0xff] }
 0x2f2   :  { %1027 = vmatpush1.bf16.msra.mxu0 %v761_v43  ;;  %1109 = vmatpush1.bf16.msra.mxu1 %v763_v44  ;;  %v868_v39 = vld [vmem:[#allocation2 + $0x4d8] sm:$0xff]  ;;  %v865_v40 = vld [vmem:[#allocation2 + $0x4c0] sm:$0xff]  ;;  %v867_v41 = vld [vmem:[#allocation2 + $0x4d0] sm:$0xff] }
 0x2f3   :  { %1028 = vmatprep.subr.bf16.mxu0 %v770_v45  ;;  %1110 = vmatprep.subr.bf16.mxu1 %v772_v46  ;;  %v874_v42 = vld [vmem:[#allocation2 + $0x508] sm:$0xff]  ;;  %v876_v43 = vld [vmem:[#allocation2 + $0x518] sm:$0xff]  ;;  %v873_v44 = vld [vmem:[#allocation2 + $0x500] sm:$0xff] }
 0x2f4   :  { %v875_v45 = vld [vmem:[#allocation2 + $0x510] sm:$0xff]  ;;  %v882_v46 = vld [vmem:[#allocation2 + $0x548] sm:$0xff] }
 0x2f6   :  { %1029 = vmatpush1.bf16.msra.mxu0 %v769_v47  ;;  %1111 = vmatpush1.bf16.msra.mxu1 %v771_v48  ;;  %v884_v47 = vld [vmem:[#allocation2 + $0x558] sm:$0xff]  ;;  %v881_v48 = vld [vmem:[#allocation2 + $0x540] sm:$0xff] }
 0x2f7   :  { %1030 = vmatprep.subr.bf16.mxu0 %v778_v49  ;;  %1112 = vmatprep.subr.bf16.mxu1 %v780_v50  ;;  %v883_v49 = vld [vmem:[#allocation2 + $0x550] sm:$0xff]  ;;  %v890_v50 = vld [vmem:[#allocation2 + $0x588] sm:$0xff] }
 0x2fa   :  { %1031 = vmatpush1.bf16.msra.mxu0 %v777_v51  ;;  %1113 = vmatpush1.bf16.msra.mxu1 %v779_v52  ;;  %v892_v51 = vld [vmem:[#allocation2 + $0x598] sm:$0xff]  ;;  %v889_v52 = vld [vmem:[#allocation2 + $0x580] sm:$0xff] }
 0x2fb   :  { %1032 = vmatprep.subr.bf16.mxu0 %v786_v53  ;;  %1114 = vmatprep.subr.bf16.mxu1 %v788_v54  ;;  %v891_v53 = vld [vmem:[#allocation2 + $0x590] sm:$0xff]  ;;  %v898_v54 = vld [vmem:[#allocation2 + $0x5c8] sm:$0xff] }
 0x2fe   :  { %1033 = vmatpush1.bf16.msra.mxu0 %v785_v55  ;;  %1115 = vmatpush1.bf16.msra.mxu1 %v787_v56  ;;  %v900_v55 = vld [vmem:[#allocation2 + $0x5d8] sm:$0xff]  ;;  %v897_v56 = vld [vmem:[#allocation2 + $0x5c0] sm:$0xff] }
 0x2ff   :  { %1034 = vmatprep.subr.bf16.mxu0 %v794_v57  ;;  %1116 = vmatprep.subr.bf16.mxu1 %v796_v58  ;;  %v899_v57 = vld [vmem:[#allocation2 + $0x5d0] sm:$0xff]  ;;  %v906_v58 = vld [vmem:[#allocation2 + $0x608] sm:$0xff] }
 0x302   :  { %1035 = vmatpush1.bf16.msra.mxu0 %v793_v59  ;;  %1117 = vmatpush1.bf16.msra.mxu1 %v795_v60  ;;  %v908_v59 = vld [vmem:[#allocation2 + $0x618] sm:$0xff]  ;;  %v905_v60 = vld [vmem:[#allocation2 + $0x600] sm:$0xff] }
 0x303   :  { %1036 = vmatprep.subr.bf16.mxu0 %v802_v61  ;;  %1118 = vmatprep.subr.bf16.mxu1 %v804_v62  ;;  %v907_v61 = vld [vmem:[#allocation2 + $0x610] sm:$0xff]  ;;  %v914_v62 = vld [vmem:[#allocation2 + $0x648] sm:$0xff] }
 0x306   :  { %1037 = vmatpush1.bf16.msra.mxu0 %v801_v63  ;;  %1119 = vmatpush1.bf16.msra.mxu1 %v803_v0  ;;  %v916_v63 = vld [vmem:[#allocation2 + $0x658] sm:$0xff]  ;;  %v913_v0 = vld [vmem:[#allocation2 + $0x640] sm:$0xff] }
 0x307   :  { %1038 = vmatprep.subr.bf16.mxu0 %v810_v1  ;;  %1120 = vmatprep.subr.bf16.mxu1 %v812_v2  ;;  %v915_v1 = vld [vmem:[#allocation2 + $0x650] sm:$0xff]  ;;  %v922_v2 = vld [vmem:[#allocation2 + $0x688] sm:$0xff] }
 0x30a   :  { %1039 = vmatpush1.bf16.msra.mxu0 %v809_v3  ;;  %1121 = vmatpush1.bf16.msra.mxu1 %v811_v4  ;;  %v924_v3 = vld [vmem:[#allocation2 + $0x698] sm:$0xff]  ;;  %v921_v4 = vld [vmem:[#allocation2 + $0x680] sm:$0xff] }
 0x30b   :  { %1040 = vmatprep.subr.bf16.mxu0 %v818_v5  ;;  %1122 = vmatprep.subr.bf16.mxu1 %v820_v6  ;;  %v923_v5 = vld [vmem:[#allocation2 + $0x690] sm:$0xff]  ;;  %v930_v6 = vld [vmem:[#allocation2 + $0x6c8] sm:$0xff] }
 0x30e   :  { %1041 = vmatpush1.bf16.msra.mxu0 %v817_v7  ;;  %1123 = vmatpush1.bf16.msra.mxu1 %v819_v17  ;;  %v932_v7 = vld [vmem:[#allocation2 + $0x6d8] sm:$0xff]  ;;  %v929_v17 = vld [vmem:[#allocation2 + $0x6c0] sm:$0xff] }
 0x30f   :  { %1042 = vmatprep.subr.bf16.mxu0 %v826_v18  ;;  %1124 = vmatprep.subr.bf16.mxu1 %v828_v19  ;;  %v931_v18 = vld [vmem:[#allocation2 + $0x6d0] sm:$0xff]  ;;  %v938_v19 = vld [vmem:[#allocation2 + $0x708] sm:$0xff] }
 0x312   :  { %1043 = vmatpush1.bf16.msra.mxu0 %v825_v20  ;;  %1125 = vmatpush1.bf16.msra.mxu1 %v827_v21  ;;  %v940_v20 = vld [vmem:[#allocation2 + $0x718] sm:$0xff]  ;;  %v937_v21 = vld [vmem:[#allocation2 + $0x700] sm:$0xff] }
 0x313   :  { %1044 = vmatprep.subr.bf16.mxu0 %v834_v22  ;;  %1126 = vmatprep.subr.bf16.mxu1 %v836_v23  ;;  %v939_v22 = vld [vmem:[#allocation2 + $0x710] sm:$0xff]  ;;  %v946_v23 = vld [vmem:[#allocation2 + $0x748] sm:$0xff] }
 0x316   :  { %1045 = vmatpush1.bf16.msra.mxu0 %v833_v24  ;;  %1127 = vmatpush1.bf16.msra.mxu1 %v835_v25  ;;  %v948_v24 = vld [vmem:[#allocation2 + $0x758] sm:$0xff]  ;;  %v945_v25 = vld [vmem:[#allocation2 + $0x740] sm:$0xff] }
 0x317   :  { %1055 = vmatprep.subr.bf16.mxu0 %v842_v26  ;;  %1137 = vmatprep.subr.bf16.mxu1 %v844_v27  ;;  %v947_v26 = vld [vmem:[#allocation2 + $0x750] sm:$0xff]  ;;  %v954_v27 = vld [vmem:[#allocation2 + $0x788] sm:$0xff] }
 0x319   :  { %1047 = vmatmul.mubr.bf16.vlgmr.msra.gmra.mrb[0].mxu0 %v3732_v11  ;;  %1129 = vmatmul.mubr.bf16.vlgmr.msra.gmra.mrb[8].mxu1 %v3732_v11 }
 0x31a   :  { %1056 = vmatpush1.bf16.msra.mxu0 %v841_v28  ;;  %1138 = vmatpush1.bf16.msra.mxu1 %v843_v29  ;;  %v956_v28 = vld [vmem:[#allocation2 + $0x798] sm:$0xff]  ;;  %v953_v29 = vld [vmem:[#allocation2 + $0x780] sm:$0xff] }
 0x31b   :  { %1057 = vmatprep.subr.bf16.mxu0 %v850_v30  ;;  %1139 = vmatprep.subr.bf16.mxu1 %v852_v31  ;;  %v955_v30 = vld [vmem:[#allocation2 + $0x790] sm:$0xff]  ;;  %v962_v31 = vld [vmem:[#allocation2 + $0x7c8] sm:$0xff] }
 0x31c   :  { %1087 = vmatprep.mubr.bf16.mxu0 %v3738_v16  ;;  %1169 = vmatprep.mubr.bf16.mxu1 %v3738_v16 }
 0x31e   :  { %1058 = vmatpush1.bf16.msra.mxu0 %v849_v32  ;;  %1140 = vmatpush1.bf16.msra.mxu1 %v851_v33  ;;  %v964_v32 = vld [vmem:[#allocation2 + $0x7d8] sm:$0xff]  ;;  %v961_v33 = vld [vmem:[#allocation2 + $0x7c0] sm:$0xff] }
 0x31f   :  { %1059 = vmatprep.subr.bf16.mxu0 %v858_v34  ;;  %1141 = vmatprep.subr.bf16.mxu1 %v860_v35  ;;  %v963_v34 = vld [vmem:[#allocation2 + $0x7d0] sm:$0xff]  ;;  %v718_v35 = vld [vmem:[#allocation2 + $0x28] sm:$0xff] }
 0x322   :  { %1060 = vmatpush1.bf16.msra.mxu0 %v857_v36  ;;  %1142 = vmatpush1.bf16.msra.mxu1 %v859_v37  ;;  %v720_v36 = vld [vmem:[#allocation2 + $0x38] sm:$0xff]  ;;  %v717_v37 = vld [vmem:[#allocation2 + $0x20] sm:$0xff] }
 0x323   :  { %1061 = vmatprep.subr.bf16.mxu0 %v866_v38  ;;  %1143 = vmatprep.subr.bf16.mxu1 %v868_v39  ;;  %v719_v38 = vld [vmem:[#allocation2 + $0x30] sm:$0xff]  ;;  %v726_v39 = vld [vmem:[#allocation2 + $0x68] sm:$0xff] }
 0x326   :  { %1062 = vmatpush1.bf16.msra.mxu0 %v865_v40  ;;  %1144 = vmatpush1.bf16.msra.mxu1 %v867_v41  ;;  %v728_v40 = vld [vmem:[#allocation2 + $0x78] sm:$0xff]  ;;  %v725_v41 = vld [vmem:[#allocation2 + $0x60] sm:$0xff] }
 0x327   :  { %1063 = vmatprep.subr.bf16.mxu0 %v874_v42  ;;  %1145 = vmatprep.subr.bf16.mxu1 %v876_v43  ;;  %v727_v42 = vld [vmem:[#allocation2 + $0x70] sm:$0xff]  ;;  %v734_v43 = vld [vmem:[#allocation2 + $0xa8] sm:$0xff] }
 0x32a   :  { %1064 = vmatpush1.bf16.msra.mxu0 %v873_v44  ;;  %1146 = vmatpush1.bf16.msra.mxu1 %v875_v45  ;;  %v736_v44 = vld [vmem:[#allocation2 + $0xb8] sm:$0xff]  ;;  %v733_v45 = vld [vmem:[#allocation2 + $0xa0] sm:$0xff] }
 0x32b   :  { %1065 = vmatprep.subr.bf16.mxu0 %v882_v46  ;;  %1147 = vmatprep.subr.bf16.mxu1 %v884_v47  ;;  %v735_v46 = vld [vmem:[#allocation2 + $0xb0] sm:$0xff]  ;;  %v742_v47 = vld [vmem:[#allocation2 + $0xe8] sm:$0xff] }
 0x32e   :  { %1066 = vmatpush1.bf16.msra.mxu0 %v881_v48  ;;  %1148 = vmatpush1.bf16.msra.mxu1 %v883_v49  ;;  %v744_v48 = vld [vmem:[#allocation2 + $0xf8] sm:$0xff]  ;;  %v741_v49 = vld [vmem:[#allocation2 + $0xe0] sm:$0xff] }
 0x32f   :  { %1067 = vmatprep.subr.bf16.mxu0 %v890_v50  ;;  %1149 = vmatprep.subr.bf16.mxu1 %v892_v51  ;;  %v743_v50 = vld [vmem:[#allocation2 + $0xf0] sm:$0xff]  ;;  %v750_v51 = vld [vmem:[#allocation2 + $0x128] sm:$0xff] }
 0x332   :  { %1068 = vmatpush1.bf16.msra.mxu0 %v889_v52  ;;  %1150 = vmatpush1.bf16.msra.mxu1 %v891_v53  ;;  %v752_v52 = vld [vmem:[#allocation2 + $0x138] sm:$0xff]  ;;  %v751_v53 = vld [vmem:[#allocation2 + $0x130] sm:$0xff] }
 0x333   :  { %1069 = vmatprep.subr.bf16.mxu0 %v898_v54  ;;  %1151 = vmatprep.subr.bf16.mxu1 %v900_v55  ;;  %v758_v54 = vld [vmem:[#allocation2 + $0x168] sm:$0xff]  ;;  %v760_v55 = vld [vmem:[#allocation2 + $0x178] sm:$0xff] }
 0x336   :  { %1070 = vmatpush1.bf16.msra.mxu0 %v897_v56  ;;  %1152 = vmatpush1.bf16.msra.mxu1 %v899_v57  ;;  %v757_v56 = vld [vmem:[#allocation2 + $0x160] sm:$0xff]  ;;  %v759_v57 = vld [vmem:[#allocation2 + $0x170] sm:$0xff] }
 0x337   :  { %1071 = vmatprep.subr.bf16.mxu0 %v906_v58  ;;  %1153 = vmatprep.subr.bf16.mxu1 %v908_v59  ;;  %v766_v58 = vld [vmem:[#allocation2 + $0x1a8] sm:$0xff]  ;;  %v768_v59 = vld [vmem:[#allocation2 + $0x1b8] sm:$0xff] }
 0x33a   :  { %1072 = vmatpush1.bf16.msra.mxu0 %v905_v60  ;;  %1154 = vmatpush1.bf16.msra.mxu1 %v907_v61  ;;  %v765_v60 = vld [vmem:[#allocation2 + $0x1a0] sm:$0xff]  ;;  %v767_v61 = vld [vmem:[#allocation2 + $0x1b0] sm:$0xff] }
 0x33b   :  { %1073 = vmatprep.subr.bf16.mxu0 %v914_v62  ;;  %1155 = vmatprep.subr.bf16.mxu1 %v916_v63  ;;  %v774_v62 = vld [vmem:[#allocation2 + $0x1e8] sm:$0xff]  ;;  %v776_v63 = vld [vmem:[#allocation2 + $0x1f8] sm:$0xff] }
 0x33e   :  { %1074 = vmatpush1.bf16.msra.mxu0 %v913_v0  ;;  %1156 = vmatpush1.bf16.msra.mxu1 %v915_v1  ;;  %v773_v0 = vld [vmem:[#allocation2 + $0x1e0] sm:$0xff]  ;;  %v775_v1 = vld [vmem:[#allocation2 + $0x1f0] sm:$0xff] }
 0x33f   :  { %1075 = vmatprep.subr.bf16.mxu0 %v922_v2  ;;  %1157 = vmatprep.subr.bf16.mxu1 %v924_v3  ;;  %v782_v2 = vld [vmem:[#allocation2 + $0x228] sm:$0xff]  ;;  %v784_v3 = vld [vmem:[#allocation2 + $0x238] sm:$0xff] }
 0x342   :  { %1076 = vmatpush1.bf16.msra.mxu0 %v921_v4  ;;  %1158 = vmatpush1.bf16.msra.mxu1 %v923_v5  ;;  %v781_v4 = vld [vmem:[#allocation2 + $0x220] sm:$0xff]  ;;  %v783_v5 = vld [vmem:[#allocation2 + $0x230] sm:$0xff] }
 0x343   :  { %1077 = vmatprep.subr.bf16.mxu0 %v930_v6  ;;  %1159 = vmatprep.subr.bf16.mxu1 %v932_v7  ;;  %v790_v6 = vld [vmem:[#allocation2 + $0x268] sm:$0xff]  ;;  %v792_v7 = vld [vmem:[#allocation2 + $0x278] sm:$0xff] }
 0x346   :  { %1078 = vmatpush1.bf16.msra.mxu0 %v929_v17  ;;  %1160 = vmatpush1.bf16.msra.mxu1 %v931_v18  ;;  %v789_v17 = vld [vmem:[#allocation2 + $0x260] sm:$0xff]  ;;  %v791_v18 = vld [vmem:[#allocation2 + $0x270] sm:$0xff] }
 0x347   :  { %1079 = vmatprep.subr.bf16.mxu0 %v938_v19  ;;  %1161 = vmatprep.subr.bf16.mxu1 %v940_v20  ;;  %v798_v19 = vld [vmem:[#allocation2 + $0x2a8] sm:$0xff]  ;;  %v800_v20 = vld [vmem:[#allocation2 + $0x2b8] sm:$0xff] }
 0x34a   :  { %1080 = vmatpush1.bf16.msra.mxu0 %v937_v21  ;;  %1162 = vmatpush1.bf16.msra.mxu1 %v939_v22  ;;  %v797_v21 = vld [vmem:[#allocation2 + $0x2a0] sm:$0xff]  ;;  %v799_v22 = vld [vmem:[#allocation2 + $0x2b0] sm:$0xff] }
 0x34b   :  { %1081 = vmatprep.subr.bf16.mxu0 %v946_v23  ;;  %1163 = vmatprep.subr.bf16.mxu1 %v948_v24  ;;  %v806_v23 = vld [vmem:[#allocation2 + $0x2e8] sm:$0xff]  ;;  %v808_v24 = vld [vmem:[#allocation2 + $0x2f8] sm:$0xff] }
 0x34e   :  { %1082 = vmatpush1.bf16.msra.mxu0 %v945_v25  ;;  %1164 = vmatpush1.bf16.msra.mxu1 %v947_v26  ;;  %v805_v25 = vld [vmem:[#allocation2 + $0x2e0] sm:$0xff]  ;;  %v807_v26 = vld [vmem:[#allocation2 + $0x2f0] sm:$0xff] }
 0x34f   :  { %1083 = vmatprep.subr.bf16.mxu0 %v954_v27  ;;  %1165 = vmatprep.subr.bf16.mxu1 %v956_v28  ;;  %v814_v27 = vld [vmem:[#allocation2 + $0x328] sm:$0xff]  ;;  %v816_v28 = vld [vmem:[#allocation2 + $0x338] sm:$0xff] }
 0x352   :  { %1084 = vmatpush1.bf16.msra.mxu0 %v953_v29  ;;  %1166 = vmatpush1.bf16.msra.mxu1 %v955_v30  ;;  %v813_v29 = vld [vmem:[#allocation2 + $0x320] sm:$0xff]  ;;  %v815_v30 = vld [vmem:[#allocation2 + $0x330] sm:$0xff] }
 0x353   :  { %1085 = vmatprep.subr.bf16.mxu0 %v962_v31  ;;  %1167 = vmatprep.subr.bf16.mxu1 %v964_v32  ;;  %v822_v31 = vld [vmem:[#allocation2 + $0x368] sm:$0xff]  ;;  %v824_v32 = vld [vmem:[#allocation2 + $0x378] sm:$0xff] }
 0x356   :  { %1086 = vmatpush1.bf16.msra.mxu0 %v961_v33  ;;  %1168 = vmatpush1.bf16.msra.mxu1 %v963_v34  ;;  %v821_v33 = vld [vmem:[#allocation2 + $0x360] sm:$0xff]  ;;  %v823_v34 = vld [vmem:[#allocation2 + $0x370] sm:$0xff] }
 0x357   :  { %1178 = vmatprep.subr.bf16.mxu0 %v718_v35  ;;  %1260 = vmatprep.subr.bf16.mxu1 %v720_v36  ;;  %v830_v35 = vld [vmem:[#allocation2 + $0x3a8] sm:$0xff]  ;;  %v832_v36 = vld [vmem:[#allocation2 + $0x3b8] sm:$0xff] }
 0x359   :  { %1088 = vmatmul.mubr.bf16.vlgmr.msra.gmra.mrb[0].mxu0 %v3736_v13  ;;  %1170 = vmatmul.mubr.bf16.vlgmr.msra.gmra.mrb[8].mxu1 %v3736_v13 }
 0x35a   :  { %1179 = vmatpush1.bf16.msra.mxu0 %v717_v37  ;;  %1261 = vmatpush1.bf16.msra.mxu1 %v719_v38  ;;  %v829_v37 = vld [vmem:[#allocation2 + $0x3a0] sm:$0xff]  ;;  %v831_v38 = vld [vmem:[#allocation2 + $0x3b0] sm:$0xff] }
 0x35b   :  { %1180 = vmatprep.subr.bf16.mxu0 %v726_v39  ;;  %1262 = vmatprep.subr.bf16.mxu1 %v728_v40  ;;  %v838_v39 = vld [vmem:[#allocation2 + $0x3e8] sm:$0xff]  ;;  %v840_v40 = vld [vmem:[#allocation2 + $0x3f8] sm:$0xff] }
 0x35c   :  { %1210 = vmatprep.mubr.bf16.mxu0 %v3734_v12  ;;  %1292 = vmatprep.mubr.bf16.mxu1 %v3734_v12  ;;  %v749_v12 = vld [vmem:[#allocation2 + $0x120] sm:$0xff] }
 0x35e   :  { %1181 = vmatpush1.bf16.msra.mxu0 %v725_v41  ;;  %1263 = vmatpush1.bf16.msra.mxu1 %v727_v42  ;;  %v837_v41 = vld [vmem:[#allocation2 + $0x3e0] sm:$0xff]  ;;  %v839_v42 = vld [vmem:[#allocation2 + $0x3f0] sm:$0xff] }
 0x35f   :  { %1182 = vmatprep.subr.bf16.mxu0 %v734_v43  ;;  %1264 = vmatprep.subr.bf16.mxu1 %v736_v44  ;;  %v846_v43 = vld [vmem:[#allocation2 + $0x428] sm:$0xff]  ;;  %v848_v44 = vld [vmem:[#allocation2 + $0x438] sm:$0xff] }
 0x362   :  { %1183 = vmatpush1.bf16.msra.mxu0 %v733_v45  ;;  %1265 = vmatpush1.bf16.msra.mxu1 %v735_v46  ;;  %v845_v45 = vld [vmem:[#allocation2 + $0x420] sm:$0xff]  ;;  %v847_v46 = vld [vmem:[#allocation2 + $0x430] sm:$0xff] }
 0x363   :  { %1184 = vmatprep.subr.bf16.mxu0 %v742_v47  ;;  %1266 = vmatprep.subr.bf16.mxu1 %v744_v48  ;;  %v854_v47 = vld [vmem:[#allocation2 + $0x468] sm:$0xff]  ;;  %v856_v48 = vld [vmem:[#allocation2 + $0x478] sm:$0xff] }
 0x366   :  { %1185 = vmatpush1.bf16.msra.mxu0 %v741_v49  ;;  %1267 = vmatpush1.bf16.msra.mxu1 %v743_v50  ;;  %v853_v49 = vld [vmem:[#allocation2 + $0x460] sm:$0xff]  ;;  %v855_v50 = vld [vmem:[#allocation2 + $0x470] sm:$0xff] }
 0x367   :  { %1186 = vmatprep.subr.bf16.mxu0 %v750_v51  ;;  %1268 = vmatprep.subr.bf16.mxu1 %v752_v52  ;;  %v862_v51 = vld [vmem:[#allocation2 + $0x4a8] sm:$0xff]  ;;  %v864_v52 = vld [vmem:[#allocation2 + $0x4b8] sm:$0xff] }
 0x36a   :  { %1187 = vmatpush1.bf16.msra.mxu0 %v749_v12  ;;  %1269 = vmatpush1.bf16.msra.mxu1 %v751_v53  ;;  %v861_v12 = vld [vmem:[#allocation2 + $0x4a0] sm:$0xff]  ;;  %v863_v53 = vld [vmem:[#allocation2 + $0x4b0] sm:$0xff] }
 0x36b   :  { %1188 = vmatprep.subr.bf16.mxu0 %v758_v54  ;;  %1270 = vmatprep.subr.bf16.mxu1 %v760_v55  ;;  %v870_v54 = vld [vmem:[#allocation2 + $0x4e8] sm:$0xff]  ;;  %v869_v55 = vld [vmem:[#allocation2 + $0x4e0] sm:$0xff] }
 0x36e   :  { %1189 = vmatpush1.bf16.msra.mxu0 %v757_v56  ;;  %1271 = vmatpush1.bf16.msra.mxu1 %v759_v57  ;;  %v871_v56 = vld [vmem:[#allocation2 + $0x4f0] sm:$0xff]  ;;  %v878_v57 = vld [vmem:[#allocation2 + $0x528] sm:$0xff] }
 0x36f   :  { %1190 = vmatprep.subr.bf16.mxu0 %v766_v58  ;;  %1272 = vmatprep.subr.bf16.mxu1 %v768_v59  ;;  %v880_v58 = vld [vmem:[#allocation2 + $0x538] sm:$0xff]  ;;  %v879_v59 = vld [vmem:[#allocation2 + $0x530] sm:$0xff] }
 0x372   :  { %1191 = vmatpush1.bf16.msra.mxu0 %v765_v60  ;;  %1273 = vmatpush1.bf16.msra.mxu1 %v767_v61  ;;  %v886_v60 = vld [vmem:[#allocation2 + $0x568] sm:$0xff]  ;;  %v888_v61 = vld [vmem:[#allocation2 + $0x578] sm:$0xff] }
 0x373   :  { %1192 = vmatprep.subr.bf16.mxu0 %v774_v62  ;;  %1274 = vmatprep.subr.bf16.mxu1 %v776_v63  ;;  %v885_v62 = vld [vmem:[#allocation2 + $0x560] sm:$0xff]  ;;  %v887_v63 = vld [vmem:[#allocation2 + $0x570] sm:$0xff] }
 0x376   :  { %1193 = vmatpush1.bf16.msra.mxu0 %v773_v0  ;;  %1275 = vmatpush1.bf16.msra.mxu1 %v775_v1  ;;  %v894_v0 = vld [vmem:[#allocation2 + $0x5a8] sm:$0xff]  ;;  %v896_v1 = vld [vmem:[#allocation2 + $0x5b8] sm:$0xff] }
 0x377   :  { %1194 = vmatprep.subr.bf16.mxu0 %v782_v2  ;;  %1276 = vmatprep.subr.bf16.mxu1 %v784_v3  ;;  %v893_v2 = vld [vmem:[#allocation2 + $0x5a0] sm:$0xff]  ;;  %v895_v3 = vld [vmem:[#allocation2 + $0x5b0] sm:$0xff] }
 0x37a   :  { %1195 = vmatpush1.bf16.msra.mxu0 %v781_v4  ;;  %1277 = vmatpush1.bf16.msra.mxu1 %v783_v5  ;;  %v902_v4 = vld [vmem:[#allocation2 + $0x5e8] sm:$0xff]  ;;  %v904_v5 = vld [vmem:[#allocation2 + $0x5f8] sm:$0xff] }
 0x37b   :  { %1196 = vmatprep.subr.bf16.mxu0 %v790_v6  ;;  %1278 = vmatprep.subr.bf16.mxu1 %v792_v7  ;;  %v901_v6 = vld [vmem:[#allocation2 + $0x5e0] sm:$0xff]  ;;  %v903_v7 = vld [vmem:[#allocation2 + $0x5f0] sm:$0xff] }
 0x37e   :  { %1197 = vmatpush1.bf16.msra.mxu0 %v789_v17  ;;  %1279 = vmatpush1.bf16.msra.mxu1 %v791_v18  ;;  %v910_v17 = vld [vmem:[#allocation2 + $0x628] sm:$0xff]  ;;  %v912_v18 = vld [vmem:[#allocation2 + $0x638] sm:$0xff] }
 0x37f   :  { %1198 = vmatprep.subr.bf16.mxu0 %v798_v19  ;;  %1280 = vmatprep.subr.bf16.mxu1 %v800_v20  ;;  %v909_v19 = vld [vmem:[#allocation2 + $0x620] sm:$0xff]  ;;  %v911_v20 = vld [vmem:[#allocation2 + $0x630] sm:$0xff] }
 0x382   :  { %1199 = vmatpush1.bf16.msra.mxu0 %v797_v21  ;;  %1281 = vmatpush1.bf16.msra.mxu1 %v799_v22  ;;  %v918_v21 = vld [vmem:[#allocation2 + $0x668] sm:$0xff]  ;;  %v920_v22 = vld [vmem:[#allocation2 + $0x678] sm:$0xff] }
 0x383   :  { %1200 = vmatprep.subr.bf16.mxu0 %v806_v23  ;;  %1282 = vmatprep.subr.bf16.mxu1 %v808_v24  ;;  %v917_v23 = vld [vmem:[#allocation2 + $0x660] sm:$0xff]  ;;  %v919_v24 = vld [vmem:[#allocation2 + $0x670] sm:$0xff] }
 0x386   :  { %1201 = vmatpush1.bf16.msra.mxu0 %v805_v25  ;;  %1283 = vmatpush1.bf16.msra.mxu1 %v807_v26  ;;  %v926_v25 = vld [vmem:[#allocation2 + $0x6a8] sm:$0xff]  ;;  %v928_v26 = vld [vmem:[#allocation2 + $0x6b8] sm:$0xff] }
 0x387   :  { %1202 = vmatprep.subr.bf16.mxu0 %v814_v27  ;;  %1284 = vmatprep.subr.bf16.mxu1 %v816_v28  ;;  %v925_v27 = vld [vmem:[#allocation2 + $0x6a0] sm:$0xff]  ;;  %v927_v28 = vld [vmem:[#allocation2 + $0x6b0] sm:$0xff] }
 0x38a   :  { %1203 = vmatpush1.bf16.msra.mxu0 %v813_v29  ;;  %1285 = vmatpush1.bf16.msra.mxu1 %v815_v30  ;;  %v934_v29 = vld [vmem:[#allocation2 + $0x6e8] sm:$0xff]  ;;  %v936_v30 = vld [vmem:[#allocation2 + $0x6f8] sm:$0xff] }
 0x38b   :  { %1204 = vmatprep.subr.bf16.mxu0 %v822_v31  ;;  %1286 = vmatprep.subr.bf16.mxu1 %v824_v32  ;;  %v933_v31 = vld [vmem:[#allocation2 + $0x6e0] sm:$0xff]  ;;  %v935_v32 = vld [vmem:[#allocation2 + $0x6f0] sm:$0xff] }
 0x38e   :  { %1205 = vmatpush1.bf16.msra.mxu0 %v821_v33  ;;  %1287 = vmatpush1.bf16.msra.mxu1 %v823_v34  ;;  %v942_v33 = vld [vmem:[#allocation2 + $0x728] sm:$0xff]  ;;  %v944_v34 = vld [vmem:[#allocation2 + $0x738] sm:$0xff] }
 0x38f   :  { %1206 = vmatprep.subr.bf16.mxu0 %v830_v35  ;;  %1288 = vmatprep.subr.bf16.mxu1 %v832_v36  ;;  %v941_v35 = vld [vmem:[#allocation2 + $0x720] sm:$0xff]  ;;  %v943_v36 = vld [vmem:[#allocation2 + $0x730] sm:$0xff] }
 0x392   :  { %1207 = vmatpush1.bf16.msra.mxu0 %v829_v37  ;;  %1289 = vmatpush1.bf16.msra.mxu1 %v831_v38  ;;  %v950_v37 = vld [vmem:[#allocation2 + $0x768] sm:$0xff]  ;;  %v952_v38 = vld [vmem:[#allocation2 + $0x778] sm:$0xff] }
 0x393   :  { %1208 = vmatprep.subr.bf16.mxu0 %v838_v39  ;;  %1290 = vmatprep.subr.bf16.mxu1 %v840_v40  ;;  %v949_v39 = vld [vmem:[#allocation2 + $0x760] sm:$0xff]  ;;  %v951_v40 = vld [vmem:[#allocation2 + $0x770] sm:$0xff] }
 0x396   :  { %1209 = vmatpush1.bf16.msra.mxu0 %v837_v41  ;;  %1291 = vmatpush1.bf16.msra.mxu1 %v839_v42  ;;  %v958_v41 = vld [vmem:[#allocation2 + $0x7a8] sm:$0xff]  ;;  %v960_v42 = vld [vmem:[#allocation2 + $0x7b8] sm:$0xff] }
 0x397   :  { %1219 = vmatprep.subr.bf16.mxu0 %v846_v43  ;;  %1301 = vmatprep.subr.bf16.mxu1 %v848_v44  ;;  %v957_v43 = vld [vmem:[#allocation2 + $0x7a0] sm:$0xff]  ;;  %v959_v44 = vld [vmem:[#allocation2 + $0x7b0] sm:$0xff] }
 0x399   :  { %1211 = vmatmul.mubr.bf16.vlgmr.msra.gmra.mrb[4].mxu0 %v3732_v11  ;;  %1293 = vmatmul.mubr.bf16.vlgmr.msra.gmra.mrb[12].mxu1 %v3732_v11  ;;  %v872_v11 = vld [vmem:[#allocation2 + $0x4f8] sm:$0xff] }
 0x39a   :  { %1220 = vmatpush1.bf16.msra.mxu0 %v845_v45  ;;  %1302 = vmatpush1.bf16.msra.mxu1 %v847_v46  ;;  %v966_v45 = vld [vmem:[#allocation2 + $0x7e8] sm:$0xff]  ;;  %v968_v46 = vld [vmem:[#allocation2 + $0x7f8] sm:$0xff] }
 0x39b   :  { %1221 = vmatprep.subr.bf16.mxu0 %v854_v47  ;;  %1303 = vmatprep.subr.bf16.mxu1 %v856_v48  ;;  %v965_v47 = vld [vmem:[#allocation2 + $0x7e0] sm:$0xff]  ;;  %v967_v48 = vld [vmem:[#allocation2 + $0x7f0] sm:$0xff] }
 0x39c   :  { %1251 = vmatprep.mubr.bf16.mxu0 %v3738_v16  ;;  %1333 = vmatprep.mubr.bf16.mxu1 %v3738_v16  ;;  %v877_v16 = vld [vmem:[#allocation2 + $0x520] sm:$0xff] }
 0x39e   :  { %1222 = vmatpush1.bf16.msra.mxu0 %v853_v49  ;;  %1304 = vmatpush1.bf16.msra.mxu1 %v855_v50 }
 0x39f   :  { %1223 = vmatprep.subr.bf16.mxu0 %v862_v51  ;;  %1305 = vmatprep.subr.bf16.mxu1 %v864_v52 }
 0x3a2   :  { %1224 = vmatpush1.bf16.msra.mxu0 %v861_v12  ;;  %1306 = vmatpush1.bf16.msra.mxu1 %v863_v53 }
 0x3a3   :  { %1225 = vmatprep.subr.bf16.mxu0 %v870_v54  ;;  %1307 = vmatprep.subr.bf16.mxu1 %v872_v11 }
 0x3a6   :  { %1226 = vmatpush1.bf16.msra.mxu0 %v869_v55  ;;  %1308 = vmatpush1.bf16.msra.mxu1 %v871_v56  ;;  %v3098_v55 = vld [vmem:[%s3962_s7 + $0x3] ss:$8 sm:$0xf] }
 0x3a7   :  { %1227 = vmatprep.subr.bf16.mxu0 %v878_v57  ;;  %1309 = vmatprep.subr.bf16.mxu1 %v880_v58  ;;  %v3099_v56 = vld [vmem:[%s3962_s7 + $0x3] ss:$8 sm:$0xf0] }
 0x3a8   :  { %v972_v57 = vor.u32 %v3099_v56, %v3098_v55 }
 0x3aa   :  { %1228 = vmatpush1.bf16.msra.mxu0 %v877_v16  ;;  %1310 = vmatpush1.bf16.msra.mxu1 %v879_v59  ;;  %v977_v58 = vrot.slane %v972_v57, %v3700_v9 }
 0x3ab   :  { %1229 = vmatprep.subr.bf16.mxu0 %v886_v60  ;;  %1311 = vmatprep.subr.bf16.mxu1 %v888_v61  ;;  %v985_v60 = vrot.slane %v972_v57, %v3711_v14 }
 0x3ae   :  { %1230 = vmatpush1.bf16.msra.mxu0 %v885_v62  ;;  %1312 = vmatpush1.bf16.msra.mxu1 %v887_v63  ;;  %v3766_v62 = vsub.s32 4, %v3697_v8  ;;  %v3769_v63 = vsub.s32 5, %v3697_v8 }
 0x3af   :  { %1231 = vmatprep.subr.bf16.mxu0 %v894_v0  ;;  %1313 = vmatprep.subr.bf16.mxu1 %v896_v1  ;;  %v989_v1 = vrot.slane %v972_v57, %v3714_v15 }
 0x3b2   :  { %1232 = vmatpush1.bf16.msra.mxu0 %v893_v2  ;;  %1314 = vmatpush1.bf16.msra.mxu1 %v895_v3  ;;  %v993_v3 = vrot.slane %v972_v57, %v3766_v62 }
 0x3b3   :  { %1233 = vmatprep.subr.bf16.mxu0 %v902_v4  ;;  %1315 = vmatprep.subr.bf16.mxu1 %v904_v5  ;;  %v3774_v4 = vsub.s32 6, %v3697_v8  ;;  %v997_v5 = vrot.slane %v972_v57, %v3769_v63 }
 0x3b6   :  { %1234 = vmatpush1.bf16.msra.mxu0 %v901_v6  ;;  %1316 = vmatpush1.bf16.msra.mxu1 %v903_v7  ;;  %v3778_v7 = vsub.s32 7, %v3697_v8 }
 0x3b7   :  { %1235 = vmatprep.subr.bf16.mxu0 %v910_v17  ;;  %1317 = vmatprep.subr.bf16.mxu1 %v912_v18 }
 0x3ba   :  { %1236 = vmatpush1.bf16.msra.mxu0 %v909_v19  ;;  %1318 = vmatpush1.bf16.msra.mxu1 %v911_v20 }
 0x3bb   :  { %1237 = vmatprep.subr.bf16.mxu0 %v918_v21  ;;  %1319 = vmatprep.subr.bf16.mxu1 %v920_v22  ;;  %v1001_v21 = vrot.slane %v972_v57, %v3774_v4 }
 0x3be   :  { %1238 = vmatpush1.bf16.msra.mxu0 %v917_v23  ;;  %1320 = vmatpush1.bf16.msra.mxu1 %v919_v24 }
 0x3bf   :  { %1239 = vmatprep.subr.bf16.mxu0 %v926_v25  ;;  %1321 = vmatprep.subr.bf16.mxu1 %v928_v26 }
 0x3c2   :  { %1240 = vmatpush1.bf16.msra.mxu0 %v925_v27  ;;  %1322 = vmatpush1.bf16.msra.mxu1 %v927_v28  ;;  %v1005_v28 = vrot.slane %v972_v57, %v3778_v7 }
 0x3c3   :  { %1241 = vmatprep.subr.bf16.mxu0 %v934_v29  ;;  %1323 = vmatprep.subr.bf16.mxu1 %v936_v30 }
 0x3c6   :  { %1242 = vmatpush1.bf16.msra.mxu0 %v933_v31  ;;  %1324 = vmatpush1.bf16.msra.mxu1 %v935_v32 }
 0x3c7   :  { %1243 = vmatprep.subr.bf16.mxu0 %v942_v33  ;;  %1325 = vmatprep.subr.bf16.mxu1 %v944_v34 }
 0x3ca   :  { %1244 = vmatpush1.bf16.msra.mxu0 %v941_v35  ;;  %1326 = vmatpush1.bf16.msra.mxu1 %v943_v36 }
 0x3cb   :  { %1245 = vmatprep.subr.bf16.mxu0 %v950_v37  ;;  %1327 = vmatprep.subr.bf16.mxu1 %v952_v38 }
 0x3ce   :  { %1246 = vmatpush1.bf16.msra.mxu0 %v949_v39  ;;  %1328 = vmatpush1.bf16.msra.mxu1 %v951_v40 }
 0x3cf   :  { %1247 = vmatprep.subr.bf16.mxu0 %v958_v41  ;;  %1329 = vmatprep.subr.bf16.mxu1 %v960_v42 }
 0x3d2   :  { %1248 = vmatpush1.bf16.msra.mxu0 %v957_v43  ;;  %1330 = vmatpush1.bf16.msra.mxu1 %v959_v44 }
 0x3d3   :  { %1249 = vmatprep.subr.bf16.mxu0 %v966_v45  ;;  %1331 = vmatprep.subr.bf16.mxu1 %v968_v46 }
 0x3d6   :  { %1250 = vmatpush1.bf16.msra.mxu0 %v965_v47  ;;  %1332 = vmatpush1.bf16.msra.mxu1 %v967_v48 }
 0x3d9   :  { %1252 = vmatmul.mubr.bf16.vlgmr.msra.gmra.mrb[4].mxu0 %v3736_v13  ;;  %1334 = vmatmul.mubr.bf16.vlgmr.msra.gmra.mrb[12].mxu1 %v3736_v13  ;;  %v981_v13 = vrot.slane %v972_v57, %v3703_v10 }
 0x42c   :  { %v1089_v49 = vpop.f32.mrb[0].mxu0  ;;  %v1171_v50 = vpop.f32.mrb[8].mxu1 }
 0x42d   :  { %v1091_v51 = vpop.f32.mrb[1].mxu0  ;;  %v1173_v52 = vpop.f32.mrb[9].mxu1  ;;  %v3236_v16 = vadd.f32 %v1089_v49, %v977_v58  ;;  %v3238_v0 = vadd.f32 %v1171_v50, %v985_v60  ;;  %v3101_v60 = vld [vmem:[%s3962_s7 + $0x4] ss:$8 sm:$0xf0] }
 0x42e   :  { %v1093_v12 = vpop.f32.mrb[2].mxu0  ;;  %v1175_v53 = vpop.f32.mrb[10].mxu1  ;;  %v3237_v59 = vadd.f32 %v1091_v51, %v981_v13  ;;  %v3239_v6 = vadd.f32 %v1173_v52, %v989_v1 }
 0x42f   :  { %v1094_v54 = vpop.f32.mrb[3].mxu0  ;;  %v1176_v11 = vpop.f32.mrb[11].mxu1 }
 0x430   :  { %v1342_v61 = vadd.f32 %v3237_v59, %v3236_v16 }
 0x432   :  { %v1343_v2 = vadd.f32 %v3238_v0, %v1342_v61  ;;  %v3102_v61 = vld [vmem:[%s3962_s7 + $0x5] ss:$8 sm:$0xf] }
 0x434   :  { %v1344_v19 = vadd.f32 %v3239_v6, %v1343_v2 }
 0x4ac   :  { %v1253_v17 = vpop.f32.mrb[4].mxu0  ;;  %v1335_v18 = vpop.f32.mrb[12].mxu1 }
 0x4ad   :  { %v3240_v20 = vadd.f32 %v1253_v17, %v993_v3  ;;  %v1255_v22 = vpop.f32.mrb[5].mxu0  ;;  %v1337_v23 = vpop.f32.mrb[13].mxu1  ;;  %v3242_v31 = vadd.f32 %v1335_v18, %v1001_v21 }
 0x4ae   :  { %v3241_v24 = vadd.f32 %v1255_v22, %v997_v5  ;;  %v1257_v25 = vpop.f32.mrb[6].mxu0  ;;  %v1339_v26 = vpop.f32.mrb[14].mxu1  ;;  %v3243_v8 = vadd.f32 %v1337_v23, %v1005_v28 }
 0x4af   :  { %v1345_v27 = vadd.f32 %v3240_v20, %v1344_v19  ;;  %v1258_v29 = vpop.f32.mrb[7].mxu0  ;;  %v1340_v30 = vpop.f32.mrb[15].mxu1 }
 0x4b1   :  { %v1346_v32 = vadd.f32 %v3241_v24, %v1345_v27 }
 0x4b3   :  { %v1347_v33 = vadd.f32 %v3242_v31, %v1346_v32 }
 0x4b5   :  { %v1348_v34 = vadd.f32 %v3243_v8, %v1347_v33 }
 0x4b7   :  { %1349 = vadd.xlane.f32.xlu0 %v1348_v34 }
 0x544   :  { %v1350_v35 = vpop.xlane.xlu0 %1349 }
 0x545   :  { %v1352_v36 = vmul.f32 0.0009765625, %v1350_v35 }
 0x547   :  { %v1353_v37 = vsub.f32 %v3236_v16, %v1352_v36  ;;  %v1354_v38 = vsub.f32 %v3237_v59, %v1352_v36  ;;  %v1355_v39 = vsub.f32 %v3238_v0, %v1352_v36  ;;  %v1356_v40 = vsub.f32 %v3239_v6, %v1352_v36  ;;  %v3100_v59 = vld [vmem:[%s3962_s7 + $0x4] ss:$8 sm:$0xf]  ;;  %v3103_v0 = vld [vmem:[%s3962_s7 + $0x5] ss:$8 sm:$0xf0] }
 0x548   :  { %v1357_v43 = vsub.f32 %v3240_v20, %v1352_v36  ;;  %v1358_v46 = vsub.f32 %v3241_v24, %v1352_v36  ;;  %v1359_v49 = vsub.f32 %v3242_v31, %v1352_v36  ;;  %v1360_v52 = vsub.f32 %v3243_v8, %v1352_v36 }
 0x549   :  { %v1361_v41 = vmul.f32 %v1353_v37, %v1353_v37  ;;  %v1362_v42 = vmul.f32 %v1354_v38, %v1354_v38  ;;  %v1363_v44 = vmul.f32 %v1355_v39, %v1355_v39  ;;  %v1364_v47 = vmul.f32 %v1356_v40, %v1356_v40 }
 0x54a   :  { %v1365_v50 = vmul.f32 %v1357_v43, %v1357_v43  ;;  %v1366_v12 = vmul.f32 %v1358_v46, %v1358_v46  ;;  %v1367_v54 = vmul.f32 %v1359_v49, %v1359_v49  ;;  %v1368_v55 = vmul.f32 %v1360_v52, %v1360_v52 }
 0x54b   :  { %v1369_v45 = vadd.f32 %v1362_v42, %v1361_v41  ;;  %v1392_v1 = vor.u32 %v3101_v60, %v3100_v59  ;;  %v1445_v2 = vor.u32 %v3103_v0, %v3102_v61 }
 0x54d   :  { %v1370_v48 = vadd.f32 %v1369_v45, %v1363_v44  ;;  %v1397_v3 = vrot.slane %v1392_v1, %v3700_v9  ;;  %v1401_v5 = vrot.slane %v1392_v1, %v3703_v10  ;;  %v1405_v6 = vrot.slane %v1392_v1, %v3711_v14 }
 0x54e   :  { %v1409_v17 = vrot.slane %v1392_v1, %v3714_v15  ;;  %v1413_v18 = vrot.slane %v1392_v1, %v3766_v62  ;;  %v1450_v19 = vrot.slane %v1445_v2, %v3700_v9  ;;  %v1454_v20 = vrot.slane %v1445_v2, %v3703_v10 }
 0x54f   :  { %v1371_v51 = vadd.f32 %v1370_v48, %v1364_v47  ;;  %v1458_v21 = vrot.slane %v1445_v2, %v3711_v14  ;;  %v1462_v22 = vrot.slane %v1445_v2, %v3714_v15  ;;  %v1466_v23 = vrot.slane %v1445_v2, %v3766_v62 }
 0x550   :  { %v1421_v24 = vrot.slane %v1392_v1, %v3774_v4  ;;  %v1474_v25 = vrot.slane %v1445_v2, %v3774_v4  ;;  %v1417_v27 = vrot.slane %v1392_v1, %v3769_v63  ;;  %v1470_v28 = vrot.slane %v1445_v2, %v3769_v63 }
 0x551   :  { %v1372_v53 = vadd.f32 %v1371_v51, %v1365_v50  ;;  %v1425_v29 = vrot.slane %v1392_v1, %v3778_v7  ;;  %v1478_v30 = vrot.slane %v1445_v2, %v3778_v7 }
 0x553   :  { %v1373_v11 = vadd.f32 %v1372_v53, %v1366_v12 }
 0x555   :  { %v1374_v56 = vadd.f32 %v1373_v11, %v1367_v54 }
 0x557   :  { %v1375_v57 = vadd.f32 %v1374_v56, %v1368_v55 }
 0x559   :  { %1376 = vadd.xlane.f32.xlu0 %v1375_v57 }
 0x5e6   :  { %v1377_v58 = vpop.xlane.xlu0 %1376 }
 0x5e7   :  { %v1378_v13 = vmul.f32 0.0009765625, %v1377_v58 }
 0x5e9   :  { %v1379_v16 = vadd.f32 1e-05, %v1378_v13 }
 0x5eb   :  { %3413 = vrsqrt.f32 %v1379_v16 }
 0x5f5   :  { %v3414_v26 = vpop.eup %3413 }
 0x5f6   :  { %v1381_v31 = vmul.f32 %v3414_v26, %v1353_v37  ;;  %v1382_v32 = vmul.f32 %v3414_v26, %v1354_v38  ;;  %v1383_v8 = vmul.f32 %v3414_v26, %v1355_v39  ;;  %v1384_v33 = vmul.f32 %v3414_v26, %v1356_v40 }
 0x5f7   :  { %v1385_v34 = vmul.f32 %v3414_v26, %v1357_v43  ;;  %v1386_v35 = vmul.f32 %v3414_v26, %v1358_v46  ;;  %v1387_v62 = vmul.f32 %v3414_v26, %v1359_v49  ;;  %v1388_v36 = vmul.f32 %v3414_v26, %v1360_v52 }
 0x5f8   :  { %v1434_v41 = vmul.f32 %v1397_v3, %v1381_v31  ;;  %v1435_v42 = vmul.f32 %v1401_v5, %v1382_v32  ;;  %v1436_v4 = vmul.f32 %v1405_v6, %v1383_v8  ;;  %v1437_v44 = vmul.f32 %v1409_v17, %v1384_v33 }
 0x5f9   :  { %v1438_v45 = vmul.f32 %v1413_v18, %v1385_v34  ;;  %v1439_v47 = vmul.f32 %v1417_v27, %v1386_v35  ;;  %v1440_v48 = vmul.f32 %v1421_v24, %v1387_v62  ;;  %v1441_v63 = vmul.f32 %v1425_v29, %v1388_v36 }
 0x5fa   :  { %v1487_v50 = vadd.f32 %v1450_v19, %v1434_v41  ;;  %v1488_v51 = vadd.f32 %v1454_v20, %v1435_v42  ;;  %v1489_v12 = vadd.f32 %v1458_v21, %v1436_v4  ;;  %v1490_v7 = vadd.f32 %v1462_v22, %v1437_v44 }
 0x5fb   :  { %v1491_v37 = vadd.f32 %v1466_v23, %v1438_v45  ;;  %v1492_v38 = vadd.f32 %v1470_v28, %v1439_v47  ;;  %v1493_v39 = vadd.f32 %v1474_v25, %v1440_v48  ;;  %v1494_v40 = vadd.f32 %v1478_v30, %v1441_v63 }
 0x5fc   :  { %v1495_v43 = vmax.f32 %v1487_v50, 0.0  ;;  %v1496_v46 = vmax.f32 %v1488_v51, 0.0  ;;  %v1497_v49 = vmax.f32 %v1489_v12, 0.0  ;;  %v1498_v52 = vmax.f32 %v1490_v7, 0.0 }
 0x5fd   :  { %v1499_v53 = vmax.f32 %v1491_v37, 0.0  ;;  %v1500_v54 = vmax.f32 %v1492_v38, 0.0  ;;  %v1501_v11 = vmax.f32 %v1493_v39, 0.0  ;;  %v1502_v55 = vmax.f32 %v1494_v40, 0.0 }
 0x5fe   :  { %v3810_v56 = vpack.c.bf16 %v1495_v43, %v1495_v43  ;;  %v1504_v57 = vpack.c.bf16 %v1496_v46, %v1496_v46  ;;  %v3812_v58 = vpack.c.bf16 %v1497_v49, %v1497_v49  ;;  %v3814_v13 = vpack.c.bf16 %v1498_v52, %v1498_v52 }
 0x5ff   :  { %v3816_v16 = vpack.c.bf16 %v1499_v53, %v1499_v53  ;;  %v3818_v59 = vpack.c.bf16 %v1500_v54, %v1500_v54  ;;  %v3820_v60 = vpack.c.bf16 %v1501_v11, %v1501_v11  ;;  %v3822_v61 = vpack.c.bf16 %v1502_v55, %v1502_v55 }
 0x600   :  { %3587 = dma.done.wait [#allocation4 + $0x1], 32768 }
 0x601   :  { %3588 = vsyncadd [#allocation4 + $0x1], 4294934528  ;;  %1826 = vmatprep.mubr.bf16.mxu0 %v1504_v57  ;;  %1990 = vmatprep.mubr.bf16.mxu1 %v1504_v57  ;;  %v1516_v0 = vld [vmem:[#allocation3 + $0x8] sm:$0xff]  ;;  %v1518_v1 = vld [vmem:[#allocation3 + $0x18] sm:$0xff]  ;;  %vm2909_vm0 = vcmask 523264   ;;  %vm3607_vm1 = vmmov 0  }
 0x602   :  { %v1515_v2 = vld [vmem:[#allocation3] sm:$0xff]  ;;  %1794 = vmatprep.subr.bf16.mxu0 %v1516_v0  ;;  %1958 = vmatprep.subr.bf16.mxu1 %v1518_v1  ;;  %v1517_v3 = vld [vmem:[#allocation3 + $0x10] sm:$0xff]  ;;  %v1520_v5 = vld [vmem:[#allocation3 + $0x28] sm:$0xff] }
 0x603   :  { %v1522_v6 = vld [vmem:[#allocation3 + $0x38] sm:$0xff]  ;;  %1795 = vmatpush1.bf16.msra.mxu0 %v1515_v2  ;;  %1959 = vmatpush1.bf16.msra.mxu1 %v1517_v3  ;;  %v1519_v17 = vld [vmem:[#allocation3 + $0x20] sm:$0xff]  ;;  %v1521_v18 = vld [vmem:[#allocation3 + $0x30] sm:$0xff] }
 0x604   :  { %1796 = vmatprep.subr.bf16.mxu0 %v1520_v5  ;;  %1960 = vmatprep.subr.bf16.mxu1 %v1522_v6  ;;  %v1524_v19 = vld [vmem:[#allocation3 + $0x48] sm:$0xff]  ;;  %v1526_v20 = vld [vmem:[#allocation3 + $0x58] sm:$0xff]  ;;  %v1523_v21 = vld [vmem:[#allocation3 + $0x40] sm:$0xff] }
 0x605   :  { %v1525_v22 = vld [vmem:[#allocation3 + $0x50] sm:$0xff]  ;;  %v1528_v23 = vld [vmem:[#allocation3 + $0x68] sm:$0xff]  ;;  %v1530_v24 = vld [vmem:[#allocation3 + $0x78] sm:$0xff] }
 0x606   :  { %v1527_v25 = vld [vmem:[#allocation3 + $0x60] sm:$0xff]  ;;  %v1529_v26 = vld [vmem:[#allocation3 + $0x70] sm:$0xff]  ;;  %v1532_v27 = vld [vmem:[#allocation3 + $0x88] sm:$0xff] }
 0x607   :  { %1797 = vmatpush1.bf16.msra.mxu0 %v1519_v17  ;;  %1961 = vmatpush1.bf16.msra.mxu1 %v1521_v18  ;;  %v1534_v28 = vld [vmem:[#allocation3 + $0x98] sm:$0xff]  ;;  %v1531_v29 = vld [vmem:[#allocation3 + $0x80] sm:$0xff]  ;;  %v1533_v30 = vld [vmem:[#allocation3 + $0x90] sm:$0xff] }
 0x608   :  { %1798 = vmatprep.subr.bf16.mxu0 %v1524_v19  ;;  %1962 = vmatprep.subr.bf16.mxu1 %v1526_v20  ;;  %v1536_v31 = vld [vmem:[#allocation3 + $0xa8] sm:$0xff]  ;;  %v1538_v32 = vld [vmem:[#allocation3 + $0xb8] sm:$0xff]  ;;  %v1535_v8 = vld [vmem:[#allocation3 + $0xa0] sm:$0xff] }
 0x609   :  { %v1537_v33 = vld [vmem:[#allocation3 + $0xb0] sm:$0xff]  ;;  %v1540_v34 = vld [vmem:[#allocation3 + $0xc8] sm:$0xff]  ;;  %v1542_v35 = vld [vmem:[#allocation3 + $0xd8] sm:$0xff] }
 0x60a   :  { %v1539_v62 = vld [vmem:[#allocation3 + $0xc0] sm:$0xff]  ;;  %v1541_v36 = vld [vmem:[#allocation3 + $0xd0] sm:$0xff]  ;;  %v1544_v41 = vld [vmem:[#allocation3 + $0xe8] sm:$0xff] }
 0x60b   :  { %1799 = vmatpush1.bf16.msra.mxu0 %v1523_v21  ;;  %1963 = vmatpush1.bf16.msra.mxu1 %v1525_v22  ;;  %v1546_v42 = vld [vmem:[#allocation3 + $0xf8] sm:$0xff]  ;;  %v1543_v4 = vld [vmem:[#allocation3 + $0xe0] sm:$0xff]  ;;  %v1545_v44 = vld [vmem:[#allocation3 + $0xf0] sm:$0xff] }
 0x60c   :  { %1800 = vmatprep.subr.bf16.mxu0 %v1528_v23  ;;  %1964 = vmatprep.subr.bf16.mxu1 %v1530_v24  ;;  %v1548_v45 = vld [vmem:[#allocation3 + $0x108] sm:$0xff]  ;;  %v1550_v47 = vld [vmem:[#allocation3 + $0x118] sm:$0xff]  ;;  %v1547_v48 = vld [vmem:[#allocation3 + $0x100] sm:$0xff] }
 0x60d   :  { %v1549_v63 = vld [vmem:[#allocation3 + $0x110] sm:$0xff]  ;;  %v1552_v50 = vld [vmem:[#allocation3 + $0x128] sm:$0xff]  ;;  %v1554_v51 = vld [vmem:[#allocation3 + $0x138] sm:$0xff] }
 0x60e   :  { %v1551_v12 = vld [vmem:[#allocation3 + $0x120] sm:$0xff]  ;;  %v1553_v7 = vld [vmem:[#allocation3 + $0x130] sm:$0xff]  ;;  %v1556_v37 = vld [vmem:[#allocation3 + $0x148] sm:$0xff] }
 0x60f   :  { %1801 = vmatpush1.bf16.msra.mxu0 %v1527_v25  ;;  %1965 = vmatpush1.bf16.msra.mxu1 %v1529_v26  ;;  %v1558_v38 = vld [vmem:[#allocation3 + $0x158] sm:$0xff]  ;;  %v1555_v39 = vld [vmem:[#allocation3 + $0x140] sm:$0xff]  ;;  %v1557_v40 = vld [vmem:[#allocation3 + $0x150] sm:$0xff] }
 0x610   :  { %1802 = vmatprep.subr.bf16.mxu0 %v1532_v27  ;;  %1966 = vmatprep.subr.bf16.mxu1 %v1534_v28  ;;  %v1560_v43 = vld [vmem:[#allocation3 + $0x168] sm:$0xff]  ;;  %v1562_v46 = vld [vmem:[#allocation3 + $0x178] sm:$0xff]  ;;  %v1559_v49 = vld [vmem:[#allocation3 + $0x160] sm:$0xff] }
 0x611   :  { %v1561_v52 = vld [vmem:[#allocation3 + $0x170] sm:$0xff]  ;;  %v1564_v53 = vld [vmem:[#allocation3 + $0x188] sm:$0xff]  ;;  %v1566_v54 = vld [vmem:[#allocation3 + $0x198] sm:$0xff] }
 0x612   :  { %v1563_v11 = vld [vmem:[#allocation3 + $0x180] sm:$0xff]  ;;  %v1565_v55 = vld [vmem:[#allocation3 + $0x190] sm:$0xff]  ;;  %v1568_v57 = vld [vmem:[#allocation3 + $0x1a8] sm:$0xff] }
 0x613   :  { %1803 = vmatpush1.bf16.msra.mxu0 %v1531_v29  ;;  %1967 = vmatpush1.bf16.msra.mxu1 %v1533_v30  ;;  %v1570_v0 = vld [vmem:[#allocation3 + $0x1b8] sm:$0xff]  ;;  %v1567_v1 = vld [vmem:[#allocation3 + $0x1a0] sm:$0xff]  ;;  %v1569_v2 = vld [vmem:[#allocation3 + $0x1b0] sm:$0xff] }
 0x614   :  { %1804 = vmatprep.subr.bf16.mxu0 %v1536_v31  ;;  %1968 = vmatprep.subr.bf16.mxu1 %v1538_v32  ;;  %v1572_v3 = vld [vmem:[#allocation3 + $0x1c8] sm:$0xff]  ;;  %v1574_v5 = vld [vmem:[#allocation3 + $0x1d8] sm:$0xff]  ;;  %v1571_v6 = vld [vmem:[#allocation3 + $0x1c0] sm:$0xff] }
 0x615   :  { %v1573_v17 = vld [vmem:[#allocation3 + $0x1d0] sm:$0xff]  ;;  %v1576_v18 = vld [vmem:[#allocation3 + $0x1e8] sm:$0xff]  ;;  %v1578_v19 = vld [vmem:[#allocation3 + $0x1f8] sm:$0xff] }
 0x616   :  { %v1575_v20 = vld [vmem:[#allocation3 + $0x1e0] sm:$0xff]  ;;  %v1577_v21 = vld [vmem:[#allocation3 + $0x1f0] sm:$0xff]  ;;  %v1580_v22 = vld [vmem:[#allocation3 + $0x208] sm:$0xff] }
 0x617   :  { %1805 = vmatpush1.bf16.msra.mxu0 %v1535_v8  ;;  %1969 = vmatpush1.bf16.msra.mxu1 %v1537_v33  ;;  %v1582_v23 = vld [vmem:[#allocation3 + $0x218] sm:$0xff]  ;;  %v1579_v24 = vld [vmem:[#allocation3 + $0x200] sm:$0xff]  ;;  %v1581_v25 = vld [vmem:[#allocation3 + $0x210] sm:$0xff] }
 0x618   :  { %1806 = vmatprep.subr.bf16.mxu0 %v1540_v34  ;;  %1970 = vmatprep.subr.bf16.mxu1 %v1542_v35  ;;  %v1584_v26 = vld [vmem:[#allocation3 + $0x228] sm:$0xff]  ;;  %v1586_v27 = vld [vmem:[#allocation3 + $0x238] sm:$0xff]  ;;  %v1583_v28 = vld [vmem:[#allocation3 + $0x220] sm:$0xff] }
 0x619   :  { %v1585_v29 = vld [vmem:[#allocation3 + $0x230] sm:$0xff]  ;;  %v1588_v30 = vld [vmem:[#allocation3 + $0x248] sm:$0xff]  ;;  %v1590_v31 = vld [vmem:[#allocation3 + $0x258] sm:$0xff] }
 0x61a   :  { %v1587_v32 = vld [vmem:[#allocation3 + $0x240] sm:$0xff]  ;;  %v1589_v8 = vld [vmem:[#allocation3 + $0x250] sm:$0xff]  ;;  %v1592_v33 = vld [vmem:[#allocation3 + $0x268] sm:$0xff] }
 0x61b   :  { %1807 = vmatpush1.bf16.msra.mxu0 %v1539_v62  ;;  %1971 = vmatpush1.bf16.msra.mxu1 %v1541_v36  ;;  %v1591_v34 = vld [vmem:[#allocation3 + $0x260] sm:$0xff]  ;;  %v1593_v35 = vld [vmem:[#allocation3 + $0x270] sm:$0xff]  ;;  %v1596_v62 = vld [vmem:[#allocation3 + $0x288] sm:$0xff] }
 0x61c   :  { %1808 = vmatprep.subr.bf16.mxu0 %v1544_v41  ;;  %1972 = vmatprep.subr.bf16.mxu1 %v1546_v42  ;;  %v1598_v36 = vld [vmem:[#allocation3 + $0x298] sm:$0xff]  ;;  %v1595_v41 = vld [vmem:[#allocation3 + $0x280] sm:$0xff]  ;;  %v1600_v42 = vld [vmem:[#allocation3 + $0x2a8] sm:$0xff] }
 0x61f   :  { %1809 = vmatpush1.bf16.msra.mxu0 %v1543_v4  ;;  %1973 = vmatpush1.bf16.msra.mxu1 %v1545_v44  ;;  %v1602_v4 = vld [vmem:[#allocation3 + $0x2b8] sm:$0xff]  ;;  %v1599_v44 = vld [vmem:[#allocation3 + $0x2a0] sm:$0xff] }
 0x620   :  { %1810 = vmatprep.subr.bf16.mxu0 %v1548_v45  ;;  %1974 = vmatprep.subr.bf16.mxu1 %v1550_v47  ;;  %v1601_v45 = vld [vmem:[#allocation3 + $0x2b0] sm:$0xff]  ;;  %v1604_v47 = vld [vmem:[#allocation3 + $0x2c8] sm:$0xff] }
 0x623   :  { %1811 = vmatpush1.bf16.msra.mxu0 %v1547_v48  ;;  %1975 = vmatpush1.bf16.msra.mxu1 %v1549_v63  ;;  %v1606_v48 = vld [vmem:[#allocation3 + $0x2d8] sm:$0xff]  ;;  %v1603_v63 = vld [vmem:[#allocation3 + $0x2c0] sm:$0xff] }
 0x624   :  { %1812 = vmatprep.subr.bf16.mxu0 %v1552_v50  ;;  %1976 = vmatprep.subr.bf16.mxu1 %v1554_v51  ;;  %v1605_v50 = vld [vmem:[#allocation3 + $0x2d0] sm:$0xff]  ;;  %v1608_v51 = vld [vmem:[#allocation3 + $0x2e8] sm:$0xff] }
 0x627   :  { %1813 = vmatpush1.bf16.msra.mxu0 %v1551_v12  ;;  %1977 = vmatpush1.bf16.msra.mxu1 %v1553_v7  ;;  %v1610_v12 = vld [vmem:[#allocation3 + $0x2f8] sm:$0xff]  ;;  %v1607_v7 = vld [vmem:[#allocation3 + $0x2e0] sm:$0xff] }
 0x628   :  { %1814 = vmatprep.subr.bf16.mxu0 %v1556_v37  ;;  %1978 = vmatprep.subr.bf16.mxu1 %v1558_v38  ;;  %v1609_v37 = vld [vmem:[#allocation3 + $0x2f0] sm:$0xff]  ;;  %v1612_v38 = vld [vmem:[#allocation3 + $0x308] sm:$0xff] }
 0x62b   :  { %1815 = vmatpush1.bf16.msra.mxu0 %v1555_v39  ;;  %1979 = vmatpush1.bf16.msra.mxu1 %v1557_v40  ;;  %v1614_v39 = vld [vmem:[#allocation3 + $0x318] sm:$0xff]  ;;  %v1611_v40 = vld [vmem:[#allocation3 + $0x300] sm:$0xff] }
 0x62c   :  { %1816 = vmatprep.subr.bf16.mxu0 %v1560_v43  ;;  %1980 = vmatprep.subr.bf16.mxu1 %v1562_v46  ;;  %v1613_v43 = vld [vmem:[#allocation3 + $0x310] sm:$0xff]  ;;  %v1616_v46 = vld [vmem:[#allocation3 + $0x328] sm:$0xff] }
 0x62f   :  { %1817 = vmatpush1.bf16.msra.mxu0 %v1559_v49  ;;  %1981 = vmatpush1.bf16.msra.mxu1 %v1561_v52  ;;  %v1618_v49 = vld [vmem:[#allocation3 + $0x338] sm:$0xff]  ;;  %v1615_v52 = vld [vmem:[#allocation3 + $0x320] sm:$0xff] }
 0x630   :  { %1818 = vmatprep.subr.bf16.mxu0 %v1564_v53  ;;  %1982 = vmatprep.subr.bf16.mxu1 %v1566_v54  ;;  %v1617_v53 = vld [vmem:[#allocation3 + $0x330] sm:$0xff]  ;;  %v1620_v54 = vld [vmem:[#allocation3 + $0x348] sm:$0xff] }
 0x633   :  { %1819 = vmatpush1.bf16.msra.mxu0 %v1563_v11  ;;  %1983 = vmatpush1.bf16.msra.mxu1 %v1565_v55  ;;  %v1622_v11 = vld [vmem:[#allocation3 + $0x358] sm:$0xff]  ;;  %v1619_v55 = vld [vmem:[#allocation3 + $0x340] sm:$0xff] }
 0x634   :  { %1820 = vmatprep.subr.bf16.mxu0 %v1568_v57  ;;  %1984 = vmatprep.subr.bf16.mxu1 %v1570_v0  ;;  %v1621_v57 = vld [vmem:[#allocation3 + $0x350] sm:$0xff]  ;;  %v1624_v0 = vld [vmem:[#allocation3 + $0x368] sm:$0xff] }
 0x637   :  { %1821 = vmatpush1.bf16.msra.mxu0 %v1567_v1  ;;  %1985 = vmatpush1.bf16.msra.mxu1 %v1569_v2  ;;  %v1626_v1 = vld [vmem:[#allocation3 + $0x378] sm:$0xff]  ;;  %v1623_v2 = vld [vmem:[#allocation3 + $0x360] sm:$0xff] }
 0x638   :  { %1822 = vmatprep.subr.bf16.mxu0 %v1572_v3  ;;  %1986 = vmatprep.subr.bf16.mxu1 %v1574_v5  ;;  %v1625_v3 = vld [vmem:[#allocation3 + $0x370] sm:$0xff]  ;;  %v1628_v5 = vld [vmem:[#allocation3 + $0x388] sm:$0xff] }
 0x63b   :  { %1823 = vmatpush1.bf16.msra.mxu0 %v1571_v6  ;;  %1987 = vmatpush1.bf16.msra.mxu1 %v1573_v17  ;;  %v1630_v6 = vld [vmem:[#allocation3 + $0x398] sm:$0xff]  ;;  %v1627_v17 = vld [vmem:[#allocation3 + $0x380] sm:$0xff] }
 0x63c   :  { %1824 = vmatprep.subr.bf16.mxu0 %v1576_v18  ;;  %1988 = vmatprep.subr.bf16.mxu1 %v1578_v19  ;;  %v1629_v18 = vld [vmem:[#allocation3 + $0x390] sm:$0xff]  ;;  %v1632_v19 = vld [vmem:[#allocation3 + $0x3a8] sm:$0xff] }
 0x63f   :  { %1825 = vmatpush1.bf16.msra.mxu0 %v1575_v20  ;;  %1989 = vmatpush1.bf16.msra.mxu1 %v1577_v21  ;;  %v1634_v20 = vld [vmem:[#allocation3 + $0x3b8] sm:$0xff]  ;;  %v1631_v21 = vld [vmem:[#allocation3 + $0x3a0] sm:$0xff] }
 0x640   :  { %1835 = vmatprep.subr.bf16.mxu0 %v1580_v22  ;;  %1999 = vmatprep.subr.bf16.mxu1 %v1582_v23  ;;  %v1633_v22 = vld [vmem:[#allocation3 + $0x3b0] sm:$0xff]  ;;  %v1636_v23 = vld [vmem:[#allocation3 + $0x3c8] sm:$0xff] }
 0x642   :  { %1827 = vmatmul.mubr.bf16.vlgmr.msra.gmra.mrb[8].mxu0 %v3810_v56  ;;  %1991 = vmatmul.mubr.bf16.vlgmr.msra.gmra.mrb[16].mxu1 %v3810_v56  ;;  %v1594_v56 = vld [vmem:[#allocation3 + $0x278] sm:$0xff] }
 0x643   :  { %1836 = vmatpush1.bf16.msra.mxu0 %v1579_v24  ;;  %2000 = vmatpush1.bf16.msra.mxu1 %v1581_v25  ;;  %v1638_v24 = vld [vmem:[#allocation3 + $0x3d8] sm:$0xff]  ;;  %v1635_v25 = vld [vmem:[#allocation3 + $0x3c0] sm:$0xff] }
 0x644   :  { %1837 = vmatprep.subr.bf16.mxu0 %v1584_v26  ;;  %2001 = vmatprep.subr.bf16.mxu1 %v1586_v27  ;;  %v1637_v26 = vld [vmem:[#allocation3 + $0x3d0] sm:$0xff]  ;;  %v1640_v27 = vld [vmem:[#allocation3 + $0x3e8] sm:$0xff] }
 0x645   :  { %1867 = vmatprep.mubr.bf16.mxu0 %v3814_v13  ;;  %2031 = vmatprep.mubr.bf16.mxu1 %v3814_v13  ;;  %v1597_v13 = vld [vmem:[#allocation3 + $0x290] sm:$0xff] }
 0x647   :  { %1838 = vmatpush1.bf16.msra.mxu0 %v1583_v28  ;;  %2002 = vmatpush1.bf16.msra.mxu1 %v1585_v29  ;;  %v1642_v28 = vld [vmem:[#allocation3 + $0x3f8] sm:$0xff]  ;;  %v1639_v29 = vld [vmem:[#allocation3 + $0x3e0] sm:$0xff] }
 0x648   :  { %1839 = vmatprep.subr.bf16.mxu0 %v1588_v30  ;;  %2003 = vmatprep.subr.bf16.mxu1 %v1590_v31  ;;  %v1641_v30 = vld [vmem:[#allocation3 + $0x3f0] sm:$0xff]  ;;  %v1644_v31 = vld [vmem:[#allocation3 + $0x408] sm:$0xff] }
 0x64b   :  { %1840 = vmatpush1.bf16.msra.mxu0 %v1587_v32  ;;  %2004 = vmatpush1.bf16.msra.mxu1 %v1589_v8  ;;  %v1646_v32 = vld [vmem:[#allocation3 + $0x418] sm:$0xff]  ;;  %v1643_v8 = vld [vmem:[#allocation3 + $0x400] sm:$0xff] }
 0x64c   :  { %1841 = vmatprep.subr.bf16.mxu0 %v1592_v33  ;;  %2005 = vmatprep.subr.bf16.mxu1 %v1594_v56  ;;  %v1645_v33 = vld [vmem:[#allocation3 + $0x410] sm:$0xff]  ;;  %v1648_v56 = vld [vmem:[#allocation3 + $0x428] sm:$0xff] }
 0x64f   :  { %1842 = vmatpush1.bf16.msra.mxu0 %v1591_v34  ;;  %2006 = vmatpush1.bf16.msra.mxu1 %v1593_v35  ;;  %v1650_v34 = vld [vmem:[#allocation3 + $0x438] sm:$0xff]  ;;  %v1647_v35 = vld [vmem:[#allocation3 + $0x420] sm:$0xff] }
 0x650   :  { %1843 = vmatprep.subr.bf16.mxu0 %v1596_v62  ;;  %2007 = vmatprep.subr.bf16.mxu1 %v1598_v36  ;;  %v1649_v62 = vld [vmem:[#allocation3 + $0x430] sm:$0xff]  ;;  %v1652_v36 = vld [vmem:[#allocation3 + $0x448] sm:$0xff] }
 0x653   :  { %1844 = vmatpush1.bf16.msra.mxu0 %v1595_v41  ;;  %2008 = vmatpush1.bf16.msra.mxu1 %v1597_v13  ;;  %v1654_v41 = vld [vmem:[#allocation3 + $0x458] sm:$0xff]  ;;  %v1651_v13 = vld [vmem:[#allocation3 + $0x440] sm:$0xff] }
 0x654   :  { %1845 = vmatprep.subr.bf16.mxu0 %v1600_v42  ;;  %2009 = vmatprep.subr.bf16.mxu1 %v1602_v4  ;;  %v1653_v42 = vld [vmem:[#allocation3 + $0x450] sm:$0xff]  ;;  %v1656_v4 = vld [vmem:[#allocation3 + $0x468] sm:$0xff] }
 0x657   :  { %1846 = vmatpush1.bf16.msra.mxu0 %v1599_v44  ;;  %2010 = vmatpush1.bf16.msra.mxu1 %v1601_v45  ;;  %v1655_v44 = vld [vmem:[#allocation3 + $0x460] sm:$0xff]  ;;  %v1657_v45 = vld [vmem:[#allocation3 + $0x470] sm:$0xff] }
 0x658   :  { %1847 = vmatprep.subr.bf16.mxu0 %v1604_v47  ;;  %2011 = vmatprep.subr.bf16.mxu1 %v1606_v48  ;;  %v1660_v47 = vld [vmem:[#allocation3 + $0x488] sm:$0xff]  ;;  %v1662_v48 = vld [vmem:[#allocation3 + $0x498] sm:$0xff] }
 0x65b   :  { %1848 = vmatpush1.bf16.msra.mxu0 %v1603_v63  ;;  %2012 = vmatpush1.bf16.msra.mxu1 %v1605_v50  ;;  %v1661_v63 = vld [vmem:[#allocation3 + $0x490] sm:$0xff]  ;;  %v1664_v50 = vld [vmem:[#allocation3 + $0x4a8] sm:$0xff] }
 0x65c   :  { %1849 = vmatprep.subr.bf16.mxu0 %v1608_v51  ;;  %2013 = vmatprep.subr.bf16.mxu1 %v1610_v12  ;;  %v1666_v51 = vld [vmem:[#allocation3 + $0x4b8] sm:$0xff]  ;;  %v1663_v12 = vld [vmem:[#allocation3 + $0x4a0] sm:$0xff] }
 0x65f   :  { %1850 = vmatpush1.bf16.msra.mxu0 %v1607_v7  ;;  %2014 = vmatpush1.bf16.msra.mxu1 %v1609_v37  ;;  %v1665_v7 = vld [vmem:[#allocation3 + $0x4b0] sm:$0xff]  ;;  %v1668_v37 = vld [vmem:[#allocation3 + $0x4c8] sm:$0xff] }
 0x660   :  { %1851 = vmatprep.subr.bf16.mxu0 %v1612_v38  ;;  %2015 = vmatprep.subr.bf16.mxu1 %v1614_v39  ;;  %v1670_v38 = vld [vmem:[#allocation3 + $0x4d8] sm:$0xff]  ;;  %v1667_v39 = vld [vmem:[#allocation3 + $0x4c0] sm:$0xff] }
 0x663   :  { %1852 = vmatpush1.bf16.msra.mxu0 %v1611_v40  ;;  %2016 = vmatpush1.bf16.msra.mxu1 %v1613_v43  ;;  %v1669_v40 = vld [vmem:[#allocation3 + $0x4d0] sm:$0xff]  ;;  %v1672_v43 = vld [vmem:[#allocation3 + $0x4e8] sm:$0xff] }
 0x664   :  { %1853 = vmatprep.subr.bf16.mxu0 %v1616_v46  ;;  %2017 = vmatprep.subr.bf16.mxu1 %v1618_v49  ;;  %v1674_v46 = vld [vmem:[#allocation3 + $0x4f8] sm:$0xff]  ;;  %v1671_v49 = vld [vmem:[#allocation3 + $0x4e0] sm:$0xff] }
 0x667   :  { %1854 = vmatpush1.bf16.msra.mxu0 %v1615_v52  ;;  %2018 = vmatpush1.bf16.msra.mxu1 %v1617_v53  ;;  %v1673_v52 = vld [vmem:[#allocation3 + $0x4f0] sm:$0xff]  ;;  %v1676_v53 = vld [vmem:[#allocation3 + $0x508] sm:$0xff] }
 0x668   :  { %1855 = vmatprep.subr.bf16.mxu0 %v1620_v54  ;;  %2019 = vmatprep.subr.bf16.mxu1 %v1622_v11  ;;  %v1678_v54 = vld [vmem:[#allocation3 + $0x518] sm:$0xff]  ;;  %v1675_v11 = vld [vmem:[#allocation3 + $0x500] sm:$0xff] }
 0x66b   :  { %1856 = vmatpush1.bf16.msra.mxu0 %v1619_v55  ;;  %2020 = vmatpush1.bf16.msra.mxu1 %v1621_v57  ;;  %v1677_v55 = vld [vmem:[#allocation3 + $0x510] sm:$0xff]  ;;  %v1680_v57 = vld [vmem:[#allocation3 + $0x528] sm:$0xff] }
 0x66c   :  { %1857 = vmatprep.subr.bf16.mxu0 %v1624_v0  ;;  %2021 = vmatprep.subr.bf16.mxu1 %v1626_v1  ;;  %v1682_v0 = vld [vmem:[#allocation3 + $0x538] sm:$0xff]  ;;  %v1679_v1 = vld [vmem:[#allocation3 + $0x520] sm:$0xff] }
 0x66f   :  { %1858 = vmatpush1.bf16.msra.mxu0 %v1623_v2  ;;  %2022 = vmatpush1.bf16.msra.mxu1 %v1625_v3  ;;  %v1681_v2 = vld [vmem:[#allocation3 + $0x530] sm:$0xff]  ;;  %v1684_v3 = vld [vmem:[#allocation3 + $0x548] sm:$0xff] }
 0x670   :  { %1859 = vmatprep.subr.bf16.mxu0 %v1628_v5  ;;  %2023 = vmatprep.subr.bf16.mxu1 %v1630_v6  ;;  %v1686_v5 = vld [vmem:[#allocation3 + $0x558] sm:$0xff]  ;;  %v1683_v6 = vld [vmem:[#allocation3 + $0x540] sm:$0xff] }
 0x673   :  { %1860 = vmatpush1.bf16.msra.mxu0 %v1627_v17  ;;  %2024 = vmatpush1.bf16.msra.mxu1 %v1629_v18  ;;  %v1685_v17 = vld [vmem:[#allocation3 + $0x550] sm:$0xff]  ;;  %v1688_v18 = vld [vmem:[#allocation3 + $0x568] sm:$0xff] }
 0x674   :  { %1861 = vmatprep.subr.bf16.mxu0 %v1632_v19  ;;  %2025 = vmatprep.subr.bf16.mxu1 %v1634_v20  ;;  %v1690_v19 = vld [vmem:[#allocation3 + $0x578] sm:$0xff]  ;;  %v1687_v20 = vld [vmem:[#allocation3 + $0x560] sm:$0xff] }
 0x677   :  { %1862 = vmatpush1.bf16.msra.mxu0 %v1631_v21  ;;  %2026 = vmatpush1.bf16.msra.mxu1 %v1633_v22  ;;  %v1689_v21 = vld [vmem:[#allocation3 + $0x570] sm:$0xff]  ;;  %v1692_v22 = vld [vmem:[#allocation3 + $0x588] sm:$0xff] }
 0x678   :  { %1863 = vmatprep.subr.bf16.mxu0 %v1636_v23  ;;  %2027 = vmatprep.subr.bf16.mxu1 %v1638_v24  ;;  %v1694_v23 = vld [vmem:[#allocation3 + $0x598] sm:$0xff]  ;;  %v1691_v24 = vld [vmem:[#allocation3 + $0x580] sm:$0xff] }
 0x67b   :  { %1864 = vmatpush1.bf16.msra.mxu0 %v1635_v25  ;;  %2028 = vmatpush1.bf16.msra.mxu1 %v1637_v26  ;;  %v1693_v25 = vld [vmem:[#allocation3 + $0x590] sm:$0xff]  ;;  %v1696_v26 = vld [vmem:[#allocation3 + $0x5a8] sm:$0xff] }
 0x67c   :  { %1865 = vmatprep.subr.bf16.mxu0 %v1640_v27  ;;  %2029 = vmatprep.subr.bf16.mxu1 %v1642_v28  ;;  %v1698_v27 = vld [vmem:[#allocation3 + $0x5b8] sm:$0xff]  ;;  %v1695_v28 = vld [vmem:[#allocation3 + $0x5a0] sm:$0xff] }
 0x67f   :  { %1866 = vmatpush1.bf16.msra.mxu0 %v1639_v29  ;;  %2030 = vmatpush1.bf16.msra.mxu1 %v1641_v30  ;;  %v1697_v29 = vld [vmem:[#allocation3 + $0x5b0] sm:$0xff]  ;;  %v1700_v30 = vld [vmem:[#allocation3 + $0x5c8] sm:$0xff] }
 0x680   :  { %1876 = vmatprep.subr.bf16.mxu0 %v1644_v31  ;;  %2040 = vmatprep.subr.bf16.mxu1 %v1646_v32  ;;  %v1702_v31 = vld [vmem:[#allocation3 + $0x5d8] sm:$0xff]  ;;  %v1699_v32 = vld [vmem:[#allocation3 + $0x5c0] sm:$0xff] }
 0x682   :  { %1868 = vmatmul.mubr.bf16.vlgmr.msra.gmra.mrb[8].mxu0 %v3812_v58  ;;  %2032 = vmatmul.mubr.bf16.vlgmr.msra.gmra.mrb[16].mxu1 %v3812_v58  ;;  %v1658_v58 = vld [vmem:[#allocation3 + $0x478] sm:$0xff] }
 0x683   :  { %1877 = vmatpush1.bf16.msra.mxu0 %v1643_v8  ;;  %2041 = vmatpush1.bf16.msra.mxu1 %v1645_v33  ;;  %v1701_v8 = vld [vmem:[#allocation3 + $0x5d0] sm:$0xff]  ;;  %v1704_v33 = vld [vmem:[#allocation3 + $0x5e8] sm:$0xff] }
 0x684   :  { %1878 = vmatprep.subr.bf16.mxu0 %v1648_v56  ;;  %2042 = vmatprep.subr.bf16.mxu1 %v1650_v34  ;;  %v1706_v56 = vld [vmem:[#allocation3 + $0x5f8] sm:$0xff]  ;;  %v1703_v34 = vld [vmem:[#allocation3 + $0x5e0] sm:$0xff] }
 0x685   :  { %1908 = vmatprep.mubr.bf16.mxu0 %v3818_v59  ;;  %2072 = vmatprep.mubr.bf16.mxu1 %v3818_v59  ;;  %v1659_v59 = vld [vmem:[#allocation3 + $0x480] sm:$0xff] }
 0x687   :  { %1879 = vmatpush1.bf16.msra.mxu0 %v1647_v35  ;;  %2043 = vmatpush1.bf16.msra.mxu1 %v1649_v62  ;;  %v1705_v35 = vld [vmem:[#allocation3 + $0x5f0] sm:$0xff]  ;;  %v1708_v62 = vld [vmem:[#allocation3 + $0x608] sm:$0xff] }
 0x688   :  { %1880 = vmatprep.subr.bf16.mxu0 %v1652_v36  ;;  %2044 = vmatprep.subr.bf16.mxu1 %v1654_v41  ;;  %v1710_v36 = vld [vmem:[#allocation3 + $0x618] sm:$0xff]  ;;  %v1707_v41 = vld [vmem:[#allocation3 + $0x600] sm:$0xff] }
 0x68b   :  { %1881 = vmatpush1.bf16.msra.mxu0 %v1651_v13  ;;  %2045 = vmatpush1.bf16.msra.mxu1 %v1653_v42  ;;  %v1709_v13 = vld [vmem:[#allocation3 + $0x610] sm:$0xff]  ;;  %v1712_v42 = vld [vmem:[#allocation3 + $0x628] sm:$0xff] }
 0x68c   :  { %1882 = vmatprep.subr.bf16.mxu0 %v1656_v4  ;;  %2046 = vmatprep.subr.bf16.mxu1 %v1658_v58  ;;  %v1714_v4 = vld [vmem:[#allocation3 + $0x638] sm:$0xff]  ;;  %v1711_v58 = vld [vmem:[#allocation3 + $0x620] sm:$0xff] }
 0x68f   :  { %1883 = vmatpush1.bf16.msra.mxu0 %v1655_v44  ;;  %2047 = vmatpush1.bf16.msra.mxu1 %v1657_v45  ;;  %v1713_v44 = vld [vmem:[#allocation3 + $0x630] sm:$0xff]  ;;  %v1716_v45 = vld [vmem:[#allocation3 + $0x648] sm:$0xff] }
 0x690   :  { %1884 = vmatprep.subr.bf16.mxu0 %v1660_v47  ;;  %2048 = vmatprep.subr.bf16.mxu1 %v1662_v48  ;;  %v1718_v47 = vld [vmem:[#allocation3 + $0x658] sm:$0xff]  ;;  %v1715_v48 = vld [vmem:[#allocation3 + $0x640] sm:$0xff] }
 0x693   :  { %1885 = vmatpush1.bf16.msra.mxu0 %v1659_v59  ;;  %2049 = vmatpush1.bf16.msra.mxu1 %v1661_v63  ;;  %v1717_v59 = vld [vmem:[#allocation3 + $0x650] sm:$0xff]  ;;  %v1720_v63 = vld [vmem:[#allocation3 + $0x668] sm:$0xff] }
 0x694   :  { %1886 = vmatprep.subr.bf16.mxu0 %v1664_v50  ;;  %2050 = vmatprep.subr.bf16.mxu1 %v1666_v51  ;;  %v1719_v50 = vld [vmem:[#allocation3 + $0x660] sm:$0xff]  ;;  %v1721_v51 = vld [vmem:[#allocation3 + $0x670] sm:$0xff] }
 0x697   :  { %1887 = vmatpush1.bf16.msra.mxu0 %v1663_v12  ;;  %2051 = vmatpush1.bf16.msra.mxu1 %v1665_v7  ;;  %v1724_v12 = vld [vmem:[#allocation3 + $0x688] sm:$0xff]  ;;  %v1726_v7 = vld [vmem:[#allocation3 + $0x698] sm:$0xff] }
 0x698   :  { %1888 = vmatprep.subr.bf16.mxu0 %v1668_v37  ;;  %2052 = vmatprep.subr.bf16.mxu1 %v1670_v38  ;;  %v1725_v37 = vld [vmem:[#allocation3 + $0x690] sm:$0xff]  ;;  %v1728_v38 = vld [vmem:[#allocation3 + $0x6a8] sm:$0xff] }
 0x69b   :  { %1889 = vmatpush1.bf16.msra.mxu0 %v1667_v39  ;;  %2053 = vmatpush1.bf16.msra.mxu1 %v1669_v40  ;;  %v1730_v39 = vld [vmem:[#allocation3 + $0x6b8] sm:$0xff]  ;;  %v1727_v40 = vld [vmem:[#allocation3 + $0x6a0] sm:$0xff] }
 0x69c   :  { %1890 = vmatprep.subr.bf16.mxu0 %v1672_v43  ;;  %2054 = vmatprep.subr.bf16.mxu1 %v1674_v46  ;;  %v1729_v43 = vld [vmem:[#allocation3 + $0x6b0] sm:$0xff]  ;;  %v1732_v46 = vld [vmem:[#allocation3 + $0x6c8] sm:$0xff] }
 0x69f   :  { %1891 = vmatpush1.bf16.msra.mxu0 %v1671_v49  ;;  %2055 = vmatpush1.bf16.msra.mxu1 %v1673_v52  ;;  %v1734_v49 = vld [vmem:[#allocation3 + $0x6d8] sm:$0xff]  ;;  %v1731_v52 = vld [vmem:[#allocation3 + $0x6c0] sm:$0xff] }
 0x6a0   :  { %1892 = vmatprep.subr.bf16.mxu0 %v1676_v53  ;;  %2056 = vmatprep.subr.bf16.mxu1 %v1678_v54  ;;  %v1733_v53 = vld [vmem:[#allocation3 + $0x6d0] sm:$0xff]  ;;  %v1736_v54 = vld [vmem:[#allocation3 + $0x6e8] sm:$0xff] }
 0x6a3   :  { %1893 = vmatpush1.bf16.msra.mxu0 %v1675_v11  ;;  %2057 = vmatpush1.bf16.msra.mxu1 %v1677_v55  ;;  %v1738_v11 = vld [vmem:[#allocation3 + $0x6f8] sm:$0xff]  ;;  %v1735_v55 = vld [vmem:[#allocation3 + $0x6e0] sm:$0xff] }
 0x6a4   :  { %1894 = vmatprep.subr.bf16.mxu0 %v1680_v57  ;;  %2058 = vmatprep.subr.bf16.mxu1 %v1682_v0  ;;  %v1737_v57 = vld [vmem:[#allocation3 + $0x6f0] sm:$0xff]  ;;  %v1740_v0 = vld [vmem:[#allocation3 + $0x708] sm:$0xff] }
 0x6a7   :  { %1895 = vmatpush1.bf16.msra.mxu0 %v1679_v1  ;;  %2059 = vmatpush1.bf16.msra.mxu1 %v1681_v2  ;;  %v1742_v1 = vld [vmem:[#allocation3 + $0x718] sm:$0xff]  ;;  %v1739_v2 = vld [vmem:[#allocation3 + $0x700] sm:$0xff] }
 0x6a8   :  { %1896 = vmatprep.subr.bf16.mxu0 %v1684_v3  ;;  %2060 = vmatprep.subr.bf16.mxu1 %v1686_v5  ;;  %v1741_v3 = vld [vmem:[#allocation3 + $0x710] sm:$0xff]  ;;  %v1744_v5 = vld [vmem:[#allocation3 + $0x728] sm:$0xff] }
 0x6ab   :  { %1897 = vmatpush1.bf16.msra.mxu0 %v1683_v6  ;;  %2061 = vmatpush1.bf16.msra.mxu1 %v1685_v17  ;;  %v1746_v6 = vld [vmem:[#allocation3 + $0x738] sm:$0xff]  ;;  %v1743_v17 = vld [vmem:[#allocation3 + $0x720] sm:$0xff] }
 0x6ac   :  { %1898 = vmatprep.subr.bf16.mxu0 %v1688_v18  ;;  %2062 = vmatprep.subr.bf16.mxu1 %v1690_v19  ;;  %v1745_v18 = vld [vmem:[#allocation3 + $0x730] sm:$0xff]  ;;  %v1748_v19 = vld [vmem:[#allocation3 + $0x748] sm:$0xff] }
 0x6af   :  { %1899 = vmatpush1.bf16.msra.mxu0 %v1687_v20  ;;  %2063 = vmatpush1.bf16.msra.mxu1 %v1689_v21  ;;  %v1750_v20 = vld [vmem:[#allocation3 + $0x758] sm:$0xff]  ;;  %v1747_v21 = vld [vmem:[#allocation3 + $0x740] sm:$0xff] }
 0x6b0   :  { %1900 = vmatprep.subr.bf16.mxu0 %v1692_v22  ;;  %2064 = vmatprep.subr.bf16.mxu1 %v1694_v23  ;;  %v1749_v22 = vld [vmem:[#allocation3 + $0x750] sm:$0xff]  ;;  %v1752_v23 = vld [vmem:[#allocation3 + $0x768] sm:$0xff] }
 0x6b3   :  { %1901 = vmatpush1.bf16.msra.mxu0 %v1691_v24  ;;  %2065 = vmatpush1.bf16.msra.mxu1 %v1693_v25  ;;  %v1754_v24 = vld [vmem:[#allocation3 + $0x778] sm:$0xff]  ;;  %v1751_v25 = vld [vmem:[#allocation3 + $0x760] sm:$0xff] }
 0x6b4   :  { %1902 = vmatprep.subr.bf16.mxu0 %v1696_v26  ;;  %2066 = vmatprep.subr.bf16.mxu1 %v1698_v27  ;;  %v1753_v26 = vld [vmem:[#allocation3 + $0x770] sm:$0xff]  ;;  %v1756_v27 = vld [vmem:[#allocation3 + $0x788] sm:$0xff] }
 0x6b7   :  { %1903 = vmatpush1.bf16.msra.mxu0 %v1695_v28  ;;  %2067 = vmatpush1.bf16.msra.mxu1 %v1697_v29  ;;  %v1758_v28 = vld [vmem:[#allocation3 + $0x798] sm:$0xff]  ;;  %v1755_v29 = vld [vmem:[#allocation3 + $0x780] sm:$0xff] }
 0x6b8   :  { %1904 = vmatprep.subr.bf16.mxu0 %v1700_v30  ;;  %2068 = vmatprep.subr.bf16.mxu1 %v1702_v31  ;;  %v1757_v30 = vld [vmem:[#allocation3 + $0x790] sm:$0xff]  ;;  %v1760_v31 = vld [vmem:[#allocation3 + $0x7a8] sm:$0xff] }
 0x6bb   :  { %1905 = vmatpush1.bf16.msra.mxu0 %v1699_v32  ;;  %2069 = vmatpush1.bf16.msra.mxu1 %v1701_v8  ;;  %v1762_v32 = vld [vmem:[#allocation3 + $0x7b8] sm:$0xff]  ;;  %v1759_v8 = vld [vmem:[#allocation3 + $0x7a0] sm:$0xff] }
 0x6bc   :  { %1906 = vmatprep.subr.bf16.mxu0 %v1704_v33  ;;  %2070 = vmatprep.subr.bf16.mxu1 %v1706_v56  ;;  %v1761_v33 = vld [vmem:[#allocation3 + $0x7b0] sm:$0xff]  ;;  %v1764_v56 = vld [vmem:[#allocation3 + $0x7c8] sm:$0xff] }
 0x6bf   :  { %1907 = vmatpush1.bf16.msra.mxu0 %v1703_v34  ;;  %2071 = vmatpush1.bf16.msra.mxu1 %v1705_v35  ;;  %v1766_v34 = vld [vmem:[#allocation3 + $0x7d8] sm:$0xff]  ;;  %v1763_v35 = vld [vmem:[#allocation3 + $0x7c0] sm:$0xff] }
 0x6c0   :  { %1917 = vmatprep.subr.bf16.mxu0 %v1708_v62  ;;  %2081 = vmatprep.subr.bf16.mxu1 %v1710_v36  ;;  %v1765_v62 = vld [vmem:[#allocation3 + $0x7d0] sm:$0xff]  ;;  %v1768_v36 = vld [vmem:[#allocation3 + $0x7e8] sm:$0xff] }
 0x6c2   :  { %1909 = vmatmul.mubr.bf16.vlgmr.msra.gmra.mrb[8].mxu0 %v3816_v16  ;;  %2073 = vmatmul.mubr.bf16.vlgmr.msra.gmra.mrb[16].mxu1 %v3816_v16  ;;  %v1722_v16 = vld [vmem:[#allocation3 + $0x678] sm:$0xff] }
 0x6c3   :  { %1918 = vmatpush1.bf16.msra.mxu0 %v1707_v41  ;;  %2082 = vmatpush1.bf16.msra.mxu1 %v1709_v13  ;;  %v1770_v41 = vld [vmem:[#allocation3 + $0x7f8] sm:$0xff]  ;;  %v1767_v13 = vld [vmem:[#allocation3 + $0x7e0] sm:$0xff] }
 0x6c4   :  { %1919 = vmatprep.subr.bf16.mxu0 %v1712_v42  ;;  %2083 = vmatprep.subr.bf16.mxu1 %v1714_v4  ;;  %v1769_v42 = vld [vmem:[#allocation3 + $0x7f0] sm:$0xff] }
 0x6c5   :  { %1949 = vmatprep.mubr.bf16.mxu0 %v3822_v61  ;;  %2113 = vmatprep.mubr.bf16.mxu1 %v3822_v61  ;;  %v1723_v61 = vld [vmem:[#allocation3 + $0x680] sm:$0xff] }
 0x6c6   :  { %v3104_v4 = vld [vmem:[%s3962_s7 + $0x6] ss:$8 sm:$0xf] }
 0x6c7   :  { %1920 = vmatpush1.bf16.msra.mxu0 %v1711_v58  ;;  %2084 = vmatpush1.bf16.msra.mxu1 %v1713_v44  ;;  %v1777_v58 = vrot.slane %v3104_v4, %v3700_v9  ;;  %v1781_v44 = vrot.slane %v3104_v4, %v3703_v10 }
 0x6c8   :  { %1921 = vmatprep.subr.bf16.mxu0 %v1716_v45  ;;  %2085 = vmatprep.subr.bf16.mxu1 %v1718_v47  ;;  %v1785_v47 = vrot.slane %v3104_v4, %v3711_v14 }
 0x6cb   :  { %1922 = vmatpush1.bf16.msra.mxu0 %v1715_v48  ;;  %2086 = vmatpush1.bf16.msra.mxu1 %v1717_v59 }
 0x6cc   :  { %1923 = vmatprep.subr.bf16.mxu0 %v1720_v63  ;;  %2087 = vmatprep.subr.bf16.mxu1 %v1722_v16 }
 0x6cf   :  { %1924 = vmatpush1.bf16.msra.mxu0 %v1719_v50  ;;  %2088 = vmatpush1.bf16.msra.mxu1 %v1721_v51  ;;  %v1789_v51 = vrot.slane %v3104_v4, %v3714_v15  ;;  %v3454_v4 = vld [vmem:[#allocation7 + $0xd0] ss:$8 sps:$4 sm:$0xff]  }
 0x6d0   :  { %1925 = vmatprep.subr.bf16.mxu0 %v1724_v12  ;;  %2089 = vmatprep.subr.bf16.mxu1 %v1726_v7 }
 0x6d3   :  { %1926 = vmatpush1.bf16.msra.mxu0 %v1723_v61  ;;  %2090 = vmatpush1.bf16.msra.mxu1 %v1725_v37 }
 0x6d4   :  { %1927 = vmatprep.subr.bf16.mxu0 %v1728_v38  ;;  %2091 = vmatprep.subr.bf16.mxu1 %v1730_v39 }
 0x6d7   :  { %1928 = vmatpush1.bf16.msra.mxu0 %v1727_v40  ;;  %2092 = vmatpush1.bf16.msra.mxu1 %v1729_v43 }
 0x6d8   :  { %1929 = vmatprep.subr.bf16.mxu0 %v1732_v46  ;;  %2093 = vmatprep.subr.bf16.mxu1 %v1734_v49  ;;  %v3415_v46 = vld [vmem:[#allocation7] ss:$8 sps:$4 sm:$0xff]   ;;  %v3417_v49 = vld [vmem:[#allocation7 + $0x4] ss:$8 sps:$4 sm:$0xff]  }
 0x6db   :  { %1930 = vmatpush1.bf16.msra.mxu0 %v1731_v52  ;;  %2094 = vmatpush1.bf16.msra.mxu1 %v1733_v53  ;;  %v3420_v52 = vld [vmem:[#allocation7 + $0x14] ss:$8 sps:$4 sm:$0xff]   ;;  %v3418_v53 = vld [vmem:[#allocation7 + $0x10] ss:$8 sps:$4 sm:$0xff]  }
 0x6dc   :  { %1931 = vmatprep.subr.bf16.mxu0 %v1736_v54  ;;  %2095 = vmatprep.subr.bf16.mxu1 %v1738_v11  ;;  %v3423_v54 = vld [vmem:[#allocation7 + $0x24] ss:$8 sps:$4 sm:$0xff]   ;;  %v3421_v11 = vld [vmem:[#allocation7 + $0x20] ss:$8 sps:$4 sm:$0xff]  }
 0x6df   :  { %1932 = vmatpush1.bf16.msra.mxu0 %v1735_v55  ;;  %2096 = vmatpush1.bf16.msra.mxu1 %v1737_v57  ;;  %v3426_v55 = vld [vmem:[#allocation7 + $0x34] ss:$8 sps:$4 sm:$0xff]   ;;  %v3424_v57 = vld [vmem:[#allocation7 + $0x30] ss:$8 sps:$4 sm:$0xff]  }
 0x6e0   :  { %1933 = vmatprep.subr.bf16.mxu0 %v1740_v0  ;;  %2097 = vmatprep.subr.bf16.mxu1 %v1742_v1  ;;  %v3429_v0 = vld [vmem:[#allocation7 + $0x44] ss:$8 sps:$4 sm:$0xff]   ;;  %v3427_v1 = vld [vmem:[#allocation7 + $0x40] ss:$8 sps:$4 sm:$0xff]  }
 0x6e3   :  { %1934 = vmatpush1.bf16.msra.mxu0 %v1739_v2  ;;  %2098 = vmatpush1.bf16.msra.mxu1 %v1741_v3  ;;  %v3432_v2 = vld [vmem:[#allocation7 + $0x54] ss:$8 sps:$4 sm:$0xff]   ;;  %v3430_v3 = vld [vmem:[#allocation7 + $0x50] ss:$8 sps:$4 sm:$0xff]  }
 0x6e4   :  { %1935 = vmatprep.subr.bf16.mxu0 %v1744_v5  ;;  %2099 = vmatprep.subr.bf16.mxu1 %v1746_v6  ;;  %v3435_v5 = vld [vmem:[#allocation7 + $0x64] ss:$8 sps:$4 sm:$0xff]   ;;  %v3433_v6 = vld [vmem:[#allocation7 + $0x60] ss:$8 sps:$4 sm:$0xff]  }
 0x6e7   :  { %1936 = vmatpush1.bf16.msra.mxu0 %v1743_v17  ;;  %2100 = vmatpush1.bf16.msra.mxu1 %v1745_v18  ;;  %v3438_v17 = vld [vmem:[#allocation7 + $0x74] ss:$8 sps:$4 sm:$0xff]   ;;  %v3436_v18 = vld [vmem:[#allocation7 + $0x70] ss:$8 sps:$4 sm:$0xff]  }
 0x6e8   :  { %1937 = vmatprep.subr.bf16.mxu0 %v1748_v19  ;;  %2101 = vmatprep.subr.bf16.mxu1 %v1750_v20  ;;  %v3441_v19 = vld [vmem:[#allocation7 + $0x84] ss:$8 sps:$4 sm:$0xff]   ;;  %v3439_v20 = vld [vmem:[#allocation7 + $0x80] ss:$8 sps:$4 sm:$0xff]  }
 0x6eb   :  { %1938 = vmatpush1.bf16.msra.mxu0 %v1747_v21  ;;  %2102 = vmatpush1.bf16.msra.mxu1 %v1749_v22  ;;  %v3444_v21 = vld [vmem:[#allocation7 + $0x94] ss:$8 sps:$4 sm:$0xff]   ;;  %v3442_v22 = vld [vmem:[#allocation7 + $0x90] ss:$8 sps:$4 sm:$0xff]  }
 0x6ec   :  { %1939 = vmatprep.subr.bf16.mxu0 %v1752_v23  ;;  %2103 = vmatprep.subr.bf16.mxu1 %v1754_v24 }
 0x6ef   :  { %1940 = vmatpush1.bf16.msra.mxu0 %v1751_v25  ;;  %2104 = vmatpush1.bf16.msra.mxu1 %v1753_v26 }
 0x6f0   :  { %1941 = vmatprep.subr.bf16.mxu0 %v1756_v27  ;;  %2105 = vmatprep.subr.bf16.mxu1 %v1758_v28 }
 0x6f3   :  { %1942 = vmatpush1.bf16.msra.mxu0 %v1755_v29  ;;  %2106 = vmatpush1.bf16.msra.mxu1 %v1757_v30 }
 0x6f4   :  { %1943 = vmatprep.subr.bf16.mxu0 %v1760_v31  ;;  %2107 = vmatprep.subr.bf16.mxu1 %v1762_v32 }
 0x6f7   :  { %1944 = vmatpush1.bf16.msra.mxu0 %v1759_v8  ;;  %2108 = vmatpush1.bf16.msra.mxu1 %v1761_v33 }
 0x6f8   :  { %1945 = vmatprep.subr.bf16.mxu0 %v1764_v56  ;;  %2109 = vmatprep.subr.bf16.mxu1 %v1766_v34  ;;  %v3447_v34 = vld [vmem:[#allocation7 + $0xa4] ss:$8 sps:$4 sm:$0xff]  }
 0x6fb   :  { %1946 = vmatpush1.bf16.msra.mxu0 %v1763_v35  ;;  %2110 = vmatpush1.bf16.msra.mxu1 %v1765_v62  ;;  %v3445_v35 = vld [vmem:[#allocation7 + $0xa0] ss:$8 sps:$4 sm:$0xff]   ;;  %v3450_v62 = vld [vmem:[#allocation7 + $0xb4] ss:$8 sps:$4 sm:$0xff]  }
 0x6fc   :  { %1947 = vmatprep.subr.bf16.mxu0 %v1768_v36  ;;  %2111 = vmatprep.subr.bf16.mxu1 %v1770_v41  ;;  %v3448_v36 = vld [vmem:[#allocation7 + $0xb0] ss:$8 sps:$4 sm:$0xff]   ;;  %v3453_v41 = vld [vmem:[#allocation7 + $0xc4] ss:$8 sps:$4 sm:$0xff]  }
 0x6ff   :  { %1948 = vmatpush1.bf16.msra.mxu0 %v1767_v13  ;;  %2112 = vmatpush1.bf16.msra.mxu1 %v1769_v42  ;;  %v3451_v13 = vld [vmem:[#allocation7 + $0xc0] ss:$8 sps:$4 sm:$0xff]   ;;  %v3456_v42 = vld [vmem:[#allocation7 + $0xd4] ss:$8 sps:$4 sm:$0xff]  }
 0x700   :  { %2607 = vmatprep.subr.bf16.mxu0 %v3417_v49 }
 0x702   :  { %1950 = vmatmul.mubr.bf16.vlgmr.msra.gmra.mrb[8].mxu0 %v3820_v60  ;;  %2114 = vmatmul.mubr.bf16.vlgmr.msra.gmra.mrb[16].mxu1 %v3820_v60 }
 0x703   :  { %2608 = vmatpush1.bf16.msra.mxu0 %v3415_v46 }
 0x704   :  { %2609 = vmatprep.subr.bf16.mxu0 %v3420_v52 }
 0x707   :  { %2610 = vmatpush1.bf16.msra.mxu0 %v3418_v53 }
 0x708   :  { %2611 = vmatprep.subr.bf16.mxu0 %v3423_v54 }
 0x70b   :  { %2612 = vmatpush1.bf16.msra.mxu0 %v3421_v11 }
 0x70c   :  { %2613 = vmatprep.subr.bf16.mxu0 %v3426_v55 }
 0x70f   :  { %2614 = vmatpush1.bf16.msra.mxu0 %v3424_v57 }
 0x710   :  { %2615 = vmatprep.subr.bf16.mxu0 %v3429_v0 }
 0x713   :  { %2616 = vmatpush1.bf16.msra.mxu0 %v3427_v1 }
 0x714   :  { %2617 = vmatprep.subr.bf16.mxu0 %v3432_v2 }
 0x717   :  { %2618 = vmatpush1.bf16.msra.mxu0 %v3430_v3 }
 0x718   :  { %2619 = vmatprep.subr.bf16.mxu0 %v3435_v5 }
 0x71b   :  { %2620 = vmatpush1.bf16.msra.mxu0 %v3433_v6 }
 0x71c   :  { %2621 = vmatprep.subr.bf16.mxu0 %v3438_v17 }
 0x71f   :  { %2622 = vmatpush1.bf16.msra.mxu0 %v3436_v18 }
 0x720   :  { %2623 = vmatprep.subr.bf16.mxu0 %v3441_v19 }
 0x723   :  { %2624 = vmatpush1.bf16.msra.mxu0 %v3439_v20 }
 0x724   :  { %2625 = vmatprep.subr.bf16.mxu0 %v3444_v21  ;;  %v3466_v21 = vld [vmem:[#allocation7 + $0x110] ss:$8 sps:$4 sm:$0xff]  }
 0x727   :  { %2626 = vmatpush1.bf16.msra.mxu0 %v3442_v22  ;;  %v3471_v22 = vld [vmem:[#allocation7 + $0x124] ss:$8 sps:$4 sm:$0xff]  }
 0x728   :  { %2627 = vmatprep.subr.bf16.mxu0 %v3447_v34  ;;  %v3492_v34 = vld [vmem:[#allocation7 + $0x194] ss:$8 sps:$4 sm:$0xff]  }
 0x72b   :  { %2628 = vmatpush1.bf16.msra.mxu0 %v3445_v35  ;;  %v3490_v35 = vld [vmem:[#allocation7 + $0x190] ss:$8 sps:$4 sm:$0xff]  }
 0x72c   :  { %2629 = vmatprep.subr.bf16.mxu0 %v3450_v62  ;;  %v3495_v62 = vld [vmem:[#allocation7 + $0x1a4] ss:$8 sps:$4 sm:$0xff]  }
 0x72f   :  { %2630 = vmatpush1.bf16.msra.mxu0 %v3448_v36  ;;  %v3493_v36 = vld [vmem:[#allocation7 + $0x1a0] ss:$8 sps:$4 sm:$0xff]  }
 0x730   :  { %2631 = vmatprep.subr.bf16.mxu0 %v3453_v41  ;;  %v3498_v41 = vld [vmem:[#allocation7 + $0x1b4] ss:$8 sps:$4 sm:$0xff]  }
 0x733   :  { %2632 = vmatpush1.bf16.msra.mxu0 %v3451_v13  ;;  %v3496_v13 = vld [vmem:[#allocation7 + $0x1b0] ss:$8 sps:$4 sm:$0xff]  }
 0x734   :  { %2633 = vmatprep.subr.bf16.mxu0 %v3456_v42  ;;  %v3501_v42 = vld [vmem:[#allocation7 + $0x1c4] ss:$8 sps:$4 sm:$0xff]  }
 0x737   :  { %2634 = vmatpush1.bf16.msra.mxu0 %v3454_v4  ;;  %v3499_v4 = vld [vmem:[#allocation7 + $0x1c0] ss:$8 sps:$4 sm:$0xff]  }
 0x7d5   :  { %v1951_v45 = vpop.f32.mrb[8].mxu0  ;;  %v2115_v48 = vpop.f32.mrb[16].mxu1 }
 0x7d6   :  { %v3244_v59 = vadd.f32 %v1951_v45, %v1777_v58  ;;  %v1953_v63 = vpop.f32.mrb[9].mxu0  ;;  %v2117_v16 = vpop.f32.mrb[17].mxu1  ;;  %v3246_v37 = vadd.f32 %v2115_v48, %v1785_v47  ;;  %v3459_v58 = vld [vmem:[#allocation7 + $0xe4] ss:$8 sps:$4 sm:$0xff]   ;;  %v3462_v45 = vld [vmem:[#allocation7 + $0xf4] ss:$8 sps:$4 sm:$0xff]  }
 0x7d7   :  { %v3245_v50 = vadd.f32 %v1953_v63, %v1781_v44  ;;  %v1955_v12 = vpop.f32.mrb[10].mxu0  ;;  %v2119_v60 = vpop.f32.mrb[18].mxu1  ;;  %v3247_v39 = vadd.f32 %v2117_v16, %v1789_v51  ;;  %v3457_v44 = vld [vmem:[#allocation7 + $0xe0] ss:$8 sps:$4 sm:$0xff]   ;;  %2635 = vmatprep.subr.bf16.mxu0 %v3459_v58  ;;  %v3460_v47 = vld [vmem:[#allocation7 + $0xf0] ss:$8 sps:$4 sm:$0xff]  }
 0x7d8   :  { %v1956_v7 = vpop.f32.mrb[11].mxu0  ;;  %v2120_v61 = vpop.f32.mrb[19].mxu1  ;;  %2636 = vmatpush1.bf16.msra.mxu0 %v3457_v44  ;;  %v3465_v48 = vld [vmem:[#allocation7 + $0x104] ss:$8 sps:$4 sm:$0xff]   ;;  %v3504_v58 = vld [vmem:[#allocation7 + $0x1d4] ss:$8 sps:$4 sm:$0xff]  }
 0x7d9   :  { %v2122_v38 = vadd.f32 %v3245_v50, %v3244_v59  ;;  %2637 = vmatprep.subr.bf16.mxu0 %v3462_v45  ;;  %v3106_v51 = vld [vmem:[%s3962_s7 + $0x40] ss:$8 sm:$0xf]  ;;  %v3507_v45 = vld [vmem:[#allocation7 + $0x1e4] ss:$8 sps:$4 sm:$0xff]  }
 0x7da   :  { %v3502_v44 = vld [vmem:[#allocation7 + $0x1d0] ss:$8 sps:$4 sm:$0xff]  }
 0x7db   :  { %v2123_v40 = vadd.f32 %v3246_v37, %v2122_v38  ;;  %v2185_v38 = vrot.slane %v3106_v51, %v3703_v10 }
 0x7dc   :  { %2638 = vmatpush1.bf16.msra.mxu0 %v3460_v47  ;;  %v3505_v47 = vld [vmem:[#allocation7 + $0x1e0] ss:$8 sps:$4 sm:$0xff]  }
 0x7dd   :  { %v2124_v43 = vadd.f32 %v3247_v39, %v2123_v40  ;;  %2648 = vmatprep.subr.bf16.mxu0 %v3465_v48  ;;  %v2193_v40 = vrot.slane %v3106_v51, %v3714_v15  ;;  %v3510_v48 = vld [vmem:[#allocation7 + $0x1f4] ss:$8 sps:$4 sm:$0xff]  }
 0x7df   :  { %2125 = vadd.xlane.f32.xlu0 %v2124_v43  ;;  %v2189_v43 = vrot.slane %v3106_v51, %v3711_v14 }
 0x86c   :  { %v2126_v23 = vpop.xlane.xlu0 %2125 }
 0x86d   :  { %v2127_v24 = vmul.f32 0.001953125, %v2126_v23  ;;  %v3469_v23 = vld [vmem:[#allocation7 + $0x120] ss:$8 sps:$4 sm:$0xff]  }
 0x86f   :  { %v2128_v25 = vsub.f32 %v3244_v59, %v2127_v24  ;;  %v2129_v26 = vsub.f32 %v3245_v50, %v2127_v24  ;;  %v2130_v27 = vsub.f32 %v3246_v37, %v2127_v24  ;;  %v2131_v28 = vsub.f32 %v3247_v39, %v2127_v24  ;;  %v3105_v50 = vld [vmem:[%s3962_s7 + $0x7] ss:$8 sm:$0xf] }
 0x870   :  { %v2158_v12 = vrot.slane %v3105_v50, %v3703_v10  ;;  %v2154_v60 = vrot.slane %v3105_v50, %v3700_v9  ;;  %v2166_v7 = vrot.slane %v3105_v50, %v3714_v15  ;;  %v2162_v61 = vrot.slane %v3105_v50, %v3711_v14  ;;  %v3463_v15 = vld [vmem:[#allocation7 + $0x100] ss:$8 sps:$4 sm:$0xff]   ;;  %v3468_v14 = vld [vmem:[#allocation7 + $0x114] ss:$8 sps:$4 sm:$0xff]  }
 0x871   :  { %v2132_v29 = vmul.f32 %v2128_v25, %v2128_v25  ;;  %v2133_v30 = vmul.f32 %v2129_v26, %v2129_v26  ;;  %v2134_v31 = vmul.f32 %v2130_v27, %v2130_v27  ;;  %v2135_v8 = vmul.f32 %v2131_v28, %v2131_v28  ;;  %v3474_v24 = vld [vmem:[#allocation7 + $0x134] ss:$8 sps:$4 sm:$0xff]   ;;  %v3107_v50 = vld [vmem:[%s3962_s7 + $0x41] ss:$8 sm:$0x3] }
 0x872   :  { %v2181_v39 = vrot.slane %v3106_v51, %v3700_v9  ;;  %v2280_v51 = vrot.slane %v3107_v50, %v3700_v9 }
 0x873   :  { %v2136_v32 = vadd.f32 %v2133_v30, %v2132_v29  ;;  %v3478_v29 = vld [vmem:[#allocation7 + $0x150] ss:$8 sps:$4 sm:$0xff]   ;;  %v3483_v30 = vld [vmem:[#allocation7 + $0x164] ss:$8 sps:$4 sm:$0xff]  }
 0x875   :  { %v2137_v33 = vadd.f32 %v2136_v32, %v2134_v31  ;;  %v3481_v31 = vld [vmem:[#allocation7 + $0x160] ss:$8 sps:$4 sm:$0xff]   ;;  %v3486_v32 = vld [vmem:[#allocation7 + $0x174] ss:$8 sps:$4 sm:$0xff]  }
 0x877   :  { %v2138_v56 = vadd.f32 %v2137_v33, %v2135_v8  ;;  %v3484_v8 = vld [vmem:[#allocation7 + $0x170] ss:$8 sps:$4 sm:$0xff]   ;;  %v3489_v33 = vld [vmem:[#allocation7 + $0x184] ss:$8 sps:$4 sm:$0xff]  }
 0x879   :  { %2139 = vadd.xlane.f32.xlu0 %v2138_v56  ;;  %v3487_v56 = vld [vmem:[#allocation7 + $0x180] ss:$8 sps:$4 sm:$0xff]  }
 0x906   :  { %v2140_v59 = vpop.xlane.xlu0 %2139 }
 0x907   :  { %v2141_v63 = vmul.f32 0.001953125, %v2140_v59  ;;  %v3508_v59 = vld [vmem:[#allocation7 + $0x1f0] ss:$8 sps:$4 sm:$0xff]  }
 0x909   :  { %v2142_v16 = vadd.f32 1e-05, %v2141_v63 }
 0x90b   :  { %3531 = vrsqrt.f32 %v2142_v16 }
 0x915   :  { %v3532_v37 = vpop.eup %3531 }
 0x916   :  { %v2145_v46 = vmul.f32 %v3532_v37, %v2129_v26  ;;  %v2144_v49 = vmul.f32 %v3532_v37, %v2128_v25  ;;  %v2147_v52 = vmul.f32 %v3532_v37, %v2131_v28  ;;  %v2146_v53 = vmul.f32 %v3532_v37, %v2130_v27  ;;  %v3472_v25 = vld [vmem:[#allocation7 + $0x130] ss:$8 sps:$4 sm:$0xff]   ;;  %v3477_v26 = vld [vmem:[#allocation7 + $0x144] ss:$8 sps:$4 sm:$0xff]   ;;  %v3475_v27 = vld [vmem:[#allocation7 + $0x140] ss:$8 sps:$4 sm:$0xff]  }
 0x917   :  { %v3480_v28 = vld [vmem:[#allocation7 + $0x154] ss:$8 sps:$4 sm:$0xff]  }
 0x918   :  { %v2172_v54 = vmul.f32 %v2158_v12, %v2145_v46  ;;  %v2171_v11 = vmul.f32 %v2154_v60, %v2144_v49  ;;  %v2174_v55 = vmul.f32 %v2166_v7, %v2147_v52  ;;  %v2173_v57 = vmul.f32 %v2162_v61, %v2146_v53  ;;  %v3512_v46 = vld [vmem:[%s3960_s5] sm:$0xff]   ;;  %v3513_v49 = vld [vmem:[%s3960_s5 + $0x48] sm:$0xff]  }
 0x919   :  { %v2284_v12 = vrot.slane %v3107_v50, %v3703_v10  ;;  %v3514_v52 = vld [vmem:[%s3960_s5 + $0x8] sm:$0xff]  }
 0x91a   :  { %v2199_v0 = vadd.f32 %v2185_v38, %v2172_v54  ;;  %v2198_v1 = vadd.f32 %v2181_v39, %v2171_v11  ;;  %v2201_v2 = vadd.f32 %v2193_v40, %v2174_v55  ;;  %v3859_v3 = vadd.f32 %v2189_v43, %v2173_v57  ;;  %v3511_v43 = vld [vmem:[%s3960_s5 + $0x40] sm:$0xff]  }
 0x91c   :  { %v2203_v5 = vmax.f32 %v2199_v0, 0.0  ;;  %v2202_v6 = vmax.f32 %v2198_v1, 0.0  ;;  %v2205_v17 = vmax.f32 %v2201_v2, 0.0  ;;  %v2204_v63 = vmax.f32 %v3859_v3, 0.0  ;;  %v3515_v2 = vld [vmem:[%s3960_s5 + $0x50] sm:$0xff]  }
 0x91d   :  { %v3516_v3 = vld [vmem:[%s3960_s5 + $0x10] sm:$0xff]  }
 0x91e   :  { %v2207_v18 = vpack.c.bf16 %v2203_v5, %v2203_v5  ;;  %v2206_v19 = vpack.c.bf16 %v2202_v6, %v2202_v6  ;;  %v2209_v20 = vpack.c.bf16 %v2205_v17, %v2205_v17  ;;  %v2208_v16 = vpack.c.bf16 %v2204_v63, %v2204_v63  ;;  %v3517_v5 = vld [vmem:[%s3960_s5 + $0x58] sm:$0xff]   ;;  %v3519_v17 = vld [vmem:[%s3960_s5 + $0x60] sm:$0xff]  }
 0x91f   :  { %v3518_v6 = vld [vmem:[%s3960_s5 + $0x18] sm:$0xff]  }
 0x920   :  { %2639 = vmatprep.mubr.bf16.mxu0 %v2207_v18  ;;  %v3520_v18 = vld [vmem:[%s3960_s5 + $0x20] sm:$0xff]  }
 0x921   :  { %2640 = vmatmul.mubr.bf16.vlgmr.msra.gmra.mrb[12].mxu0 %v2206_v19  ;;  %v3522_v19 = vld [vmem:[%s3960_s5 + $0x28] sm:$0xff]  }
 0x922   :  { %2649 = vmatpush1.bf16.msra.mxu0 %v3463_v15  ;;  %2680 = vmatprep.mubr.bf16.mxu0 %v2209_v20  ;;  %v3521_v15 = vld [vmem:[%s3960_s5 + $0x68] sm:$0xff]   ;;  %v3524_v20 = vld [vmem:[%s3960_s5 + $0x30] sm:$0xff]  }
 0x923   :  { %2650 = vmatprep.subr.bf16.mxu0 %v3468_v14  ;;  %v3523_v14 = vld [vmem:[%s3960_s5 + $0x70] sm:$0xff]  }
 0x926   :  { %2651 = vmatpush1.bf16.msra.mxu0 %v3466_v21  ;;  %v3525_v21 = vld [vmem:[%s3960_s5 + $0x78] sm:$0xff]  }
 0x927   :  { %2652 = vmatprep.subr.bf16.mxu0 %v3471_v22  ;;  %v3526_v22 = vld [vmem:[%s3960_s5 + $0x38] sm:$0xff]  }
 0x92a   :  { %2653 = vmatpush1.bf16.msra.mxu0 %v3469_v23 }
 0x92b   :  { %2654 = vmatprep.subr.bf16.mxu0 %v3474_v24 }
 0x92e   :  { %2655 = vmatpush1.bf16.msra.mxu0 %v3472_v25 }
 0x92f   :  { %2656 = vmatprep.subr.bf16.mxu0 %v3477_v26  ;;  %v3172_v26 = vld [vmem:[%s3962_s7 + $0x42] ss:$8 sm:$0x3] }
 0x932   :  { %2657 = vmatpush1.bf16.msra.mxu0 %v3475_v27  ;;  %v3173_v27 = vld [vmem:[%s3962_s7 + $0x43] ss:$8 sm:$0x3] }
 0x933   :  { %2658 = vmatprep.subr.bf16.mxu0 %v3480_v28  ;;  %v2712_v28 = vrot.slane %v3172_v26, %v3700_v9 }
 0x936   :  { %2659 = vmatpush1.bf16.msra.mxu0 %v3478_v29  ;;  %v2716_v29 = vrot.slane %v3172_v26, %v3703_v10 }
 0x937   :  { %2660 = vmatprep.subr.bf16.mxu0 %v3483_v30 }
 0x93a   :  { %2661 = vmatpush1.bf16.msra.mxu0 %v3481_v31 }
 0x93b   :  { %2662 = vmatprep.subr.bf16.mxu0 %v3486_v32  ;;  %v2727_v32 = vrot.slane %v3173_v27, %v3700_v9 }
 0x93e   :  { %2663 = vmatpush1.bf16.msra.mxu0 %v3484_v8  ;;  %v2731_v8 = vrot.slane %v3173_v27, %v3703_v10 }
 0x93f   :  { %2664 = vmatprep.subr.bf16.mxu0 %v3489_v33 }
 0x942   :  { %2665 = vmatpush1.bf16.msra.mxu0 %v3487_v56 }
 0x943   :  { %2666 = vmatprep.subr.bf16.mxu0 %v3492_v34 }
 0x946   :  { %2667 = vmatpush1.bf16.msra.mxu0 %v3490_v35 }
 0x947   :  { %2668 = vmatprep.subr.bf16.mxu0 %v3495_v62 }
 0x94a   :  { %2669 = vmatpush1.bf16.msra.mxu0 %v3493_v36 }
 0x94b   :  { %2670 = vmatprep.subr.bf16.mxu0 %v3498_v41 }
 0x94e   :  { %2671 = vmatpush1.bf16.msra.mxu0 %v3496_v13 }
 0x94f   :  { %2672 = vmatprep.subr.bf16.mxu0 %v3501_v42 }
 0x952   :  { %2673 = vmatpush1.bf16.msra.mxu0 %v3499_v4 }
 0x953   :  { %2674 = vmatprep.subr.bf16.mxu0 %v3504_v58 }
 0x956   :  { %2675 = vmatpush1.bf16.msra.mxu0 %v3502_v44  ;;  %v2772_v44 = vld [vmem:[%s3962_s7 + $0x44] ss:$0 sm:$0xff] }
 0x957   :  { %2676 = vmatprep.subr.bf16.mxu0 %v3507_v45 }
 0x95a   :  { %2677 = vmatpush1.bf16.msra.mxu0 %v3505_v47 }
 0x95b   :  { %2678 = vmatprep.subr.bf16.mxu0 %v3510_v48 }
 0x95e   :  { %2679 = vmatpush1.bf16.msra.mxu0 %v3508_v59 }
 0x95f   :  { %3197 = vmatprep.subr.bf16.mxu0 %v3511_v43 }
 0x961   :  { %2681 = vmatmul.mubr.bf16.vlgmr.msra.gmra.mrb[12].mxu0 %v2208_v16 }
 0x962   :  { %3198 = vmatpush3.bf16.msra.mxu0 %v3512_v46  ;;  %v2924_v46 = vld [vmem:[%s3962_s7 + $0x45] ss:$0 sm:$0xff] }
 0x963   :  { %3199 = vmatprep.subr.bf16.mxu0 %v3513_v49 }
 0x966   :  { %3200 = vmatpush3.bf16.msra.mxu0 %v3514_v52  ;;  %v2926_v52 = vld [vmem:[%s3962_s7 + $0x46] ss:$0 sm:$0xff] }
 0x967   :  { %3201 = vmatprep.subr.bf16.mxu0 %v3515_v2 }
 0x96a   :  { %3202 = vmatpush3.bf16.msra.mxu0 %v3516_v3 }
 0x96b   :  { %3203 = vmatprep.subr.bf16.mxu0 %v3517_v5 }
 0x96e   :  { %3204 = vmatpush3.bf16.msra.mxu0 %v3518_v6 }
 0x96f   :  { %3205 = vmatprep.subr.bf16.mxu0 %v3519_v17 }
 0x972   :  { %3206 = vmatpush3.bf16.msra.mxu0 %v3520_v18 }
 0x973   :  { %3207 = vmatprep.subr.bf16.mxu0 %v3521_v15 }
 0x976   :  { %3208 = vmatpush3.bf16.msra.mxu0 %v3522_v19 }
 0x977   :  { %3209 = vmatprep.subr.bf16.mxu0 %v3523_v14 }
 0x97a   :  { %3210 = vmatpush3.bf16.msra.mxu0 %v3524_v20 }
 0x97b   :  { %3211 = vmatprep.subr.bf16.mxu0 %v3525_v21 }
 0x97e   :  { %3212 = vmatpush3.bf16.msra.mxu0 %v3526_v22 }
 0xa34   :  { %v2682_v60 = vpop.f32.mrb[12].mxu0 }
 0xa35   :  { %v3248_v7 = vadd.f32 %v2682_v60, %v2280_v51  ;;  %v2684_v61 = vpop.f32.mrb[13].mxu0  ;;  %v3606_v60 = vmov 0.0  }
 0xa36   :  { %v3249_v37 = vadd.f32 %v2684_v61, %v2284_v12  ;;  %v2686_v38 = vpop.f32.mrb[14].mxu0  ;;  %v3527_v12 = vld [vmem:[%s3961_s6] sm:$0xff]   ;;  %3224 = vmatprep.subr.bf16.mxu1 %v3606_v60  ;;  %v3529_v61 = vld [vmem:[%s3961_s6 + $0x10] sm:$0xff]   ;;  %3232 = vmatprep.mubr.msk.bf16.mxu1 %vm3607_vm1, %v3606_v60 }
 0xa37   :  { %v2687_v39 = vpop.f32.mrb[15].mxu0  ;;  %3225 = vmatpush3.bf16.msra.mxu1 %v3527_v12 }
 0xa38   :  { %v2689_v40 = vadd.f32 %v3249_v37, %v3248_v7  ;;  %3226 = vmatprep.subr.bf16.mxu1 %v3606_v60 }
 0xa3a   :  { %2690 = vadd.xlane.f32.xlu1 %v2689_v40 }
 0xac7   :  { %v2691_v53 = vpop.xlane.xlu1 %2690 }
 0xac8   :  { %v2693_v54 = vmul.f32 0.00390625, %v2691_v53 }
 0xaca   :  { %v2694_v11 = vsub.f32 %v3248_v7, %v2693_v54  ;;  %v2695_v55 = vsub.f32 %v3249_v37, %v2693_v54  ;;  %v3528_v7 = vld [vmem:[%s3961_s6 + $0x8] sm:$0xff]   ;;  %v3530_v37 = vld [vmem:[%s3961_s6 + $0x18] sm:$0xff]  }
 0xacb   :  { %3227 = vmatpush3.bf16.msra.mxu1 %v3528_v7 }
 0xacc   :  { %v2696_v57 = vmul.f32 %v2694_v11, %v2694_v11  ;;  %v2697_v0 = vmul.f32 %v2695_v55, %v2695_v55  ;;  %3228 = vmatprep.subr.bf16.mxu1 %v3606_v60 }
 0xace   :  { %v2698_v1 = vadd.f32 %v2697_v0, %v2696_v57  ;;  %v2938_v57 = vld [vmem:[%s3962_s7 + $0x47] ss:$0 sm:$0xff] }
 0xacf   :  { %3229 = vmatpush3.bf16.msra.mxu1 %v3529_v61 }
 0xad0   :  { %2699 = vadd.xlane.f32.xlu1 %v2698_v1  ;;  %3230 = vmatprep.subr.bf16.mxu1 %v3606_v60 }
 0xad3   :  { %3231 = vmatpush3.bf16.msra.mxu1 %v3530_v37 }
 0xb5d   :  { %v2700_v23 = vpop.xlane.xlu1 %2699 }
 0xb5e   :  { %v2701_v24 = vmul.f32 0.00390625, %v2700_v23 }
 0xb60   :  { %v2702_v25 = vadd.f32 1e-05, %v2701_v24 }
 0xb62   :  { %3533 = vrsqrt.f32 %v2702_v25 }
 0xb6c   :  { %v3534_v30 = vpop.eup %3533 }
 0xb6d   :  { %v2705_v31 = vmul.f32 %v3534_v30, %v2695_v55  ;;  %v2704_v33 = vmul.f32 %v3534_v30, %v2694_v11 }
 0xb6f   :  { %v2720_v56 = vmul.f32 %v2716_v29, %v2705_v31  ;;  %v2719_v34 = vmul.f32 %v2712_v28, %v2704_v33 }
 0xb71   :  { %v2735_v35 = vadd.f32 %v2731_v8, %v2720_v56  ;;  %v2734_v62 = vadd.f32 %v2727_v32, %v2719_v34 }
 0xb73   :  { %v2737_v36 = vmax.f32 %v2735_v35, 0.0  ;;  %v2736_v41 = vmax.f32 %v2734_v62, 0.0 }
 0xb75   :  { %v2739_v13 = vpack.c.bf16 %v2737_v36, %v2737_v36  ;;  %v2738_v42 = vpack.c.bf16 %v2736_v41, %v2736_v41 }
 0xb77   :  { %2901 = vmatprep.mubr.bf16.mxu0 %v2739_v13 }
 0xb78   :  { %2902 = vmatmul.mubr.bf16.vlgmr.msra.gmra.mrb[16].mxu0 %v2738_v42 }
 0xc4b   :  { %v3213_v4 = vpop.f32.mrb[16].mxu0 }
 0xc4c   :  { %v3214_v58 = vpop.f32.mrb[17].mxu0 }
 0xc4d   :  { %v3215_v9 = vadd.f32 %v3214_v58, %v3213_v4  ;;  %v3216_v45 = vpop.f32.mrb[18].mxu0 }
 0xc4e   :  { %v3217_v10 = vpop.f32.mrb[19].mxu0 }
 0xc4f   :  { %v2904_v47 = vadd.f32 %v3215_v9, %v2772_v44 }
 0xc51   :  { %v2910_v48 = vsel %vm2909_vm0, %v2904_v47, 0.0 }
 0xc52   :  { %2911 = vadd.xlane.f32.xlu0 %v2910_v48 }
 0xcdf   :  { %v2912_v59 = vpop.xlane.xlu0 %2911 }
 0xce0   :  { %v2914_v63 = vmul.f32 0.015625, %v2912_v59 }
 0xce2   :  { %v2915_v16 = vsub.f32 %v2904_v47, %v2914_v63 }
 0xce4   :  { %v2916_v50 = vmul.f32 %v2915_v16, %v2915_v16 }
 0xce6   :  { %v2917_v51 = vsel %vm2909_vm0, %v2916_v50, 0.0 }
 0xce7   :  { %2918 = vadd.xlane.f32.xlu1 %v2917_v51 }
 0xd74   :  { %v2919_v38 = vpop.xlane.xlu1 %2918 }
 0xd75   :  { %v2920_v39 = vmul.f32 0.015625, %v2919_v38 }
 0xd77   :  { %v2921_v40 = vadd.f32 1e-05, %v2920_v39 }
 0xd79   :  { %3535 = vrsqrt.f32 %v2921_v40 }
 0xd83   :  { %v3536_v43 = vpop.eup %3535 }
 0xd84   :  { %v2923_v49 = vmul.f32 %v3536_v43, %v2915_v16 }
 0xd86   :  { %v2925_v53 = vmul.f32 %v2924_v46, %v2923_v49 }
 0xd88   :  { %v2927_v54 = vadd.f32 %v2926_v52, %v2925_v53 }
 0xd8a   :  { %v2928_v11 = vmax.f32 %v2927_v54, 0.0 }
 0xd8c   :  { %v2929_v55 = vpack.c.bf16 %v2928_v11, %v2928_v11 }
 0xd8e   :  { %3233 = vmatmul.mubr.msk.bf16.vlgmr.msra.gmra.mrb[20].mxu1 %vm2909_vm0, %v2929_v55 }
 0xe61   :  { %v3000_v0 = vpop.f32.mrb[20].mxu1 }
 0xe62   :  { %v3001_v1 = vadd.f32 %v3000_v0, %v2938_v57  ;;  %v3234_v2 = vpop.f32.mrb[21].mxu1 }
 0xe63   :  { %v3003_v3 = vpop.f32.mrb[22].mxu1 }
 0xe64   :  { %3006 = vst [vmem:[%s3963_s8] sm:$0xff] %v3001_v1  ;;  %v3235_v5 = vpop.f32.mrb[23].mxu1 }
 0xe65   :  { %3011 = vsyncpa [#allocation6], 1 }
 0xe66   :  { %3012 = vsyncpa [#allocation8], 1 }
 0xe67   :  { %3013 = vsyncmov [#allocation4] }
 0xe6a   :  { %s3014_s28 = vpop.sfrf %3013 }
 0xe6b   :  { %p3195_p2 = scmp.ne.s32.totalorder %s3014_s28, 0 }
 0xe6d   :  { %3018 = shalt.err (%p3195_p2)  }
 0xe6e   :  { %3020 = vsyncmov [#allocation4 + $0x1] }
 0xe71   :  { %s3021_s2 = vpop.sfrf %3020 }
 0xe72   :  { %p3196_p3 = scmp.ne.s32.totalorder %s3021_s2, 0 }
 0xe74   :  { %3025 = shalt.err (%p3196_p3)  }

</bundles_post_ra>
